<compile_context>
chip_gen: v7x
topology: tpu7x:2x2x1
jax: 0.10.0
libtpu: 0.0.40
codegen_flags: <defaults>
</compile_context>

<pallas_src>
import jax
import jax.numpy as jnp
from jax.experimental import pallas as pl
from jax.experimental.pallas import tpu as pltpu

# ---- small synthetic flan-t5-like config ----
VOCAB = 64
D_MODEL = 32
N_HEADS = 4
D_KV = 8
D_FF = 64
N_ENC_LAYERS = 1
N_DEC_LAYERS = 1
REL_BUCKETS = 8
REL_MAX_DIST = 16
PAD_TOKEN_ID = 1          # T5 eos id; module sets pad_token = eos_token
LN_EPS = 1e-6
NEG_INF = -1e9
HDK = N_HEADS * D_KV      # 32


# ---------------- single fused Pallas kernel (one batch row per grid step) ----------------
def _model_kernel(
    ids_ref, emb_ref, enc_bias_ref, dec_bias_ref, cross_bias_ref,
    e_ln_sa_ref, e_wqkv_ref, e_wo_ref, e_ln_ff_ref, e_wi_ref, e_wof_ref, e_fln_ref,
    d_ln_sa_ref, d_wqkv_ref, d_wo_ref, d_ln_ca_ref, d_cq_ref, d_ckv_ref, d_co_ref,
    d_ln_ff_ref, d_wi_ref, d_wof_ref, d_fln_ref,
    out_ref,
):
    S = ids_ref.shape[1]
    ids = ids_ref[0]                                             # (S, 1) int32

    # ---- embedding lookup: bf16 one-hot (exact) x bf16 table on the MXU, f32 acc ----
    onehot = (ids == jax.lax.broadcasted_iota(jnp.int32, (S, VOCAB), 1)).astype(jnp.bfloat16)
    x_emb = jnp.dot(onehot, emb_ref[...], preferred_element_type=jnp.float32)   # (S, D) f32

    enc_bias = enc_bias_ref[0]       # (H, S, S)  rel bias + key-padding mask
    dec_bias = dec_bias_ref[...]     # (H, S, S)  rel bias + causal mask
    cross_bias = cross_bias_ref[0]   # (H, S, S)  key-padding mask

    # ---- fp32 RMSNorm (T5 LayerNorm: no mean subtraction, no bias) ----
    def rms(x, w):
        var = jnp.mean(x * x, axis=-1, keepdims=True)
        return x * jax.lax.rsqrt(var + LN_EPS) * w

    # ---- bf16 MXU inputs, fp32 accumulation ----
    def mm_b(xb, w):                                  # xb already bf16
        return jnp.dot(xb, w, preferred_element_type=jnp.float32)

    def mm(x, w):
        return mm_b(x.astype(jnp.bfloat16), w)

    def gelu_new(x):   # tanh approximation (flan-t5 gated-gelu)
        return 0.5 * x * (1.0 + jnp.tanh(0.7978845608028654 *
                                         (x + 0.044715 * x * x * x)))

    def heads(x):      # (T, H*d_kv) -> (H, T, d_kv)
        return jnp.transpose(x.reshape(x.shape[0], N_HEADS, D_KV), (1, 0, 2))

    # ---- head-batched attention; softmax in fp32; T5 does NOT scale by 1/sqrt(d) ----
    def attention(q, k, v, bias):
        qh, kh, vh = heads(q), heads(k), heads(v)
        s = jnp.einsum('hqd,hkd->hqk', qh, kh,
                       preferred_element_type=jnp.float32) + bias          # (H, Tq, Tk)
        s = s - jnp.max(s, axis=-1, keepdims=True)
        p = jnp.exp(s)
        p = p * pl.reciprocal(jnp.sum(p, axis=-1, keepdims=True), approx=True)
        ctx = jnp.einsum('hqk,hkd->hqd', p, vh,
                         preferred_element_type=jnp.float32)               # (H, Tq, d_kv)
        return jnp.transpose(ctx, (1, 0, 2)).reshape(q.shape[0], HDK)      # (Tq, H*d_kv)

    def ffn(x, wi_ref, wof_ref, l):
        xb = x.astype(jnp.bfloat16)                                        # cast once, 2 matmuls
        return mm(gelu_new(mm_b(xb, wi_ref[l, 0])) * mm_b(xb, wi_ref[l, 1]), wof_ref[l])

    # ---------------- encoder ----------------
    x = x_emb
    for l in range(N_ENC_LAYERS):
        hb = rms(x, e_ln_sa_ref[l]).astype(jnp.bfloat16)                   # cast once, 3 matmuls
        q = mm_b(hb, e_wqkv_ref[l, 0])
        k = mm_b(hb, e_wqkv_ref[l, 1])
        v = mm_b(hb, e_wqkv_ref[l, 2])
        x = x + mm(attention(q, k, v, enc_bias), e_wo_ref[l])
        x = x + ffn(rms(x, e_ln_ff_ref[l]), e_wi_ref, e_wof_ref, l)
    enc_out = rms(x, e_fln_ref[...])                                       # (S, D)
    enc_out_bf = enc_out.astype(jnp.bfloat16)                              # cast once for all layers

    # ---------------- decoder (decoder_input_ids = input_ids) ----------------
    y = x_emb
    for l in range(N_DEC_LAYERS):
        # self-attention (causal + relative bias; no padding mask — HF default)
        hb = rms(y, d_ln_sa_ref[l]).astype(jnp.bfloat16)
        q = mm_b(hb, d_wqkv_ref[l, 0])
        k = mm_b(hb, d_wqkv_ref[l, 1])
        v = mm_b(hb, d_wqkv_ref[l, 2])
        y = y + mm(attention(q, k, v, dec_bias), d_wo_ref[l])
        # cross-attention over encoder output (padding mask on keys, no rel bias)
        hb = rms(y, d_ln_ca_ref[l]).astype(jnp.bfloat16)
        q = mm_b(hb, d_cq_ref[l])
        k = mm_b(enc_out_bf, d_ckv_ref[l, 0])
        v = mm_b(enc_out_bf, d_ckv_ref[l, 1])
        y = y + mm(attention(q, k, v, cross_bias), d_co_ref[l])
        # gated-gelu FFN
        y = y + ffn(rms(y, d_ln_ff_ref[l]), d_wi_ref, d_wof_ref, l)
    dec_out = rms(y, d_fln_ref[...])                                       # (S, D) last_hidden_state

    # ---------------- masked mean pooling ----------------
    pad = (ids != PAD_TOKEN_ID).astype(jnp.float32)                        # (S, 1)
    num = jnp.sum(dec_out * pad, axis=0, keepdims=True)                    # (1, D)
    den = jnp.maximum(jnp.sum(pad, axis=0, keepdims=True), 1.0)            # avoid /0 on all-pad rows
    out_ref[...] = (num / den).reshape(1, 1, D_MODEL)


# ---------------- host side: relative-position bias + weight packing ----------------
def relative_position_bucket(rel_pos, bidirectional, num_buckets, max_distance):
    ret = jnp.zeros_like(rel_pos)
    if bidirectional:
        num_buckets //= 2
        ret = ret + (rel_pos > 0).astype(jnp.int32) * num_buckets
        rel_pos = jnp.abs(rel_pos)
    else:
        rel_pos = -jnp.minimum(rel_pos, 0)
    max_exact = num_buckets // 2
    is_small = rel_pos < max_exact
    rel_large = max_exact + (
        jnp.log(jnp.maximum(rel_pos, 1).astype(jnp.float32) / max_exact)
        / jnp.log(max_distance / max_exact) * (num_buckets - max_exact)
    ).astype(jnp.int32)
    rel_large = jnp.minimum(rel_large, num_buckets - 1)
    return ret + jnp.where(is_small, rel_pos, rel_large)


def compute_position_bias(rel_emb, q_len, k_len, bidirectional):
    ctx = jnp.arange(q_len)[:, None]
    mem = jnp.arange(k_len)[None, :]
    buckets = relative_position_bucket(mem - ctx, bidirectional, REL_BUCKETS, REL_MAX_DIST)
    vals = rel_emb[buckets]                          # (q, k, H)
    return jnp.transpose(vals, (2, 0, 1))            # (H, q, k)


def _pack_layers(layers, cross=False):
    bf = lambda a: a.astype(jnp.bfloat16)
    packed = dict(
        ln_sa=jnp.stack([l["ln_sa"].reshape(1, -1) for l in layers]),                    # (L,1,D) f32
        wqkv=bf(jnp.stack([jnp.stack([l["q"], l["k"], l["v"]]) for l in layers])),       # (L,3,D,HDK)
        wo=bf(jnp.stack([l["o"] for l in layers])),                                      # (L,HDK,D)
        ln_ff=jnp.stack([l["ln_ff"].reshape(1, -1) for l in layers]),
        wi=bf(jnp.stack([jnp.stack([l["wi0"], l["wi1"]]) for l in layers])),             # (L,2,D,D_FF)
        wof=bf(jnp.stack([l["wo"] for l in layers])),                                    # (L,D_FF,D)
    )
    if cross:
        packed.update(
            ln_ca=jnp.stack([l["ln_ca"].reshape(1, -1) for l in layers]),
            cq=bf(jnp.stack([l["cq"] for l in layers])),                                 # (L,D,HDK)
            ckv=bf(jnp.stack([jnp.stack([l["ck"], l["cv"]]) for l in layers])),          # (L,2,D,HDK)
            co=bf(jnp.stack([l["co"] for l in layers])),                                 # (L,HDK,D)
        )
    return packed


def _rep_spec(shape):
    n = len(shape)
    return pl.BlockSpec(tuple(shape), lambda b, _n=n: (0,) * _n)


def _batch_spec(shape):
    n = len(shape)
    return pl.BlockSpec((1,) + tuple(shape[1:]), lambda b, _n=n: (b,) + (0,) * (_n - 1))


def flan_t5_text_encoder(params, input_ids, attention_mask):
    B, S = input_ids.shape
    ext = (1.0 - attention_mask.astype(jnp.float32)) * NEG_INF                       # (B, S)
    causal = jnp.where(jnp.arange(S)[None, :] <= jnp.arange(S)[:, None], 0.0, NEG_INF)
    # pre-add padding mask into the biases (kernel does one plain add per block)
    enc_bias = (compute_position_bias(params["enc_rel_bias"], S, S, True)[None]
                + ext[:, None, None, :]).astype(jnp.float32)                         # (B,H,S,S)
    dec_bias = (compute_position_bias(params["dec_rel_bias"], S, S, False)
                + causal[None]).astype(jnp.float32)                                  # (H,S,S)
    cross_bias = jnp.broadcast_to(ext[:, None, None, :],
                                  (B, N_HEADS, S, S)).astype(jnp.float32)            # (B,H,S,S)

    e = _pack_layers(params["enc_layers"])
    d = _pack_layers(params["dec_layers"], cross=True)

    ids3 = input_ids.astype(jnp.int32).reshape(B, S, 1)
    emb = params["shared"].astype(jnp.bfloat16)

    args = (
        ids3, emb, enc_bias, dec_bias, cross_bias,
        e["ln_sa"], e["wqkv"], e["wo"], e["ln_ff"], e["wi"], e["wof"],
        params["enc_final_ln"].reshape(1, -1).astype(jnp.float32),
        d["ln_sa"], d["wqkv"], d["wo"], d["ln_ca"], d["cq"], d["ckv"], d["co"],
        d["ln_ff"], d["wi"], d["wof"],
        params["dec_final_ln"].reshape(1, -1).astype(jnp.float32),
    )
    in_specs = [
        _batch_spec(ids3.shape),          # token ids       : tiled by batch
        _rep_spec(emb.shape),             # embedding table : VMEM-resident
        _batch_spec(enc_bias.shape),      # enc bias + mask : tiled by batch
        _rep_spec(dec_bias.shape),        # dec causal bias : shared
        _batch_spec(cross_bias.shape),    # cross-attn mask : tiled by batch
    ] + [_rep_spec(a.shape) for a in args[5:]]   # all weights: constant index_map (resident)

    out = pl.pallas_call(
        _model_kernel,
        out_shape=jax.ShapeDtypeStruct((B, 1, D_MODEL), jnp.float32),
        grid=(B,),
        in_specs=in_specs,
        out_specs=_batch_spec((B, 1, D_MODEL)),
        compiler_params=pltpu.CompilerParams(dimension_semantics=("parallel",)),
    )(*args)
    return out.reshape(B, D_MODEL)


# ---------------- deterministic parameter init ----------------
def init_params(key):
    keys = iter(jax.random.split(key, 128))

    def w(shape, scale=0.05):
        return jax.random.normal(next(keys), shape, jnp.float32) * scale

    def enc_layer():
        return dict(
            ln_sa=jnp.ones((D_MODEL,), jnp.float32),
            q=w((D_MODEL, HDK)), k=w((D_MODEL, HDK)),
            v=w((D_MODEL, HDK)), o=w((HDK, D_MODEL)),
            ln_ff=jnp.ones((D_MODEL,), jnp.float32),
            wi0=w((D_MODEL, D_FF)), wi1=w((D_MODEL, D_FF)), wo=w((D_FF, D_MODEL)),
        )

    def dec_layer():
        dd = enc_layer()
        dd.update(
            ln_ca=jnp.ones((D_MODEL,), jnp.float32),
            cq=w((D_MODEL, HDK)), ck=w((D_MODEL, HDK)),
            cv=w((D_MODEL, HDK)), co=w((HDK, D_MODEL)),
        )
        return dd

    return dict(
        shared=w((VOCAB, D_MODEL), 1.0),
        enc_rel_bias=w((REL_BUCKETS, N_HEADS)),
        dec_rel_bias=w((REL_BUCKETS, N_HEADS)),
        enc_layers=[enc_layer() for _ in range(N_ENC_LAYERS)],
        enc_final_ln=jnp.ones((D_MODEL,), jnp.float32),
        dec_layers=[dec_layer() for _ in range(N_DEC_LAYERS)],
        dec_final_ln=jnp.ones((D_MODEL,), jnp.float32),
    )


if __name__ == "__main__":
    key = jax.random.PRNGKey(0)
    pkey, ikey = jax.random.split(key)
    params = init_params(pkey)

    B, S = 2, 8
    ids = jax.random.randint(ikey, (B, S), 2, VOCAB)
    # row 0: full length; row 1: padded with pad/eos id after 4 tokens
    pad = jnp.arange(S)[None, :] >= jnp.array([[S], [4]])
    input_ids = jnp.where(pad, PAD_TOKEN_ID, ids).astype(jnp.int32)
    attention_mask = (~pad).astype(jnp.int32)

    emb = jax.jit(flan_t5_text_encoder)(params, input_ids, attention_mask)
    jax.block_until_ready(emb)
    assert emb.shape == (B, D_MODEL) and emb.dtype == jnp.float32
    assert bool(jnp.all(jnp.isfinite(emb)))
    print("KERNEL_OK")
</pallas_src>

<mosaic_0001>
module attributes {stable_mosaic.version = 11 : i64} {
  func.func @_model_kernel(%arg0: i32, %arg1: memref<1x8x1xi32, #tpu.memory_space<vmem>>, %arg2: memref<64x32xbf16, #tpu.memory_space<vmem>>, %arg3: memref<1x4x8x8xf32, #tpu.memory_space<vmem>>, %arg4: memref<4x8x8xf32, #tpu.memory_space<vmem>>, %arg5: memref<1x4x8x8xf32, #tpu.memory_space<vmem>>, %arg6: memref<1x1x32xf32, #tpu.memory_space<vmem>>, %arg7: memref<1x3x32x32xbf16, #tpu.memory_space<vmem>>, %arg8: memref<1x32x32xbf16, #tpu.memory_space<vmem>>, %arg9: memref<1x1x32xf32, #tpu.memory_space<vmem>>, %arg10: memref<1x2x32x64xbf16, #tpu.memory_space<vmem>>, %arg11: memref<1x64x32xbf16, #tpu.memory_space<vmem>>, %arg12: memref<1x32xf32, #tpu.memory_space<vmem>>, %arg13: memref<1x1x32xf32, #tpu.memory_space<vmem>>, %arg14: memref<1x3x32x32xbf16, #tpu.memory_space<vmem>>, %arg15: memref<1x32x32xbf16, #tpu.memory_space<vmem>>, %arg16: memref<1x1x32xf32, #tpu.memory_space<vmem>>, %arg17: memref<1x32x32xbf16, #tpu.memory_space<vmem>>, %arg18: memref<1x2x32x32xbf16, #tpu.memory_space<vmem>>, %arg19: memref<1x32x32xbf16, #tpu.memory_space<vmem>>, %arg20: memref<1x1x32xf32, #tpu.memory_space<vmem>>, %arg21: memref<1x2x32x64xbf16, #tpu.memory_space<vmem>>, %arg22: memref<1x64x32xbf16, #tpu.memory_space<vmem>>, %arg23: memref<1x32xf32, #tpu.memory_space<vmem>>, %arg24: memref<1x1x32xf32, #tpu.memory_space<vmem>>) attributes {dimension_semantics = [#tpu.dimension_semantics<parallel>], iteration_bounds = array<i64: 2>, scalar_prefetch = 0 : i64, scratch_operands = 0 : i64, tpu.core_type = #tpu.core_type<tc>, window_params = [{transform_indices = @transform_0, window_bounds = array<i64: 1, 8, 1>}, {pipeline_mode = #tpu.pipeline_mode<synchronous>, transform_indices = @transform_1, window_bounds = array<i64: 64, 32>}, {transform_indices = @transform_2, window_bounds = array<i64: 1, 4, 8, 8>}, {pipeline_mode = #tpu.pipeline_mode<synchronous>, transform_indices = @transform_3, window_bounds = array<i64: 4, 8, 8>}, {transform_indices = @transform_4, window_bounds = array<i64: 1, 4, 8, 8>}, {pipeline_mode = #tpu.pipeline_mode<synchronous>, transform_indices = @transform_5, window_bounds = array<i64: 1, 1, 32>}, {pipeline_mode = #tpu.pipeline_mode<synchronous>, transform_indices = @transform_6, window_bounds = array<i64: 1, 3, 32, 32>}, {pipeline_mode = #tpu.pipeline_mode<synchronous>, transform_indices = @transform_7, window_bounds = array<i64: 1, 32, 32>}, {pipeline_mode = #tpu.pipeline_mode<synchronous>, transform_indices = @transform_8, window_bounds = array<i64: 1, 1, 32>}, {pipeline_mode = #tpu.pipeline_mode<synchronous>, transform_indices = @transform_9, window_bounds = array<i64: 1, 2, 32, 64>}, {pipeline_mode = #tpu.pipeline_mode<synchronous>, transform_indices = @transform_10, window_bounds = array<i64: 1, 64, 32>}, {pipeline_mode = #tpu.pipeline_mode<synchronous>, transform_indices = @transform_11, window_bounds = array<i64: 1, 32>}, {pipeline_mode = #tpu.pipeline_mode<synchronous>, transform_indices = @transform_12, window_bounds = array<i64: 1, 1, 32>}, {pipeline_mode = #tpu.pipeline_mode<synchronous>, transform_indices = @transform_13, window_bounds = array<i64: 1, 3, 32, 32>}, {pipeline_mode = #tpu.pipeline_mode<synchronous>, transform_indices = @transform_14, window_bounds = array<i64: 1, 32, 32>}, {pipeline_mode = #tpu.pipeline_mode<synchronous>, transform_indices = @transform_15, window_bounds = array<i64: 1, 1, 32>}, {pipeline_mode = #tpu.pipeline_mode<synchronous>, transform_indices = @transform_16, window_bounds = array<i64: 1, 32, 32>}, {pipeline_mode = #tpu.pipeline_mode<synchronous>, transform_indices = @transform_17, window_bounds = array<i64: 1, 2, 32, 32>}, {pipeline_mode = #tpu.pipeline_mode<synchronous>, transform_indices = @transform_18, window_bounds = array<i64: 1, 32, 32>}, {pipeline_mode = #tpu.pipeline_mode<synchronous>, transform_indices = @transform_19, window_bounds = array<i64: 1, 1, 32>}, {pipeline_mode = #tpu.pipeline_mode<synchronous>, transform_indices = @transform_20, window_bounds = array<i64: 1, 2, 32, 64>}, {pipeline_mode = #tpu.pipeline_mode<synchronous>, transform_indices = @transform_21, window_bounds = array<i64: 1, 64, 32>}, {pipeline_mode = #tpu.pipeline_mode<synchronous>, transform_indices = @transform_22, window_bounds = array<i64: 1, 32>}, {transform_indices = @transform_23, window_bounds = array<i64: 1, 1, 32>}]} {
    %c0 = arith.constant 0 : index
    %c0_0 = arith.constant 0 : index
    %c0_1 = arith.constant 0 : index
    %0 = vector.load %arg1[%c0, %c0_0, %c0_1] : memref<1x8x1xi32, #tpu.memory_space<vmem>>, vector<1x8x1xi32>
    %1 = vector.shape_cast %0 : vector<1x8x1xi32> to vector<8x1xi32>
    %2 = tpu.iota {dimensions = array<i32: 1>} : vector<8x64xi32>
    %3 = vector.broadcast %1 : vector<8x1xi32> to vector<8x64xi32>
    %4 = arith.cmpi eq, %3, %2 : vector<8x64xi32>
    %5 = arith.extui %4 : vector<8x64xi1> to vector<8x64xi32>
    %6 = arith.sitofp %5 : vector<8x64xi32> to vector<8x64xf32>
    %7 = arith.truncf %6 : vector<8x64xf32> to vector<8x64xbf16>
    %c0_2 = arith.constant 0 : index
    %c0_3 = arith.constant 0 : index
    %8 = vector.load %arg2[%c0_2, %c0_3] : memref<64x32xbf16, #tpu.memory_space<vmem>>, vector<64x32xbf16>
    %cst = arith.constant dense<0.000000e+00> : vector<8x32xf32>
    %9 = tpu.matmul %7, %8, %cst {dimension_numbers = #tpu.dot_dimension_numbers<[1], [0], [0], [1], [0, 0, 1, 1], [], []>} : vector<8x64xbf16>, vector<64x32xbf16>, vector<8x32xf32> -> vector<8x32xf32>
    %c0_4 = arith.constant 0 : index
    %c0_5 = arith.constant 0 : index
    %c0_6 = arith.constant 0 : index
    %c0_7 = arith.constant 0 : index
    %10 = vector.load %arg3[%c0_4, %c0_5, %c0_6, %c0_7] : memref<1x4x8x8xf32, #tpu.memory_space<vmem>>, vector<1x4x8x8xf32>
    %11 = vector.shape_cast %10 : vector<1x4x8x8xf32> to vector<4x8x8xf32>
    %c0_8 = arith.constant 0 : index
    %c0_9 = arith.constant 0 : index
    %c0_10 = arith.constant 0 : index
    %12 = vector.load %arg4[%c0_8, %c0_9, %c0_10] : memref<4x8x8xf32, #tpu.memory_space<vmem>>, vector<4x8x8xf32>
    %c0_11 = arith.constant 0 : index
    %c0_12 = arith.constant 0 : index
    %c0_13 = arith.constant 0 : index
    %c0_14 = arith.constant 0 : index
    %13 = vector.load %arg5[%c0_11, %c0_12, %c0_13, %c0_14] : memref<1x4x8x8xf32, #tpu.memory_space<vmem>>, vector<1x4x8x8xf32>
    %14 = vector.shape_cast %13 : vector<1x4x8x8xf32> to vector<4x8x8xf32>
    %c0_15 = arith.constant 0 : index
    %c0_16 = arith.constant 0 : index
    %c0_17 = arith.constant 0 : index
    %15 = vector.load %arg6[%c0_15, %c0_16, %c0_17] : memref<1x1x32xf32, #tpu.memory_space<vmem>>, vector<1x1x32xf32>
    %16 = vector.shape_cast %15 : vector<1x1x32xf32> to vector<1x32xf32>
    %17 = arith.mulf %9, %9 : vector<8x32xf32>
    %cst_18 = arith.constant dense<0.000000e+00> : vector<8xf32>
    %18 = vector.multi_reduction <add>, %17, %cst_18 [1] : vector<8x32xf32> to vector<8xf32>
    %19 = vector.shape_cast %18 : vector<8xf32> to vector<8x1xf32>
    %cst_19 = arith.constant 3.200000e+01 : f32
    %20 = vector.broadcast %cst_19 : f32 to vector<8x1xf32>
    %21 = arith.divf %19, %20 : vector<8x1xf32>
    %cst_20 = arith.constant 9.99999997E-7 : f32
    %22 = vector.broadcast %cst_20 : f32 to vector<8x1xf32>
    %23 = arith.addf %21, %22 : vector<8x1xf32>
    %24 = math.rsqrt %23 : vector<8x1xf32>
    %25 = vector.broadcast %24 : vector<8x1xf32> to vector<8x32xf32>
    %26 = arith.mulf %9, %25 : vector<8x32xf32>
    %27 = vector.broadcast %16 : vector<1x32xf32> to vector<8x32xf32>
    %28 = arith.mulf %26, %27 : vector<8x32xf32>
    %29 = arith.truncf %28 : vector<8x32xf32> to vector<8x32xbf16>
    %c0_21 = arith.constant 0 : index
    %c0_22 = arith.constant 0 : index
    %c0_23 = arith.constant 0 : index
    %c0_24 = arith.constant 0 : index
    %30 = vector.load %arg7[%c0_21, %c0_22, %c0_23, %c0_24] : memref<1x3x32x32xbf16, #tpu.memory_space<vmem>>, vector<1x1x32x32xbf16>
    %31 = vector.shape_cast %30 : vector<1x1x32x32xbf16> to vector<32x32xbf16>
    %cst_25 = arith.constant dense<0.000000e+00> : vector<8x32xf32>
    %32 = tpu.matmul %29, %31, %cst_25 {dimension_numbers = #tpu.dot_dimension_numbers<[1], [0], [0], [1], [0, 0, 1, 1], [], []>} : vector<8x32xbf16>, vector<32x32xbf16>, vector<8x32xf32> -> vector<8x32xf32>
    %c0_26 = arith.constant 0 : index
    %c1 = arith.constant 1 : index
    %c0_27 = arith.constant 0 : index
    %c0_28 = arith.constant 0 : index
    %33 = vector.load %arg7[%c0_26, %c1, %c0_27, %c0_28] : memref<1x3x32x32xbf16, #tpu.memory_space<vmem>>, vector<1x1x32x32xbf16>
    %34 = vector.shape_cast %33 : vector<1x1x32x32xbf16> to vector<32x32xbf16>
    %cst_29 = arith.constant dense<0.000000e+00> : vector<8x32xf32>
    %35 = tpu.matmul %29, %34, %cst_29 {dimension_numbers = #tpu.dot_dimension_numbers<[1], [0], [0], [1], [0, 0, 1, 1], [], []>} : vector<8x32xbf16>, vector<32x32xbf16>, vector<8x32xf32> -> vector<8x32xf32>
    %c0_30 = arith.constant 0 : index
    %c2 = arith.constant 2 : index
    %c0_31 = arith.constant 0 : index
    %c0_32 = arith.constant 0 : index
    %36 = vector.load %arg7[%c0_30, %c2, %c0_31, %c0_32] : memref<1x3x32x32xbf16, #tpu.memory_space<vmem>>, vector<1x1x32x32xbf16>
    %37 = vector.shape_cast %36 : vector<1x1x32x32xbf16> to vector<32x32xbf16>
    %cst_33 = arith.constant dense<0.000000e+00> : vector<8x32xf32>
    %38 = tpu.matmul %29, %37, %cst_33 {dimension_numbers = #tpu.dot_dimension_numbers<[1], [0], [0], [1], [0, 0, 1, 1], [], []>} : vector<8x32xbf16>, vector<32x32xbf16>, vector<8x32xf32> -> vector<8x32xf32>
    %39 = vector.shape_cast %32 : vector<8x32xf32> to vector<8x4x8xf32>
    %40 = tpu.transpose %39, [1, 0, 2] : vector<8x4x8xf32> -> vector<4x8x8xf32>
    %41 = vector.shape_cast %35 : vector<8x32xf32> to vector<8x4x8xf32>
    %42 = tpu.transpose %41, [1, 0, 2] : vector<8x4x8xf32> -> vector<4x8x8xf32>
    %43 = vector.shape_cast %38 : vector<8x32xf32> to vector<8x4x8xf32>
    %44 = tpu.transpose %43, [1, 0, 2] : vector<8x4x8xf32> -> vector<4x8x8xf32>
    "tpu.trace_start"() <{level = 10 : i32, message = "hqd,hkd->hqk"}> : () -> ()
    %cst_34 = arith.constant dense<0.000000e+00> : vector<4x8x8xf32>
    %45 = tpu.matmul %40, %42, %cst_34 {dimension_numbers = #tpu.dot_dimension_numbers<[2], [2], [1], [1], [0, 0, 0, 1, 1, 1], [0], [0]>} : vector<4x8x8xf32>, vector<4x8x8xf32>, vector<4x8x8xf32> -> vector<4x8x8xf32>
    "tpu.trace_stop"() : () -> ()
    %46 = arith.addf %45, %11 : vector<4x8x8xf32>
    %cst_35 = arith.constant dense<0xFF800000> : vector<4x8xf32>
    %47 = vector.multi_reduction <maximumf>, %46, %cst_35 [2] : vector<4x8x8xf32> to vector<4x8xf32>
    %48 = vector.shape_cast %47 : vector<4x8xf32> to vector<4x8x1xf32>
    %49 = vector.broadcast %48 : vector<4x8x1xf32> to vector<4x8x8xf32>
    %50 = arith.subf %46, %49 : vector<4x8x8xf32>
    %51 = math.exp %50 : vector<4x8x8xf32>
    %cst_36 = arith.constant dense<0.000000e+00> : vector<4x8xf32>
    %52 = vector.multi_reduction <add>, %51, %cst_36 [2] : vector<4x8x8xf32> to vector<4x8xf32>
    %53 = vector.shape_cast %52 : vector<4x8xf32> to vector<4x8x1xf32>
    %54 = tpu.reciprocal %53 {approx = true} : vector<4x8x1xf32> -> vector<4x8x1xf32>
    %55 = vector.broadcast %54 : vector<4x8x1xf32> to vector<4x8x8xf32>
    %56 = arith.mulf %51, %55 : vector<4x8x8xf32>
    "tpu.trace_start"() <{level = 10 : i32, message = "hqk,hkd->hqd"}> : () -> ()
    %cst_37 = arith.constant dense<0.000000e+00> : vector<4x8x8xf32>
    %57 = tpu.matmul %56, %44, %cst_37 {dimension_numbers = #tpu.dot_dimension_numbers<[2], [1], [1], [2], [0, 0, 0, 1, 1, 2], [0], [0]>} : vector<4x8x8xf32>, vector<4x8x8xf32>, vector<4x8x8xf32> -> vector<4x8x8xf32>
    "tpu.trace_stop"() : () -> ()
    %58 = tpu.transpose %57, [1, 0, 2] : vector<4x8x8xf32> -> vector<8x4x8xf32>
    %59 = vector.shape_cast %58 : vector<8x4x8xf32> to vector<8x32xf32>
    %c0_38 = arith.constant 0 : index
    %c0_39 = arith.constant 0 : index
    %c0_40 = arith.constant 0 : index
    %60 = vector.load %arg8[%c0_38, %c0_39, %c0_40] : memref<1x32x32xbf16, #tpu.memory_space<vmem>>, vector<1x32x32xbf16>
    %61 = vector.shape_cast %60 : vector<1x32x32xbf16> to vector<32x32xbf16>
    %62 = arith.truncf %59 : vector<8x32xf32> to vector<8x32xbf16>
    %cst_41 = arith.constant dense<0.000000e+00> : vector<8x32xf32>
    %63 = tpu.matmul %62, %61, %cst_41 {dimension_numbers = #tpu.dot_dimension_numbers<[1], [0], [0], [1], [0, 0, 1, 1], [], []>} : vector<8x32xbf16>, vector<32x32xbf16>, vector<8x32xf32> -> vector<8x32xf32>
    %64 = arith.addf %9, %63 : vector<8x32xf32>
    %c0_42 = arith.constant 0 : index
    %c0_43 = arith.constant 0 : index
    %c0_44 = arith.constant 0 : index
    %65 = vector.load %arg9[%c0_42, %c0_43, %c0_44] : memref<1x1x32xf32, #tpu.memory_space<vmem>>, vector<1x1x32xf32>
    %66 = vector.shape_cast %65 : vector<1x1x32xf32> to vector<1x32xf32>
    %67 = arith.mulf %64, %64 : vector<8x32xf32>
    %cst_45 = arith.constant dense<0.000000e+00> : vector<8xf32>
    %68 = vector.multi_reduction <add>, %67, %cst_45 [1] : vector<8x32xf32> to vector<8xf32>
    %69 = vector.shape_cast %68 : vector<8xf32> to vector<8x1xf32>
    %cst_46 = arith.constant 3.200000e+01 : f32
    %70 = vector.broadcast %cst_46 : f32 to vector<8x1xf32>
    %71 = arith.divf %69, %70 : vector<8x1xf32>
    %cst_47 = arith.constant 9.99999997E-7 : f32
    %72 = vector.broadcast %cst_47 : f32 to vector<8x1xf32>
    %73 = arith.addf %71, %72 : vector<8x1xf32>
    %74 = math.rsqrt %73 : vector<8x1xf32>
    %75 = vector.broadcast %74 : vector<8x1xf32> to vector<8x32xf32>
    %76 = arith.mulf %64, %75 : vector<8x32xf32>
    %77 = vector.broadcast %66 : vector<1x32xf32> to vector<8x32xf32>
    %78 = arith.mulf %76, %77 : vector<8x32xf32>
    %79 = arith.truncf %78 : vector<8x32xf32> to vector<8x32xbf16>
    %c0_48 = arith.constant 0 : index
    %c0_49 = arith.constant 0 : index
    %c0_50 = arith.constant 0 : index
    %c0_51 = arith.constant 0 : index
    %80 = vector.load %arg10[%c0_48, %c0_49, %c0_50, %c0_51] : memref<1x2x32x64xbf16, #tpu.memory_space<vmem>>, vector<1x1x32x64xbf16>
    %81 = vector.shape_cast %80 : vector<1x1x32x64xbf16> to vector<32x64xbf16>
    %cst_52 = arith.constant dense<0.000000e+00> : vector<8x64xf32>
    %82 = tpu.matmul %79, %81, %cst_52 {dimension_numbers = #tpu.dot_dimension_numbers<[1], [0], [0], [1], [0, 0, 1, 1], [], []>} : vector<8x32xbf16>, vector<32x64xbf16>, vector<8x64xf32> -> vector<8x64xf32>
    %cst_53 = arith.constant 5.000000e-01 : f32
    %83 = vector.broadcast %cst_53 : f32 to vector<8x64xf32>
    %84 = arith.mulf %83, %82 : vector<8x64xf32>
    %cst_54 = arith.constant 4.471500e-02 : f32
    %85 = vector.broadcast %cst_54 : f32 to vector<8x64xf32>
    %86 = arith.mulf %85, %82 : vector<8x64xf32>
    %87 = arith.mulf %86, %82 : vector<8x64xf32>
    %88 = arith.mulf %87, %82 : vector<8x64xf32>
    %89 = arith.addf %82, %88 : vector<8x64xf32>
    %cst_55 = arith.constant 0.797884583 : f32
    %90 = vector.broadcast %cst_55 : f32 to vector<8x64xf32>
    %91 = arith.mulf %90, %89 : vector<8x64xf32>
    %92 = math.tanh %91 : vector<8x64xf32>
    %cst_56 = arith.constant 1.000000e+00 : f32
    %93 = vector.broadcast %cst_56 : f32 to vector<8x64xf32>
    %94 = arith.addf %93, %92 : vector<8x64xf32>
    %95 = arith.mulf %84, %94 : vector<8x64xf32>
    %c0_57 = arith.constant 0 : index
    %c1_58 = arith.constant 1 : index
    %c0_59 = arith.constant 0 : index
    %c0_60 = arith.constant 0 : index
    %96 = vector.load %arg10[%c0_57, %c1_58, %c0_59, %c0_60] : memref<1x2x32x64xbf16, #tpu.memory_space<vmem>>, vector<1x1x32x64xbf16>
    %97 = vector.shape_cast %96 : vector<1x1x32x64xbf16> to vector<32x64xbf16>
    %cst_61 = arith.constant dense<0.000000e+00> : vector<8x64xf32>
    %98 = tpu.matmul %79, %97, %cst_61 {dimension_numbers = #tpu.dot_dimension_numbers<[1], [0], [0], [1], [0, 0, 1, 1], [], []>} : vector<8x32xbf16>, vector<32x64xbf16>, vector<8x64xf32> -> vector<8x64xf32>
    %99 = arith.mulf %95, %98 : vector<8x64xf32>
    %c0_62 = arith.constant 0 : index
    %c0_63 = arith.constant 0 : index
    %c0_64 = arith.constant 0 : index
    %100 = vector.load %arg11[%c0_62, %c0_63, %c0_64] : memref<1x64x32xbf16, #tpu.memory_space<vmem>>, vector<1x64x32xbf16>
    %101 = vector.shape_cast %100 : vector<1x64x32xbf16> to vector<64x32xbf16>
    %102 = arith.truncf %99 : vector<8x64xf32> to vector<8x64xbf16>
    %cst_65 = arith.constant dense<0.000000e+00> : vector<8x32xf32>
    %103 = tpu.matmul %102, %101, %cst_65 {dimension_numbers = #tpu.dot_dimension_numbers<[1], [0], [0], [1], [0, 0, 1, 1], [], []>} : vector<8x64xbf16>, vector<64x32xbf16>, vector<8x32xf32> -> vector<8x32xf32>
    %104 = arith.addf %64, %103 : vector<8x32xf32>
    %c0_66 = arith.constant 0 : index
    %c0_67 = arith.constant 0 : index
    %105 = vector.load %arg12[%c0_66, %c0_67] : memref<1x32xf32, #tpu.memory_space<vmem>>, vector<1x32xf32>
    %106 = arith.mulf %104, %104 : vector<8x32xf32>
    %cst_68 = arith.constant dense<0.000000e+00> : vector<8xf32>
    %107 = vector.multi_reduction <add>, %106, %cst_68 [1] : vector<8x32xf32> to vector<8xf32>
    %108 = vector.shape_cast %107 : vector<8xf32> to vector<8x1xf32>
    %cst_69 = arith.constant 3.200000e+01 : f32
    %109 = vector.broadcast %cst_69 : f32 to vector<8x1xf32>
    %110 = arith.divf %108, %109 : vector<8x1xf32>
    %cst_70 = arith.constant 9.99999997E-7 : f32
    %111 = vector.broadcast %cst_70 : f32 to vector<8x1xf32>
    %112 = arith.addf %110, %111 : vector<8x1xf32>
    %113 = math.rsqrt %112 : vector<8x1xf32>
    %114 = vector.broadcast %113 : vector<8x1xf32> to vector<8x32xf32>
    %115 = arith.mulf %104, %114 : vector<8x32xf32>
    %116 = vector.broadcast %105 : vector<1x32xf32> to vector<8x32xf32>
    %117 = arith.mulf %115, %116 : vector<8x32xf32>
    %118 = arith.truncf %117 : vector<8x32xf32> to vector<8x32xbf16>
    %c0_71 = arith.constant 0 : index
    %c0_72 = arith.constant 0 : index
    %c0_73 = arith.constant 0 : index
    %119 = vector.load %arg13[%c0_71, %c0_72, %c0_73] : memref<1x1x32xf32, #tpu.memory_space<vmem>>, vector<1x1x32xf32>
    %120 = vector.shape_cast %119 : vector<1x1x32xf32> to vector<1x32xf32>
    %121 = arith.mulf %9, %9 : vector<8x32xf32>
    %cst_74 = arith.constant dense<0.000000e+00> : vector<8xf32>
    %122 = vector.multi_reduction <add>, %121, %cst_74 [1] : vector<8x32xf32> to vector<8xf32>
    %123 = vector.shape_cast %122 : vector<8xf32> to vector<8x1xf32>
    %cst_75 = arith.constant 3.200000e+01 : f32
    %124 = vector.broadcast %cst_75 : f32 to vector<8x1xf32>
    %125 = arith.divf %123, %124 : vector<8x1xf32>
    %cst_76 = arith.constant 9.99999997E-7 : f32
    %126 = vector.broadcast %cst_76 : f32 to vector<8x1xf32>
    %127 = arith.addf %125, %126 : vector<8x1xf32>
    %128 = math.rsqrt %127 : vector<8x1xf32>
    %129 = vector.broadcast %128 : vector<8x1xf32> to vector<8x32xf32>
    %130 = arith.mulf %9, %129 : vector<8x32xf32>
    %131 = vector.broadcast %120 : vector<1x32xf32> to vector<8x32xf32>
    %132 = arith.mulf %130, %131 : vector<8x32xf32>
    %133 = arith.truncf %132 : vector<8x32xf32> to vector<8x32xbf16>
    %c0_77 = arith.constant 0 : index
    %c0_78 = arith.constant 0 : index
    %c0_79 = arith.constant 0 : index
    %c0_80 = arith.constant 0 : index
    %134 = vector.load %arg14[%c0_77, %c0_78, %c0_79, %c0_80] : memref<1x3x32x32xbf16, #tpu.memory_space<vmem>>, vector<1x1x32x32xbf16>
    %135 = vector.shape_cast %134 : vector<1x1x32x32xbf16> to vector<32x32xbf16>
    %cst_81 = arith.constant dense<0.000000e+00> : vector<8x32xf32>
    %136 = tpu.matmul %133, %135, %cst_81 {dimension_numbers = #tpu.dot_dimension_numbers<[1], [0], [0], [1], [0, 0, 1, 1], [], []>} : vector<8x32xbf16>, vector<32x32xbf16>, vector<8x32xf32> -> vector<8x32xf32>
    %c0_82 = arith.constant 0 : index
    %c1_83 = arith.constant 1 : index
    %c0_84 = arith.constant 0 : index
    %c0_85 = arith.constant 0 : index
    %137 = vector.load %arg14[%c0_82, %c1_83, %c0_84, %c0_85] : memref<1x3x32x32xbf16, #tpu.memory_space<vmem>>, vector<1x1x32x32xbf16>
    %138 = vector.shape_cast %137 : vector<1x1x32x32xbf16> to vector<32x32xbf16>
    %cst_86 = arith.constant dense<0.000000e+00> : vector<8x32xf32>
    %139 = tpu.matmul %133, %138, %cst_86 {dimension_numbers = #tpu.dot_dimension_numbers<[1], [0], [0], [1], [0, 0, 1, 1], [], []>} : vector<8x32xbf16>, vector<32x32xbf16>, vector<8x32xf32> -> vector<8x32xf32>
    %c0_87 = arith.constant 0 : index
    %c2_88 = arith.constant 2 : index
    %c0_89 = arith.constant 0 : index
    %c0_90 = arith.constant 0 : index
    %140 = vector.load %arg14[%c0_87, %c2_88, %c0_89, %c0_90] : memref<1x3x32x32xbf16, #tpu.memory_space<vmem>>, vector<1x1x32x32xbf16>
    %141 = vector.shape_cast %140 : vector<1x1x32x32xbf16> to vector<32x32xbf16>
    %cst_91 = arith.constant dense<0.000000e+00> : vector<8x32xf32>
    %142 = tpu.matmul %133, %141, %cst_91 {dimension_numbers = #tpu.dot_dimension_numbers<[1], [0], [0], [1], [0, 0, 1, 1], [], []>} : vector<8x32xbf16>, vector<32x32xbf16>, vector<8x32xf32> -> vector<8x32xf32>
    %143 = vector.shape_cast %136 : vector<8x32xf32> to vector<8x4x8xf32>
    %144 = tpu.transpose %143, [1, 0, 2] : vector<8x4x8xf32> -> vector<4x8x8xf32>
    %145 = vector.shape_cast %139 : vector<8x32xf32> to vector<8x4x8xf32>
    %146 = tpu.transpose %145, [1, 0, 2] : vector<8x4x8xf32> -> vector<4x8x8xf32>
    %147 = vector.shape_cast %142 : vector<8x32xf32> to vector<8x4x8xf32>
    %148 = tpu.transpose %147, [1, 0, 2] : vector<8x4x8xf32> -> vector<4x8x8xf32>
    "tpu.trace_start"() <{level = 10 : i32, message = "hqd,hkd->hqk"}> : () -> ()
    %cst_92 = arith.constant dense<0.000000e+00> : vector<4x8x8xf32>
    %149 = tpu.matmul %144, %146, %cst_92 {dimension_numbers = #tpu.dot_dimension_numbers<[2], [2], [1], [1], [0, 0, 0, 1, 1, 1], [0], [0]>} : vector<4x8x8xf32>, vector<4x8x8xf32>, vector<4x8x8xf32> -> vector<4x8x8xf32>
    "tpu.trace_stop"() : () -> ()
    %150 = arith.addf %149, %12 : vector<4x8x8xf32>
    %cst_93 = arith.constant dense<0xFF800000> : vector<4x8xf32>
    %151 = vector.multi_reduction <maximumf>, %150, %cst_93 [2] : vector<4x8x8xf32> to vector<4x8xf32>
    %152 = vector.shape_cast %151 : vector<4x8xf32> to vector<4x8x1xf32>
    %153 = vector.broadcast %152 : vector<4x8x1xf32> to vector<4x8x8xf32>
    %154 = arith.subf %150, %153 : vector<4x8x8xf32>
    %155 = math.exp %154 : vector<4x8x8xf32>
    %cst_94 = arith.constant dense<0.000000e+00> : vector<4x8xf32>
    %156 = vector.multi_reduction <add>, %155, %cst_94 [2] : vector<4x8x8xf32> to vector<4x8xf32>
    %157 = vector.shape_cast %156 : vector<4x8xf32> to vector<4x8x1xf32>
    %158 = tpu.reciprocal %157 {approx = true} : vector<4x8x1xf32> -> vector<4x8x1xf32>
    %159 = vector.broadcast %158 : vector<4x8x1xf32> to vector<4x8x8xf32>
    %160 = arith.mulf %155, %159 : vector<4x8x8xf32>
    "tpu.trace_start"() <{level = 10 : i32, message = "hqk,hkd->hqd"}> : () -> ()
    %cst_95 = arith.constant dense<0.000000e+00> : vector<4x8x8xf32>
    %161 = tpu.matmul %160, %148, %cst_95 {dimension_numbers = #tpu.dot_dimension_numbers<[2], [1], [1], [2], [0, 0, 0, 1, 1, 2], [0], [0]>} : vector<4x8x8xf32>, vector<4x8x8xf32>, vector<4x8x8xf32> -> vector<4x8x8xf32>
    "tpu.trace_stop"() : () -> ()
    %162 = tpu.transpose %161, [1, 0, 2] : vector<4x8x8xf32> -> vector<8x4x8xf32>
    %163 = vector.shape_cast %162 : vector<8x4x8xf32> to vector<8x32xf32>
    %c0_96 = arith.constant 0 : index
    %c0_97 = arith.constant 0 : index
    %c0_98 = arith.constant 0 : index
    %164 = vector.load %arg15[%c0_96, %c0_97, %c0_98] : memref<1x32x32xbf16, #tpu.memory_space<vmem>>, vector<1x32x32xbf16>
    %165 = vector.shape_cast %164 : vector<1x32x32xbf16> to vector<32x32xbf16>
    %166 = arith.truncf %163 : vector<8x32xf32> to vector<8x32xbf16>
    %cst_99 = arith.constant dense<0.000000e+00> : vector<8x32xf32>
    %167 = tpu.matmul %166, %165, %cst_99 {dimension_numbers = #tpu.dot_dimension_numbers<[1], [0], [0], [1], [0, 0, 1, 1], [], []>} : vector<8x32xbf16>, vector<32x32xbf16>, vector<8x32xf32> -> vector<8x32xf32>
    %168 = arith.addf %9, %167 : vector<8x32xf32>
    %c0_100 = arith.constant 0 : index
    %c0_101 = arith.constant 0 : index
    %c0_102 = arith.constant 0 : index
    %169 = vector.load %arg16[%c0_100, %c0_101, %c0_102] : memref<1x1x32xf32, #tpu.memory_space<vmem>>, vector<1x1x32xf32>
    %170 = vector.shape_cast %169 : vector<1x1x32xf32> to vector<1x32xf32>
    %171 = arith.mulf %168, %168 : vector<8x32xf32>
    %cst_103 = arith.constant dense<0.000000e+00> : vector<8xf32>
    %172 = vector.multi_reduction <add>, %171, %cst_103 [1] : vector<8x32xf32> to vector<8xf32>
    %173 = vector.shape_cast %172 : vector<8xf32> to vector<8x1xf32>
    %cst_104 = arith.constant 3.200000e+01 : f32
    %174 = vector.broadcast %cst_104 : f32 to vector<8x1xf32>
    %175 = arith.divf %173, %174 : vector<8x1xf32>
    %cst_105 = arith.constant 9.99999997E-7 : f32
    %176 = vector.broadcast %cst_105 : f32 to vector<8x1xf32>
    %177 = arith.addf %175, %176 : vector<8x1xf32>
    %178 = math.rsqrt %177 : vector<8x1xf32>
    %179 = vector.broadcast %178 : vector<8x1xf32> to vector<8x32xf32>
    %180 = arith.mulf %168, %179 : vector<8x32xf32>
    %181 = vector.broadcast %170 : vector<1x32xf32> to vector<8x32xf32>
    %182 = arith.mulf %180, %181 : vector<8x32xf32>
    %183 = arith.truncf %182 : vector<8x32xf32> to vector<8x32xbf16>
    %c0_106 = arith.constant 0 : index
    %c0_107 = arith.constant 0 : index
    %c0_108 = arith.constant 0 : index
    %184 = vector.load %arg17[%c0_106, %c0_107, %c0_108] : memref<1x32x32xbf16, #tpu.memory_space<vmem>>, vector<1x32x32xbf16>
    %185 = vector.shape_cast %184 : vector<1x32x32xbf16> to vector<32x32xbf16>
    %cst_109 = arith.constant dense<0.000000e+00> : vector<8x32xf32>
    %186 = tpu.matmul %183, %185, %cst_109 {dimension_numbers = #tpu.dot_dimension_numbers<[1], [0], [0], [1], [0, 0, 1, 1], [], []>} : vector<8x32xbf16>, vector<32x32xbf16>, vector<8x32xf32> -> vector<8x32xf32>
    %c0_110 = arith.constant 0 : index
    %c0_111 = arith.constant 0 : index
    %c0_112 = arith.constant 0 : index
    %c0_113 = arith.constant 0 : index
    %187 = vector.load %arg18[%c0_110, %c0_111, %c0_112, %c0_113] : memref<1x2x32x32xbf16, #tpu.memory_space<vmem>>, vector<1x1x32x32xbf16>
    %188 = vector.shape_cast %187 : vector<1x1x32x32xbf16> to vector<32x32xbf16>
    %cst_114 = arith.constant dense<0.000000e+00> : vector<8x32xf32>
    %189 = tpu.matmul %118, %188, %cst_114 {dimension_numbers = #tpu.dot_dimension_numbers<[1], [0], [0], [1], [0, 0, 1, 1], [], []>} : vector<8x32xbf16>, vector<32x32xbf16>, vector<8x32xf32> -> vector<8x32xf32>
    %c0_115 = arith.constant 0 : index
    %c1_116 = arith.constant 1 : index
    %c0_117 = arith.constant 0 : index
    %c0_118 = arith.constant 0 : index
    %190 = vector.load %arg18[%c0_115, %c1_116, %c0_117, %c0_118] : memref<1x2x32x32xbf16, #tpu.memory_space<vmem>>, vector<1x1x32x32xbf16>
    %191 = vector.shape_cast %190 : vector<1x1x32x32xbf16> to vector<32x32xbf16>
    %cst_119 = arith.constant dense<0.000000e+00> : vector<8x32xf32>
    %192 = tpu.matmul %118, %191, %cst_119 {dimension_numbers = #tpu.dot_dimension_numbers<[1], [0], [0], [1], [0, 0, 1, 1], [], []>} : vector<8x32xbf16>, vector<32x32xbf16>, vector<8x32xf32> -> vector<8x32xf32>
    %193 = vector.shape_cast %186 : vector<8x32xf32> to vector<8x4x8xf32>
    %194 = tpu.transpose %193, [1, 0, 2] : vector<8x4x8xf32> -> vector<4x8x8xf32>
    %195 = vector.shape_cast %189 : vector<8x32xf32> to vector<8x4x8xf32>
    %196 = tpu.transpose %195, [1, 0, 2] : vector<8x4x8xf32> -> vector<4x8x8xf32>
    %197 = vector.shape_cast %192 : vector<8x32xf32> to vector<8x4x8xf32>
    %198 = tpu.transpose %197, [1, 0, 2] : vector<8x4x8xf32> -> vector<4x8x8xf32>
    "tpu.trace_start"() <{level = 10 : i32, message = "hqd,hkd->hqk"}> : () -> ()
    %cst_120 = arith.constant dense<0.000000e+00> : vector<4x8x8xf32>
    %199 = tpu.matmul %194, %196, %cst_120 {dimension_numbers = #tpu.dot_dimension_numbers<[2], [2], [1], [1], [0, 0, 0, 1, 1, 1], [0], [0]>} : vector<4x8x8xf32>, vector<4x8x8xf32>, vector<4x8x8xf32> -> vector<4x8x8xf32>
    "tpu.trace_stop"() : () -> ()
    %200 = arith.addf %199, %14 : vector<4x8x8xf32>
    %cst_121 = arith.constant dense<0xFF800000> : vector<4x8xf32>
    %201 = vector.multi_reduction <maximumf>, %200, %cst_121 [2] : vector<4x8x8xf32> to vector<4x8xf32>
    %202 = vector.shape_cast %201 : vector<4x8xf32> to vector<4x8x1xf32>
    %203 = vector.broadcast %202 : vector<4x8x1xf32> to vector<4x8x8xf32>
    %204 = arith.subf %200, %203 : vector<4x8x8xf32>
    %205 = math.exp %204 : vector<4x8x8xf32>
    %cst_122 = arith.constant dense<0.000000e+00> : vector<4x8xf32>
    %206 = vector.multi_reduction <add>, %205, %cst_122 [2] : vector<4x8x8xf32> to vector<4x8xf32>
    %207 = vector.shape_cast %206 : vector<4x8xf32> to vector<4x8x1xf32>
    %208 = tpu.reciprocal %207 {approx = true} : vector<4x8x1xf32> -> vector<4x8x1xf32>
    %209 = vector.broadcast %208 : vector<4x8x1xf32> to vector<4x8x8xf32>
    %210 = arith.mulf %205, %209 : vector<4x8x8xf32>
    "tpu.trace_start"() <{level = 10 : i32, message = "hqk,hkd->hqd"}> : () -> ()
    %cst_123 = arith.constant dense<0.000000e+00> : vector<4x8x8xf32>
    %211 = tpu.matmul %210, %198, %cst_123 {dimension_numbers = #tpu.dot_dimension_numbers<[2], [1], [1], [2], [0, 0, 0, 1, 1, 2], [0], [0]>} : vector<4x8x8xf32>, vector<4x8x8xf32>, vector<4x8x8xf32> -> vector<4x8x8xf32>
    "tpu.trace_stop"() : () -> ()
    %212 = tpu.transpose %211, [1, 0, 2] : vector<4x8x8xf32> -> vector<8x4x8xf32>
    %213 = vector.shape_cast %212 : vector<8x4x8xf32> to vector<8x32xf32>
    %c0_124 = arith.constant 0 : index
    %c0_125 = arith.constant 0 : index
    %c0_126 = arith.constant 0 : index
    %214 = vector.load %arg19[%c0_124, %c0_125, %c0_126] : memref<1x32x32xbf16, #tpu.memory_space<vmem>>, vector<1x32x32xbf16>
    %215 = vector.shape_cast %214 : vector<1x32x32xbf16> to vector<32x32xbf16>
    %216 = arith.truncf %213 : vector<8x32xf32> to vector<8x32xbf16>
    %cst_127 = arith.constant dense<0.000000e+00> : vector<8x32xf32>
    %217 = tpu.matmul %216, %215, %cst_127 {dimension_numbers = #tpu.dot_dimension_numbers<[1], [0], [0], [1], [0, 0, 1, 1], [], []>} : vector<8x32xbf16>, vector<32x32xbf16>, vector<8x32xf32> -> vector<8x32xf32>
    %218 = arith.addf %168, %217 : vector<8x32xf32>
    %c0_128 = arith.constant 0 : index
    %c0_129 = arith.constant 0 : index
    %c0_130 = arith.constant 0 : index
    %219 = vector.load %arg20[%c0_128, %c0_129, %c0_130] : memref<1x1x32xf32, #tpu.memory_space<vmem>>, vector<1x1x32xf32>
    %220 = vector.shape_cast %219 : vector<1x1x32xf32> to vector<1x32xf32>
    %221 = arith.mulf %218, %218 : vector<8x32xf32>
    %cst_131 = arith.constant dense<0.000000e+00> : vector<8xf32>
    %222 = vector.multi_reduction <add>, %221, %cst_131 [1] : vector<8x32xf32> to vector<8xf32>
    %223 = vector.shape_cast %222 : vector<8xf32> to vector<8x1xf32>
    %cst_132 = arith.constant 3.200000e+01 : f32
    %224 = vector.broadcast %cst_132 : f32 to vector<8x1xf32>
    %225 = arith.divf %223, %224 : vector<8x1xf32>
    %cst_133 = arith.constant 9.99999997E-7 : f32
    %226 = vector.broadcast %cst_133 : f32 to vector<8x1xf32>
    %227 = arith.addf %225, %226 : vector<8x1xf32>
    %228 = math.rsqrt %227 : vector<8x1xf32>
    %229 = vector.broadcast %228 : vector<8x1xf32> to vector<8x32xf32>
    %230 = arith.mulf %218, %229 : vector<8x32xf32>
    %231 = vector.broadcast %220 : vector<1x32xf32> to vector<8x32xf32>
    %232 = arith.mulf %230, %231 : vector<8x32xf32>
    %233 = arith.truncf %232 : vector<8x32xf32> to vector<8x32xbf16>
    %c0_134 = arith.constant 0 : index
    %c0_135 = arith.constant 0 : index
    %c0_136 = arith.constant 0 : index
    %c0_137 = arith.constant 0 : index
    %234 = vector.load %arg21[%c0_134, %c0_135, %c0_136, %c0_137] : memref<1x2x32x64xbf16, #tpu.memory_space<vmem>>, vector<1x1x32x64xbf16>
    %235 = vector.shape_cast %234 : vector<1x1x32x64xbf16> to vector<32x64xbf16>
    %cst_138 = arith.constant dense<0.000000e+00> : vector<8x64xf32>
    %236 = tpu.matmul %233, %235, %cst_138 {dimension_numbers = #tpu.dot_dimension_numbers<[1], [0], [0], [1], [0, 0, 1, 1], [], []>} : vector<8x32xbf16>, vector<32x64xbf16>, vector<8x64xf32> -> vector<8x64xf32>
    %cst_139 = arith.constant 5.000000e-01 : f32
    %237 = vector.broadcast %cst_139 : f32 to vector<8x64xf32>
    %238 = arith.mulf %237, %236 : vector<8x64xf32>
    %cst_140 = arith.constant 4.471500e-02 : f32
    %239 = vector.broadcast %cst_140 : f32 to vector<8x64xf32>
    %240 = arith.mulf %239, %236 : vector<8x64xf32>
    %241 = arith.mulf %240, %236 : vector<8x64xf32>
    %242 = arith.mulf %241, %236 : vector<8x64xf32>
    %243 = arith.addf %236, %242 : vector<8x64xf32>
    %cst_141 = arith.constant 0.797884583 : f32
    %244 = vector.broadcast %cst_141 : f32 to vector<8x64xf32>
    %245 = arith.mulf %244, %243 : vector<8x64xf32>
    %246 = math.tanh %245 : vector<8x64xf32>
    %cst_142 = arith.constant 1.000000e+00 : f32
    %247 = vector.broadcast %cst_142 : f32 to vector<8x64xf32>
    %248 = arith.addf %247, %246 : vector<8x64xf32>
    %249 = arith.mulf %238, %248 : vector<8x64xf32>
    %c0_143 = arith.constant 0 : index
    %c1_144 = arith.constant 1 : index
    %c0_145 = arith.constant 0 : index
    %c0_146 = arith.constant 0 : index
    %250 = vector.load %arg21[%c0_143, %c1_144, %c0_145, %c0_146] : memref<1x2x32x64xbf16, #tpu.memory_space<vmem>>, vector<1x1x32x64xbf16>
    %251 = vector.shape_cast %250 : vector<1x1x32x64xbf16> to vector<32x64xbf16>
    %cst_147 = arith.constant dense<0.000000e+00> : vector<8x64xf32>
    %252 = tpu.matmul %233, %251, %cst_147 {dimension_numbers = #tpu.dot_dimension_numbers<[1], [0], [0], [1], [0, 0, 1, 1], [], []>} : vector<8x32xbf16>, vector<32x64xbf16>, vector<8x64xf32> -> vector<8x64xf32>
    %253 = arith.mulf %249, %252 : vector<8x64xf32>
    %c0_148 = arith.constant 0 : index
    %c0_149 = arith.constant 0 : index
    %c0_150 = arith.constant 0 : index
    %254 = vector.load %arg22[%c0_148, %c0_149, %c0_150] : memref<1x64x32xbf16, #tpu.memory_space<vmem>>, vector<1x64x32xbf16>
    %255 = vector.shape_cast %254 : vector<1x64x32xbf16> to vector<64x32xbf16>
    %256 = arith.truncf %253 : vector<8x64xf32> to vector<8x64xbf16>
    %cst_151 = arith.constant dense<0.000000e+00> : vector<8x32xf32>
    %257 = tpu.matmul %256, %255, %cst_151 {dimension_numbers = #tpu.dot_dimension_numbers<[1], [0], [0], [1], [0, 0, 1, 1], [], []>} : vector<8x64xbf16>, vector<64x32xbf16>, vector<8x32xf32> -> vector<8x32xf32>
    %258 = arith.addf %218, %257 : vector<8x32xf32>
    %c0_152 = arith.constant 0 : index
    %c0_153 = arith.constant 0 : index
    %259 = vector.load %arg23[%c0_152, %c0_153] : memref<1x32xf32, #tpu.memory_space<vmem>>, vector<1x32xf32>
    %260 = arith.mulf %258, %258 : vector<8x32xf32>
    %cst_154 = arith.constant dense<0.000000e+00> : vector<8xf32>
    %261 = vector.multi_reduction <add>, %260, %cst_154 [1] : vector<8x32xf32> to vector<8xf32>
    %262 = vector.shape_cast %261 : vector<8xf32> to vector<8x1xf32>
    %cst_155 = arith.constant 3.200000e+01 : f32
    %263 = vector.broadcast %cst_155 : f32 to vector<8x1xf32>
    %264 = arith.divf %262, %263 : vector<8x1xf32>
    %cst_156 = arith.constant 9.99999997E-7 : f32
    %265 = vector.broadcast %cst_156 : f32 to vector<8x1xf32>
    %266 = arith.addf %264, %265 : vector<8x1xf32>
    %267 = math.rsqrt %266 : vector<8x1xf32>
    %268 = vector.broadcast %267 : vector<8x1xf32> to vector<8x32xf32>
    %269 = arith.mulf %258, %268 : vector<8x32xf32>
    %270 = vector.broadcast %259 : vector<1x32xf32> to vector<8x32xf32>
    %271 = arith.mulf %269, %270 : vector<8x32xf32>
    %c1_i32 = arith.constant 1 : i32
    %272 = vector.broadcast %c1_i32 : i32 to vector<8x1xi32>
    %273 = arith.cmpi ne, %1, %272 : vector<8x1xi32>
    %274 = arith.extui %273 : vector<8x1xi1> to vector<8x1xi32>
    %275 = arith.sitofp %274 : vector<8x1xi32> to vector<8x1xf32>
    %276 = vector.broadcast %275 : vector<8x1xf32> to vector<8x32xf32>
    %277 = arith.mulf %271, %276 : vector<8x32xf32>
    %cst_157 = arith.constant dense<0.000000e+00> : vector<32xf32>
    %278 = vector.multi_reduction <add>, %277, %cst_157 [0] : vector<8x32xf32> to vector<32xf32>
    %279 = vector.shape_cast %278 : vector<32xf32> to vector<1x32xf32>
    %cst_158 = arith.constant dense<0.000000e+00> : vector<1xf32>
    %280 = vector.multi_reduction <add>, %275, %cst_158 [0] : vector<8x1xf32> to vector<1xf32>
    %281 = vector.shape_cast %280 : vector<1xf32> to vector<1x1xf32>
    %cst_159 = arith.constant 1.000000e+00 : f32
    %282 = vector.broadcast %cst_159 : f32 to vector<1x1xf32>
    %283 = arith.maximumf %281, %282 : vector<1x1xf32>
    %284 = vector.broadcast %283 : vector<1x1xf32> to vector<1x32xf32>
    %285 = arith.divf %279, %284 : vector<1x32xf32>
    %286 = vector.shape_cast %285 : vector<1x32xf32> to vector<1x1x32xf32>
    %c0_160 = arith.constant 0 : index
    %c0_161 = arith.constant 0 : index
    %c0_162 = arith.constant 0 : index
    %287 = vector.load %arg24[%c0_160, %c0_161, %c0_162] : memref<1x1x32xf32, #tpu.memory_space<vmem>>, vector<1x1x32xf32>
    tpu.vector_store %arg24[%c0_160, %c0_161, %c0_162], %286 {strides = array<i32>} : memref<1x1x32xf32, #tpu.memory_space<vmem>>, vector<1x1x32xf32>,
    return
  }
  func.func @transform_0(%arg0: i32) -> (i32, i32, i32) {
    %c0_i32 = arith.constant 0 : i32
    %c0_i32_0 = arith.constant 0 : i32
    %c0_i32_1 = arith.constant 0 : i32
    return %arg0, %c0_i32, %c0_i32_0 : i32, i32, i32
  }
  func.func @transform_1(%arg0: i32) -> (i32, i32) {
    %c0_i32 = arith.constant 0 : i32
    %c0_i32_0 = arith.constant 0 : i32
    %c0_i32_1 = arith.constant 0 : i32
    return %c0_i32, %c0_i32_0 : i32, i32
  }
  func.func @transform_2(%arg0: i32) -> (i32, i32, i32, i32) {
    %c0_i32 = arith.constant 0 : i32
    %c0_i32_0 = arith.constant 0 : i32
    %c0_i32_1 = arith.constant 0 : i32
    %c0_i32_2 = arith.constant 0 : i32
    return %arg0, %c0_i32, %c0_i32_0, %c0_i32_1 : i32, i32, i32, i32
  }
  func.func @transform_3(%arg0: i32) -> (i32, i32, i32) {
    %c0_i32 = arith.constant 0 : i32
    %c0_i32_0 = arith.constant 0 : i32
    %c0_i32_1 = arith.constant 0 : i32
    %c0_i32_2 = arith.constant 0 : i32
    return %c0_i32, %c0_i32_0, %c0_i32_1 : i32, i32, i32
  }
  func.func @transform_4(%arg0: i32) -> (i32, i32, i32, i32) {
    %c0_i32 = arith.constant 0 : i32
    %c0_i32_0 = arith.constant 0 : i32
    %c0_i32_1 = arith.constant 0 : i32
    %c0_i32_2 = arith.constant 0 : i32
    return %arg0, %c0_i32, %c0_i32_0, %c0_i32_1 : i32, i32, i32, i32
  }
  func.func @transform_5(%arg0: i32) -> (i32, i32, i32) {
    %c0_i32 = arith.constant 0 : i32
    %c0_i32_0 = arith.constant 0 : i32
    %c0_i32_1 = arith.constant 0 : i32
    %c0_i32_2 = arith.constant 0 : i32
    return %c0_i32, %c0_i32_0, %c0_i32_1 : i32, i32, i32
  }
  func.func @transform_6(%arg0: i32) -> (i32, i32, i32, i32) {
    %c0_i32 = arith.constant 0 : i32
    %c0_i32_0 = arith.constant 0 : i32
    %c0_i32_1 = arith.constant 0 : i32
    %c0_i32_2 = arith.constant 0 : i32
    %c0_i32_3 = arith.constant 0 : i32
    return %c0_i32, %c0_i32_0, %c0_i32_1, %c0_i32_2 : i32, i32, i32, i32
  }
  func.func @transform_7(%arg0: i32) -> (i32, i32, i32) {
    %c0_i32 = arith.constant 0 : i32
    %c0_i32_0 = arith.constant 0 : i32
    %c0_i32_1 = arith.constant 0 : i32
    %c0_i32_2 = arith.constant 0 : i32
    return %c0_i32, %c0_i32_0, %c0_i32_1 : i32, i32, i32
  }
  func.func @transform_8(%arg0: i32) -> (i32, i32, i32) {
    %c0_i32 = arith.constant 0 : i32
    %c0_i32_0 = arith.constant 0 : i32
    %c0_i32_1 = arith.constant 0 : i32
    %c0_i32_2 = arith.constant 0 : i32
    return %c0_i32, %c0_i32_0, %c0_i32_1 : i32, i32, i32
  }
  func.func @transform_9(%arg0: i32) -> (i32, i32, i32, i32) {
    %c0_i32 = arith.constant 0 : i32
    %c0_i32_0 = arith.constant 0 : i32
    %c0_i32_1 = arith.constant 0 : i32
    %c0_i32_2 = arith.constant 0 : i32
    %c0_i32_3 = arith.constant 0 : i32
    return %c0_i32, %c0_i32_0, %c0_i32_1, %c0_i32_2 : i32, i32, i32, i32
  }
  func.func @transform_10(%arg0: i32) -> (i32, i32, i32) {
    %c0_i32 = arith.constant 0 : i32
    %c0_i32_0 = arith.constant 0 : i32
    %c0_i32_1 = arith.constant 0 : i32
    %c0_i32_2 = arith.constant 0 : i32
    return %c0_i32, %c0_i32_0, %c0_i32_1 : i32, i32, i32
  }
  func.func @transform_11(%arg0: i32) -> (i32, i32) {
    %c0_i32 = arith.constant 0 : i32
    %c0_i32_0 = arith.constant 0 : i32
    %c0_i32_1 = arith.constant 0 : i32
    return %c0_i32, %c0_i32_0 : i32, i32
  }
  func.func @transform_12(%arg0: i32) -> (i32, i32, i32) {
    %c0_i32 = arith.constant 0 : i32
    %c0_i32_0 = arith.constant 0 : i32
    %c0_i32_1 = arith.constant 0 : i32
    %c0_i32_2 = arith.constant 0 : i32
    return %c0_i32, %c0_i32_0, %c0_i32_1 : i32, i32, i32
  }
  func.func @transform_13(%arg0: i32) -> (i32, i32, i32, i32) {
    %c0_i32 = arith.constant 0 : i32
    %c0_i32_0 = arith.constant 0 : i32
    %c0_i32_1 = arith.constant 0 : i32
    %c0_i32_2 = arith.constant 0 : i32
    %c0_i32_3 = arith.constant 0 : i32
    return %c0_i32, %c0_i32_0, %c0_i32_1, %c0_i32_2 : i32, i32, i32, i32
  }
  func.func @transform_14(%arg0: i32) -> (i32, i32, i32) {
    %c0_i32 = arith.constant 0 : i32
    %c0_i32_0 = arith.constant 0 : i32
    %c0_i32_1 = arith.constant 0 : i32
    %c0_i32_2 = arith.constant 0 : i32
    return %c0_i32, %c0_i32_0, %c0_i32_1 : i32, i32, i32
  }
  func.func @transform_15(%arg0: i32) -> (i32, i32, i32) {
    %c0_i32 = arith.constant 0 : i32
    %c0_i32_0 = arith.constant 0 : i32
    %c0_i32_1 = arith.constant 0 : i32
    %c0_i32_2 = arith.constant 0 : i32
    return %c0_i32, %c0_i32_0, %c0_i32_1 : i32, i32, i32
  }
  func.func @transform_16(%arg0: i32) -> (i32, i32, i32) {
    %c0_i32 = arith.constant 0 : i32
    %c0_i32_0 = arith.constant 0 : i32
    %c0_i32_1 = arith.constant 0 : i32
    %c0_i32_2 = arith.constant 0 : i32
    return %c0_i32, %c0_i32_0, %c0_i32_1 : i32, i32, i32
  }
  func.func @transform_17(%arg0: i32) -> (i32, i32, i32, i32) {
    %c0_i32 = arith.constant 0 : i32
    %c0_i32_0 = arith.constant 0 : i32
    %c0_i32_1 = arith.constant 0 : i32
    %c0_i32_2 = arith.constant 0 : i32
    %c0_i32_3 = arith.constant 0 : i32
    return %c0_i32, %c0_i32_0, %c0_i32_1, %c0_i32_2 : i32, i32, i32, i32
  }
  func.func @transform_18(%arg0: i32) -> (i32, i32, i32) {
    %c0_i32 = arith.constant 0 : i32
    %c0_i32_0 = arith.constant 0 : i32
    %c0_i32_1 = arith.constant 0 : i32
    %c0_i32_2 = arith.constant 0 : i32
    return %c0_i32, %c0_i32_0, %c0_i32_1 : i32, i32, i32
  }
  func.func @transform_19(%arg0: i32) -> (i32, i32, i32) {
    %c0_i32 = arith.constant 0 : i32
    %c0_i32_0 = arith.constant 0 : i32
    %c0_i32_1 = arith.constant 0 : i32
    %c0_i32_2 = arith.constant 0 : i32
    return %c0_i32, %c0_i32_0, %c0_i32_1 : i32, i32, i32
  }
  func.func @transform_20(%arg0: i32) -> (i32, i32, i32, i32) {
    %c0_i32 = arith.constant 0 : i32
    %c0_i32_0 = arith.constant 0 : i32
    %c0_i32_1 = arith.constant 0 : i32
    %c0_i32_2 = arith.constant 0 : i32
    %c0_i32_3 = arith.constant 0 : i32
    return %c0_i32, %c0_i32_0, %c0_i32_1, %c0_i32_2 : i32, i32, i32, i32
  }
  func.func @transform_21(%arg0: i32) -> (i32, i32, i32) {
    %c0_i32 = arith.constant 0 : i32
    %c0_i32_0 = arith.constant 0 : i32
    %c0_i32_1 = arith.constant 0 : i32
    %c0_i32_2 = arith.constant 0 : i32
    return %c0_i32, %c0_i32_0, %c0_i32_1 : i32, i32, i32
  }
  func.func @transform_22(%arg0: i32) -> (i32, i32) {
    %c0_i32 = arith.constant 0 : i32
    %c0_i32_0 = arith.constant 0 : i32
    %c0_i32_1 = arith.constant 0 : i32
    return %c0_i32, %c0_i32_0 : i32, i32
  }
  func.func @transform_23(%arg0: i32) -> (i32, i32, i32) {
    %c0_i32 = arith.constant 0 : i32
    %c0_i32_0 = arith.constant 0 : i32
    %c0_i32_1 = arith.constant 0 : i32
    return %arg0, %c0_i32, %c0_i32_0 : i32, i32, i32
  }
}

</mosaic_0001>

<bundles_post_ra>
// kernel: flan_t5_text_encoder.1
= control target key start
LH: loop header
LB: loop body
LE: loop exit
PB: predicated region body
PF: predicated region fallthrough
CT: control target
= control target key end

     0   :  { %s7676_s0 = inlined_call_operand.vmem [shape: s32[2,8,1], index: 0, kind: input, shape index: {}]   ;;  %s7677_s1 = inlined_call_operand.vmem [shape: bf16[64,32], index: 1, kind: input, shape index: {}]   ;;  %s7678_s2 = inlined_call_operand.vmem [shape: f32[2,4,8,8], index: 2, kind: input, shape index: {}]   ;;  %s7679_s3 = inlined_call_operand.vmem [shape: f32[4,8,8], index: 3, kind: input, shape index: {}]   ;;  %s7680_s4 = inlined_call_operand.vmem [shape: f32[2,4,8,8], index: 4, kind: input, shape index: {}]   ;;  %s7681_s5 = inlined_call_operand.vmem [shape: f32[1,1,32], index: 5, kind: input, shape index: {}]   ;;  %s7682_s6 = inlined_call_operand.vmem [shape: bf16[1,3,32,32], index: 6, kind: input, shape index: {}]   ;;  %s7683_s7 = inlined_call_operand.vmem [shape: bf16[1,32,32], index: 7, kind: input, shape index: {}]   ;;  %s7684_s8 = inlined_call_operand.vmem [shape: f32[1,1,32], index: 8, kind: input, shape index: {}]   ;;  %s7685_s9 = inlined_call_operand.vmem [shape: bf16[1,2,32,64], index: 9, kind: input, shape index: {}]   ;;  %s7686_s10 = inlined_call_operand.vmem [shape: bf16[1,64,32], index: 10, kind: input, shape index: {}]   ;;  %s7687_s11 = inlined_call_operand.vmem [shape: f32[1,32], index: 11, kind: input, shape index: {}]   ;;  %s7688_s12 = inlined_call_operand.vmem [shape: f32[1,1,32], index: 12, kind: input, shape index: {}]   ;;  %s7689_s13 = inlined_call_operand.vmem [shape: bf16[1,3,32,32], index: 13, kind: input, shape index: {}]   ;;  %s7690_s14 = inlined_call_operand.vmem [shape: bf16[1,32,32], index: 14, kind: input, shape index: {}]   ;;  %s7691_s15 = inlined_call_operand.vmem [shape: f32[1,1,32], index: 15, kind: input, shape index: {}]   ;;  %s7692_s16 = inlined_call_operand.vmem [shape: bf16[1,32,32], index: 16, kind: input, shape index: {}]   ;;  %s7693_s17 = inlined_call_operand.vmem [shape: bf16[1,2,32,32], index: 17, kind: input, shape index: {}]   ;;  %s7694_s18 = inlined_call_operand.vmem [shape: bf16[1,32,32], index: 18, kind: input, shape index: {}]   ;;  %s7695_s19 = inlined_call_operand.vmem [shape: f32[1,1,32], index: 19, kind: input, shape index: {}]   ;;  %s7696_s20 = inlined_call_operand.vmem [shape: bf16[1,2,32,64], index: 20, kind: input, shape index: {}]   ;;  %s7697_s21 = inlined_call_operand.vmem [shape: bf16[1,64,32], index: 21, kind: input, shape index: {}]   ;;  %s7698_s22 = inlined_call_operand.vmem [shape: f32[1,32], index: 22, kind: input, shape index: {}]   ;;  %s7699_s23 = inlined_call_operand.hbm [shape: f32[2,1,32], index: 23, kind: output, shape index: {}]  }
   0x1   :  { %7725 = sst [smem:[#allocation10_spill]] %s7676_s0 }
   0x2   :  { %7726 = sst [smem:[#allocation11_spill]] %s7677_s1 }
   0x3   :  { %7727 = sst [smem:[#allocation12_spill]] %s7678_s2 }
   0x4   :  { %7728 = sst [smem:[#allocation13_spill]] %s7679_s3 }
   0x5   :  { %7729 = sst [smem:[#allocation14_spill]] %s7680_s4 }
   0x6   :  { %7730 = sst [smem:[#allocation15_spill]] %s7681_s5 }
   0x7   :  { %7731 = sst [smem:[#allocation16_spill]] %s7682_s6 }
   0x8   :  { %7732 = sst [smem:[#allocation17_spill]] %s7683_s7 }
   0x9   :  { %7733 = sst [smem:[#allocation18_spill]] %s7684_s8 }
   0xa   :  { %7734 = sst [smem:[#allocation19_spill]] %s7685_s9 }
   0xb   :  { %7735 = sst [smem:[#allocation20_spill]] %s7686_s10 }
   0xc   :  { %7736 = sst [smem:[#allocation21_spill]] %s7687_s11 }
   0xd   :  { %28 = vsyncpa [#allocation3], 0 }
   0xe   :  { %30 = vsyncpa [#allocation3 + $0x1], 0  ;;  %s6810_s4 = smov 0   ;;  %s6812_s30 = smov 0  }
   0xf   :  { %s6814_s24 = smov 0   ;;  %s6816_s25 = smov 0  }
  0x10 LB: > { %7737 = sst [smem:[#allocation5_spill]] %s6664_s4  ;;  %s6831_s5 = sadd.s32 4294967295, %s6676_s25   ;;  %s6676_s25 = sphi %s6816_s25, %s7766_s25   ;;  %s6672_s24 = sphi %s6814_s24, %s7768_s24   ;;  %s6668_s30 = sphi %s6812_s30, %s7770_s30   ;;  %s6664_s4 = sphi %s6810_s4, %s7769_s4  }
  0x11   : > { %7738 = sst [smem:[#allocation6_spill]] %s6672_s24  ;;  %s5882_s1 = sadd.s32 4294967294, %s6676_s25  }
  0x12   : > { %s6835_s26 = sadd.s32 1, %s6676_s25   ;;  %s541_s2 = sadd.s32 1, %s6672_s24 }
  0x13   : > { %7739 = sst [smem:[#allocation7_spill]] %s6835_s26  ;;  %s538_s6 = ssub.s32 %s6676_s25, %s6835_s26 }
  0x14   : > { %p551_p0 = scmp.ne.s32.totalorder %s6672_s24, %s6668_s30  ;;  %p539_p1 = scmp.eq.s32.totalorder %s538_s6, 0 }
  0x15   : > { %p552_p2 = scmp.eq.s32.totalorder %s6831_s5, 1  ;;  %p557_p3 = scmp.ne.s32.totalorder %s6668_s30, %s6664_s4 }
  0x16   : > { %p558_p4 = scmp.eq.s32.totalorder %s5882_s1, 1  ;;  %p5885_p7 = scmp.ge.s32.totalorder %s6676_s25, 1 }
  0x17   : > { %s6846_s27 = scalar_select %p539_p1, %s6672_s24, %s541_s2  }
  0x18   : > { %p6848_p5 = por %p552_p2, %p551_p0  ;;  %p6852_p6 = por %p558_p4, %p557_p3 }
  0x19   : > { %7740 = sst [smem:[#allocation8_spill]] %s6846_s27  ;;  %p659_p8 = scmp.lt.s32.totalorder %s6676_s25, 3 }
  0x1a   : > { %s7742_s28 = scalar_select %p6852_p6, 1, 0 }
  0x1b   : > { %p660_p9 = pnand %p5885_p7, %p659_p8 }
  0x1c   : > { %7743 = sst [smem:[#allocation9_spill]] %s7742_s28  ;;  %p731_p10 = scmp.lt.s32.totalorder (!%p660_p9), %s6831_s5, 1  ;;  %v6678_v1 = vmov (!%p660_p9), 0   ;;  %v6679_v2 = vmov (!%p660_p9), 0.0   ;;  %vm6680_vm0 = vmmov (!%p660_p9), 0   ;;  %v747_v7 = vlaneseq (!%p660_p9) }
  0x1d   : > { %663 = sbr.rel (%p660_p9) target bundleno = 6189 (0x182d), region = 112  ;;  %s7744_s0 = sld [smem:[#allocation11_spill]] (!%p660_p9)  ;;  %6501 = vset.pattern.permute.xlu0 (!%p660_p9), %v6678_v1  ;;  %6167 = vmatprep.subr.bf16.mxu0 (!%p660_p9), %v6679_v2  ;;  %vm788_vm2 = vcmask (!%p660_p9), 523264   ;;  %vm846_vm3 = vcmask (!%p660_p9), 261120   ;;  %v6684_v47 = vmov (!%p660_p9), 1983009808  }
  0x1e   : > { %6179 = vmatprep.subr.bf16.mxu1 (!%p660_p9), %v6679_v2  ;;  %6502 = vset.pattern.permute.xlu1 (!%p660_p9), %v6678_v1  ;;  %s7745_s24 = sld [smem:[#allocation10_spill]] (!%p660_p9)  ;;  %v748_v8 = vand.u32 (!%p660_p9), 127, %v747_v7  ;;  %s7746_s27 = sld [smem:[#allocation16_spill]] (!%p660_p9)  ;;  %v1049_v48 = vunpack.c.l.s4 (!%p660_p9), %v6684_v47  ;;  %v6685_v49 = vmov (!%p660_p9), 1934713408   ;;  %v1052_v53 = vshrl.u32 (!%p660_p9), %v747_v7, 7 }
  0x1f   : > { %6175 = vmatprep.mubr.msk.bf16.mxu0 (!%p660_p9), %vm6680_vm0, %v6679_v2  ;;  %6183 = vmatprep.mubr.msk.bf16.mxu1 (!%p660_p9), %vm6680_vm0, %v6679_v2  ;;  %s7747_s28 = sld [smem:[#allocation15_spill]] (!%p660_p9)  ;;  %s7721_s6 = smov (!%p660_p9), 120   ;;  %v1081_v50 = vunpack.c.l.s4 (!%p660_p9), %v6685_v49  ;;  %vm1474_vm4 = vcmask (!%p660_p9), 64512   ;;  %vm2264_vm5 = vcmask (!%p660_p9), 130048   ;;  %vm2266_vm6 = vcmask (!%p660_p9), 195584  }
  0x20   : > { %s7719_s4 = smov (!%p660_p9), 112   ;;  %v1050_v52 = vunpack.c.0.s8 (!%p660_p9), %v1049_v48  ;;  %s7748_s3 = sld [smem:[#allocation12_spill]] (!%p660_p9)  ;;  %vm5772_vm8 = vcmask (!%p660_p9), 7168   ;;  %vm5788_vm9 = vcmask (!%p660_p9), 253952  }
  0x21   : > { %v1082_v54 = vunpack.c.0.s8 (!%p660_p9), %v1081_v50  ;;  %s7750_s9 = sld [smem:[#allocation19_spill]] (!%p660_p9)  ;;  %s7751_s8 = sld [smem:[#allocation18_spill]] (!%p660_p9) }
  0x22   : > { %v6950_v58 = vsub.s32 (!%p660_p9), %v1050_v52, %v1052_v53  ;;  %s7752_s10 = sld [smem:[#allocation20_spill]] (!%p660_p9)  ;;  %s7761_s11 = sld [smem:[#allocation21_spill]] (!%p660_p9) }
  0x23   : > { %v6503_v0 = vld [vmem:[%s7744_s0] sm:$0xff] (!%p660_p9)   ;;  %v6504_v3 = vld [vmem:[%s7744_s0 + $0x8] sm:$0xff] (!%p660_p9)   ;;  %v6505_v5 = vld [vmem:[%s7744_s0 + $0x10] sm:$0xff] (!%p660_p9)   ;;  %v6952_v61 = vsub.s32 (!%p660_p9), %v1082_v54, %v1052_v53 }
  0x24   : > { %s6864_s1 = scalar_select %p731_p10, %s6831_s5, 1  ;;  %6168 = vmatpush3.bf16.msra.mxu0 %v6503_v0  ;;  %v6506_v6 = vld [vmem:[%s7744_s0 + $0x18] sm:$0xff]   ;;  %v6507_v18 = vld [vmem:[%s7746_s27] sm:$0xff]   ;;  %v6509_v20 = vld [vmem:[%s7746_s27 + $0x8] sm:$0xff]  }
  0x25   : > { %6169 = vmatprep.subr.bf16.mxu0 %v6679_v2  ;;  %v6508_v19 = vld [vmem:[%s7746_s27 + $0x20] sm:$0xff]   ;;  %6180 = vmatpush3.bf16.msra.mxu1 %v6507_v18  ;;  %v6510_v21 = vld [vmem:[%s7746_s27 + $0x28] sm:$0xff]   ;;  %v6511_v29 = vld [vmem:[%s7746_s27 + $0x10] sm:$0xff]   ;;  %s7713_s0 = smov 8  }
  0x26   : > { %s5886_s29 = sshll.u32 %s6864_s1, 3  ;;  %6181 = vmatprep.subr.bf16.mxu1 %v6679_v2  ;;  %v5897_v26 = vld [vmem:[%s7747_s28] ss:$0 sm:$0xff]  ;;  %v6512_v31 = vld [vmem:[%s7746_s27 + $0x18] sm:$0xff]   ;;  %s7710_s28 = sshll.u32 %s6864_s1, 5 }
  0x27   : > { %s6875_s26 = scalar_lea.vmem %s7745_s24, %s5886_s29  ;;  %s7717_s24 = smov 104  }
  0x28   : > { %v746_v4 = vld [vmem:[%s6875_s26] sm:$0xff]  ;;  %6170 = vmatpush3.bf16.msra.mxu0 %v6504_v3  ;;  %s739_s2 = scalar_lea.vmem %s7748_s3, %s7710_s28  ;;  %s7749_s3 = sld [smem:[#allocation17_spill]] }
  0x29   : > { %750 = vperm.xlu0 %6501, %v746_v4   ;;  %6171 = vmatprep.subr.bf16.mxu0 %v6679_v2  ;;  %s7715_s28 = smov 16   ;;  %s7711_s29 = smov 24  }
  0x2a   : > { %6182 = vmatpush3.bf16.msra.mxu1 %v6509_v20 }
  0x2b   : > { %6187 = vmatprep.subr.bf16.mxu1 %v6679_v2 }
  0x2c   : > { %6172 = vmatpush3.bf16.msra.mxu0 %v6505_v5 }
  0x2d   : > { %6173 = vmatprep.subr.bf16.mxu0 %v6679_v2 }
  0x30   : > { %6174 = vmatpush3.bf16.msra.mxu0 %v6506_v6 }
  0x31   : > { %6195 = vmatprep.subr.bf16.mxu0 %v6679_v2 }
  0xa8   : > { %v751_v9 = vpop.permute.xlu0 %750 }
  0xa9   : > { %vm752_vm1 = vcmp.eq.s32.totalorder %v751_v9, %v748_v8 }
  0xaa   : > { %v5891_v10 = vsel %vm752_vm1, 1.0, %v6679_v2 }
  0xab   : > { %v755_v11 = vpack.c.bf16 %v5891_v10, %v5891_v10 }
  0xad   : > { %6176 = vmatmul.mubr.msk.bf16.vlgmr.msra.gmra.mrb[0].mxu0 %vm788_vm2, %v755_v11 }
  0xae   : > { %6199 = vmatprep.mubr.msk.bf16.mxu0 %vm6680_vm0, %v6679_v2  ;;  %6196 = vmatpush3.bf16.msra.mxu0 %v6508_v19 }
  0xaf   : > { %6197 = vmatprep.subr.bf16.mxu0 %v6679_v2 }
  0xb2   : > { %6198 = vmatpush3.bf16.msra.mxu0 %v6510_v21 }
  0xb3   : > { %6203 = vmatprep.subr.mxu0 %v6679_v2 }
 0x180   : > { %v6896_v12 = vpop.f32.mrb[0].mxu0 }
 0x181   : > { %v6177_v13 = vpop.f32.mrb[1].mxu0  ;;  %v845_v14 = vmul.f32 %v6896_v12, %v6896_v12 }
 0x182   : > { %v829_v15 = vpop.f32.mrb[2].mxu0 }
 0x183   : > { %v6178_v16 = vpop.f32.mrb[3].mxu0  ;;  %v847_v17 = vsel %vm846_vm3, %v845_v14, 0.0 }
 0x184   : > { %848 = vadd.xlane.f32.xlu0 %v847_v17 }
 0x211   : > { %v849_v22 = vpop.xlane.xlu0 %848 }
 0x212   : > { %v851_v23 = vmul.f32 0.03125, %v849_v22 }
 0x214   : > { %v852_v24 = vadd.f32 1e-06, %v851_v23 }
 0x216   : > { %6547 = vrsqrt.f32 %v852_v24 }
 0x220   : > { %v6548_v25 = vpop.eup %6547 }
 0x221   : > { %v6921_v27 = vmul.f32 %v6548_v25, %v6896_v12 }
 0x223   : > { %v861_v28 = vmul.f32 %v5897_v26, %v6921_v27 }
 0x225   : > { %v862_v30 = vpack.c.bf16 %v861_v28, %v861_v28 }
 0x227   : > { %6184 = vmatmul.mubr.msk.bf16.vlgmr.msra.gmra.mrb[0].mxu1 %vm846_vm3, %v862_v30  ;;  %6200 = vmatmul.mubr.msk.bf16.vlgmr.msra.gmra.mrb[4].mxu0 %vm846_vm3, %v862_v30 }
 0x228   : > { %6188 = vmatpush3.bf16.msra.mxu1 %v6511_v29  ;;  %6191 = vmatprep.mubr.msk.bf16.mxu1 %vm6680_vm0, %v6679_v2 }
 0x229   : > { %6189 = vmatprep.subr.bf16.mxu1 %v6679_v2  ;;  %6205 = vmatprep.mubr.msk.f32.mxu0 %vm6680_vm0, %v6679_v2 }
 0x22c   : > { %6190 = vmatpush3.bf16.msra.mxu1 %v6512_v31 }
 0x22d   : > { %6208 = vmatprep.subr.mxu1 %v6679_v2 }
 0x22f   : > { %6192 = vmatmul.mubr.msk.bf16.vlgmr.msra.gmra.mrb[4].mxu1 %vm846_vm3, %v862_v30 }
 0x230   : > { %6210 = vmatprep.mubr.msk.f32.mxu1 %vm6680_vm0, %v6679_v2 }
 0x2fa   : > { %v916_v32 = vpop.f32.mrb[0].mxu1  ;;  %v6941_v33 = vpop.f32.mrb[4].mxu0 }
 0x2fb   : > { %1037 = vrot.lane.b32.xlu1 %v916_v32, %s7721_s6  ;;  %v6185_v34 = vpop.f32.mrb[1].mxu1  ;;  %v6201_v35 = vpop.f32.mrb[5].mxu0 }
 0x2fc   : > { %v919_v36 = vpop.f32.mrb[2].mxu1  ;;  %v1033_v37 = vpop.f32.mrb[6].mxu0 }
 0x2fd   : > { %v6186_v38 = vpop.f32.mrb[3].mxu1  ;;  %v6202_v39 = vpop.f32.mrb[7].mxu0 }
 0x2ff   : > { %1040 = vrot.lane.b32.xlu1 %v916_v32, %s7719_s4 }
 0x302   : > { %v973_v40 = vpop.f32.mrb[4].mxu1 }
 0x303   : > { %1183 = vrot.lane.b32.xlu1 %v973_v40, %s7721_s6  ;;  %v6193_v41 = vpop.f32.mrb[5].mxu1 }
 0x304   : > { %v976_v42 = vpop.f32.mrb[6].mxu1 }
 0x305   : > { %v6194_v43 = vpop.f32.mrb[7].mxu1 }
 0x307   : > { %1186 = vrot.lane.b32.xlu1 %v973_v40, %s7719_s4 }
 0x30b   : > { %1189 = vrot.lane.b32.xlu1 %v973_v40, %s7717_s24 }
 0x30f   : > { %1043 = vrot.lane.b32.xlu1 %v916_v32, %s7717_s24 }
 0x36d   : > { %v1038_v44 = vpop.permute.xlu1 %1037 }
 0x371   : > { %v1041_v45 = vpop.permute.xlu1 %1040 }
 0x372   : > { %v1046_v3 = vcombine.low %v916_v32, %v1041_v45  ;;  %v1047_v4 = vcombine.high %v916_v32, %v1041_v45 }
 0x374   : > { %v1054_v17 = vrot.slane %v1046_v3, %v6950_v58  ;;  %v1061_v18 = vrot.slane %v1047_v4, %v6950_v58 }
 0x375   : > { %v1184_v46 = vpop.permute.xlu1 %1183 }
 0x379   : > { %v1187_v51 = vpop.permute.xlu1 %1186 }
 0x37a   : > { %v1192_v55 = vcombine.low %v973_v40, %v1187_v51  ;;  %v1193_v56 = vcombine.high %v973_v40, %v1187_v51 }
 0x37c   : > { %v1200_v62 = vrot.slane %v1192_v55, %v6950_v58  ;;  %v1207_v63 = vrot.slane %v1193_v56, %v6950_v58 }
 0x37d   : > { %v1190_v57 = vpop.permute.xlu1 %1189 }
 0x37e   : > { %v1208_v59 = vcombine.low %v1184_v46, %v1190_v57  ;;  %v1209_v60 = vcombine.high %v1184_v46, %v1190_v57 }
 0x380   : > { %v1216_v0 = vrot.slane %v1208_v59, %v6950_v58  ;;  %v1223_v1 = vrot.slane %v1209_v60, %v6950_v58 }
 0x381   : > { %v1044_v5 = vpop.permute.xlu1 %1043 }
 0x382   : > { %v1224_v6 = vcombine.low %v1200_v62, %v1216_v0  ;;  %v1225_v7 = vcombine.high %v1200_v62, %v1216_v0  ;;  %v1240_v8 = vcombine.low %v1207_v63, %v1223_v1  ;;  %v1241_v9 = vcombine.high %v1207_v63, %v1223_v1 }
 0x383   : > { %v1062_v10 = vcombine.low %v1038_v44, %v1044_v5  ;;  %v1063_v11 = vcombine.high %v1038_v44, %v1044_v5 }
 0x384   : > { %v1232_v13 = vrot.slane %v1224_v6, %v6952_v61  ;;  %v1239_v14 = vrot.slane %v1225_v7, %v6952_v61  ;;  %v1248_v15 = vrot.slane %v1240_v8, %v6952_v61  ;;  %v1255_v16 = vrot.slane %v1241_v9, %v6952_v61 }
 0x385   : > { %v1070_v19 = vrot.slane %v1062_v10, %v6950_v58  ;;  %v1077_v20 = vrot.slane %v1063_v11, %v6950_v58  ;;  %v832_v10 = vld [vmem:[%s739_s2] sm:$0xff]  ;;  %v833_v11 = vld [vmem:[%s739_s2 + $0x8] sm:$0xff] }
 0x386   : > { %v1260_v21 = vcombine.low %v1232_v13, %v1239_v14  ;;  %v5917_v22 = vcombine.high %v1232_v13, %v1239_v14  ;;  %v1276_v23 = vcombine.low %v1248_v15, %v1255_v16  ;;  %v5918_v24 = vcombine.high %v1248_v15, %v1255_v16 }
 0x387   : > { %v1078_v25 = vcombine.low %v1054_v17, %v1070_v19  ;;  %v1079_v26 = vcombine.high %v1054_v17, %v1070_v19  ;;  %v1094_v28 = vcombine.low %v1061_v18, %v1077_v20  ;;  %v1095_v29 = vcombine.high %v1061_v18, %v1077_v20  ;;  %v834_v19 = vld [vmem:[%s739_s2 + $0x10] sm:$0xff] }
 0x388   : > { %v1267_v30 = vrot.slane %v1260_v21, %v6950_v58  ;;  %v1275_v31 = vrot.slane %v5917_v22, %v6950_v58  ;;  %v1283_v32 = vrot.slane %v1276_v23, %v6950_v58  ;;  %v1291_v34 = vrot.slane %v5918_v24, %v6950_v58  ;;  %v835_v22 = vld [vmem:[%s739_s2 + $0x18] sm:$0xff]  ;;  %s7760_s2 = smov 24  }
 0x389   : > { %v1086_v35 = vrot.slane %v1078_v25, %v6952_v61  ;;  %v1093_v36 = vrot.slane %v1079_v26, %v6952_v61  ;;  %v1102_v37 = vrot.slane %v1094_v28, %v6952_v61  ;;  %v1109_v38 = vrot.slane %v1095_v29, %v6952_v61 }
 0x38a   : > { %v1292_v39 = vcombine.low %v1267_v30, %v1275_v31  ;;  %v1308_v40 = vcombine.low %v1283_v32, %v1291_v34  ;;  %v1293_v45 = vcombine.high %v1267_v30, %v1275_v31  ;;  %v1309_v46 = vcombine.high %v1283_v32, %v1291_v34 }
 0x38b   : > { %v1114_v41 = vcombine.low %v1086_v35, %v1093_v36  ;;  %v5915_v42 = vcombine.high %v1086_v35, %v1093_v36  ;;  %v1130_v43 = vcombine.low %v1102_v37, %v1109_v38  ;;  %v5916_v44 = vcombine.high %v1102_v37, %v1109_v38 }
 0x38c   : > { %v1300_v47 = vrot.slane %v1292_v39, %v6952_v61  ;;  %v1316_v48 = vrot.slane %v1308_v40, %v6952_v61  ;;  %v1307_v60 = vrot.slane %v1293_v45, %v6952_v61  ;;  %v1323_v62 = vrot.slane %v1309_v46, %v6952_v61 }
 0x38d   : > { %v1121_v49 = vrot.slane %v1114_v41, %v6950_v58  ;;  %v1129_v50 = vrot.slane %v5915_v42, %v6950_v58  ;;  %v1137_v51 = vrot.slane %v1130_v43, %v6950_v58  ;;  %v1145_v52 = vrot.slane %v5916_v44, %v6950_v58 }
 0x38e   : > { %v1324_v53 = vcombine.low %v1300_v47, %v1316_v48  ;;  %v1325_v54 = vcombine.high %v1300_v47, %v1316_v48  ;;  %v1326_v6 = vcombine.low %v1307_v60, %v1323_v62  ;;  %v1327_v7 = vcombine.high %v1307_v60, %v1323_v62 }
 0x38f   : > { %v1146_v55 = vcombine.low %v1121_v49, %v1129_v50  ;;  %v1147_v56 = vcombine.high %v1121_v49, %v1129_v50  ;;  %v1162_v57 = vcombine.low %v1137_v51, %v1145_v52  ;;  %v1163_v59 = vcombine.high %v1137_v51, %v1145_v52 }
 0x390   : > { %6204 = vmatpush3.xpose.msk.msra.mxu0 %vm1474_vm4, %v1324_v53  ;;  %6209 = vmatpush3.xpose.msk.msra.mxu1 %vm1474_vm4, %v1325_v54 }
 0x391   : > { %6213 = vmatprep.subr.mxu0 %v6679_v2  ;;  %6218 = vmatprep.subr.mxu1 %v6679_v2  ;;  %v1154_v63 = vrot.slane %v1146_v55, %v6952_v61  ;;  %v1170_v0 = vrot.slane %v1162_v57, %v6952_v61  ;;  %v1161_v4 = vrot.slane %v1147_v56, %v6952_v61 }
 0x392   : > { %v1177_v5 = vrot.slane %v1163_v59, %v6952_v61 }
 0x393   : > { %v1178_v1 = vcombine.low %v1154_v63, %v1170_v0  ;;  %v1179_v3 = vcombine.high %v1154_v63, %v1170_v0 }
 0x394   : > { %v1180_v8 = vcombine.low %v1161_v4, %v1177_v5  ;;  %v1181_v9 = vcombine.high %v1161_v4, %v1177_v5 }
 0x395   : > { %6206 = vmatmul.mubr.msk.f32.vlgmr.msra.gmra.mrb[8].mxu0 %vm1474_vm4, %v1178_v1  ;;  %6211 = vmatmul.mubr.msk.f32.vlgmr.msra.gmra.mrb[8].mxu1 %vm1474_vm4, %v1179_v3 }
 0x396   : > { %6214 = vmatpush3.xpose.msk.msra.mxu0 %vm1474_vm4, %v1326_v6  ;;  %6219 = vmatpush3.xpose.msk.msra.mxu1 %vm1474_vm4, %v1327_v7 }
 0x397   : > { %6215 = vmatprep.mubr.msk.f32.mxu0 %vm6680_vm0, %v6679_v2  ;;  %6220 = vmatprep.mubr.msk.f32.mxu1 %vm6680_vm0, %v6679_v2 }
 0x398   : > { %6223 = vmatprep.subr.mxu0 %v6679_v2  ;;  %6228 = vmatprep.subr.mxu1 %v6679_v2 }
 0x399   : > { %6216 = vmatmul.mubr.msk.f32.vlgmr.msra.gmra.mrb[10].mxu0 %vm1474_vm4, %v1180_v8  ;;  %6221 = vmatmul.mubr.msk.f32.vlgmr.msra.gmra.mrb[10].mxu1 %vm1474_vm4, %v1181_v9 }
 0x39a   : > { %6225 = vmatprep.mubr.msk.f32.mxu0 %vm6680_vm0, %v6679_v2  ;;  %6230 = vmatprep.mubr.msk.f32.mxu1 %vm6680_vm0, %v6679_v2 }
 0x468   : > { %v1547_v13 = vpop.f32.mrb[8].mxu0  ;;  %v1623_v14 = vpop.f32.mrb[8].mxu1 }
 0x469   : > { %v1548_v15 = vadd.f32 %v1547_v13, %v832_v10  ;;  %v1624_v16 = vadd.f32 %v1623_v14, %v833_v11  ;;  %v6207_v17 = vpop.f32.mrb[9].mxu0  ;;  %v6212_v18 = vpop.f32.mrb[9].mxu1 }
 0x46b   : > { %v1782_v20 = vsel %vm1474_vm4, %v1624_v16, -inf  ;;  %v1779_v21 = vsel %vm1474_vm4, %v1548_v15, -inf }
 0x46c   : > { %1783 = vmax.xlane.f32.xlu0 %v1782_v20  ;;  %v1775_v23 = vpop.f32.mrb[10].mxu1  ;;  %1780 = vmax.xlane.f32.xlu1 %v1779_v21  ;;  %v1699_v24 = vpop.f32.mrb[10].mxu0 }
 0x46d   : > { %v1700_v25 = vadd.f32 %v1699_v24, %v834_v19  ;;  %v6217_v26 = vpop.f32.mrb[11].mxu0  ;;  %v6222_v28 = vpop.f32.mrb[11].mxu1  ;;  %v1776_v29 = vadd.f32 %v1775_v23, %v835_v22 }
 0x46f   : > { %v1785_v30 = vsel %vm1474_vm4, %v1700_v25, -inf  ;;  %v1788_v31 = vsel %vm1474_vm4, %v1776_v29, -inf }
 0x470   : > { %1786 = vmax.xlane.f32.xlu0 %v1785_v30 }
 0x474   : > { %1789 = vmax.xlane.f32.xlu0 %v1788_v31 }
 0x47d   : > { %1329 = vrot.lane.b32.xlu1 %v6941_v33, %s7721_s6 }
 0x481   : > { %1335 = vrot.lane.b32.xlu1 %v6941_v33, %s7717_s24  ;;  %s7758_s24 = smov 16  }
 0x4f9   : > { %v1784_v32 = vpop.xlane.xlu0 %1783  ;;  %v1781_v34 = vpop.xlane.xlu1 %1780 }
 0x4fa   : > { %v1792_v35 = vsub.f32 %v1624_v16, %v1784_v32  ;;  %v1791_v36 = vsub.f32 %v1548_v15, %v1781_v34 }
 0x4fc   : > { %v1795_v37 = vmul.f32 1.442695, %v1791_v36  ;;  %v1797_v38 = vmul.f32 1.442695, %v1792_v35 }
 0x4fd   : > { %v1787_v39 = vpop.xlane.xlu0 %1786  ;;  %v1330_v55 = vpop.permute.xlu1 %1329 }
 0x4fe   : > { %v1793_v40 = vsub.f32 %v1700_v25, %v1787_v39  ;;  %6549 = vpow2.f32 %v1795_v37 }
 0x4ff   : > { %6551 = vpow2.f32 %v1797_v38 }
 0x500   : > { %v1799_v41 = vmul.f32 1.442695, %v1793_v40 }
 0x501   : > { %v1790_v42 = vpop.xlane.xlu0 %1789  ;;  %v1336_v57 = vpop.permute.xlu1 %1335 }
 0x502   : > { %v1794_v43 = vsub.f32 %v1776_v29, %v1790_v42  ;;  %6553 = vpow2.f32 %v1799_v41  ;;  %v1354_v60 = vcombine.low %v1330_v55, %v1336_v57  ;;  %v1355_v62 = vcombine.high %v1330_v55, %v1336_v57 }
 0x504   : > { %v1801_v44 = vmul.f32 1.442695, %v1794_v43  ;;  %v1362_v3 = vrot.slane %v1354_v60, %v6950_v58  ;;  %v1369_v4 = vrot.slane %v1355_v62, %v6950_v58 }
 0x506   : > { %6555 = vpow2.f32 %v1801_v44 }
 0x508   : > { %v7020_v45 = vpop.eup %6549 }
 0x509   : > { %v1803_v46 = vsel %vm1474_vm4, %v7020_v45, 0.0  ;;  %v6552_v47 = vpop.eup %6551 }
 0x50a   : > { %1804 = vadd.xlane.f32.xlu0 %v1803_v46  ;;  %v1806_v48 = vsel %vm1474_vm4, %v6552_v47, 0.0 }
 0x50c   : > { %v7025_v49 = vpop.eup %6553 }
 0x50d   : > { %v1809_v50 = vsel %vm1474_vm4, %v7025_v49, 0.0 }
 0x50e   : > { %1807 = vadd.xlane.f32.xlu0 %v1806_v48 }
 0x510   : > { %v7029_v51 = vpop.eup %6555 }
 0x511   : > { %v1812_v52 = vsel %vm1474_vm4, %v7029_v51, 0.0 }
 0x512   : > { %1810 = vadd.xlane.f32.xlu0 %v1809_v50 }
 0x516   : > { %1813 = vadd.xlane.f32.xlu0 %v1812_v52 }
 0x52c   : > { %1332 = vrot.lane.b32.xlu0 %v6941_v33, %s7719_s4  ;;  %s7756_s4 = sld [smem:[#allocation13_spill]] }
 0x532   : > { %s7757_s6 = smov %s7756_s4 }
 0x597   : > { %v1805_v53 = vpop.xlane.xlu0 %1804 }
 0x598   : > { %6557 = vrcp.f32 %v1805_v53 }
 0x59b   : > { %v1808_v54 = vpop.xlane.xlu0 %1807 }
 0x59c   : > { %6559 = vrcp.f32 %v1808_v54 }
 0x59f   : > { %v1811_v56 = vpop.xlane.xlu0 %1810 }
 0x5a0   : > { %6561 = vrcp.f32 %v1811_v56 }
 0x5a2   : > { %v6558_v23 = vpop.eup %6557 }
 0x5a3   : > { %v1814_v59 = vpop.xlane.xlu0 %1813  ;;  %v1819_v39 = vmul.f32 %v6558_v23, %v7020_v45 }
 0x5a4   : > { %6563 = vrcp.f32 %v1814_v59 }
 0x5a6   : > { %v6560_v29 = vpop.eup %6559 }
 0x5a7   : > { %v1333_v63 = vpop.permute.xlu0 %1332  ;;  %v1820_v40 = vmul.f32 %v6560_v29, %v6552_v47 }
 0x5a8   : > { %v1338_v0 = vcombine.low %v6941_v33, %v1333_v63  ;;  %v1339_v1 = vcombine.high %v6941_v33, %v1333_v63 }
 0x5aa   : > { %v1346_v5 = vrot.slane %v1338_v0, %v6950_v58  ;;  %v1353_v6 = vrot.slane %v1339_v1, %v6950_v58  ;;  %v6562_v32 = vpop.eup %6561 }
 0x5ab   : > { %v1821_v43 = vmul.f32 %v6562_v32, %v7025_v49 }
 0x5ac   : > { %v1370_v7 = vcombine.low %v1346_v5, %v1362_v3  ;;  %v1371_v8 = vcombine.high %v1346_v5, %v1362_v3  ;;  %v1386_v9 = vcombine.low %v1353_v6, %v1369_v4  ;;  %v1387_v10 = vcombine.high %v1353_v6, %v1369_v4  ;;  %v6513_v4 = vld [vmem:[%s7749_s3] sm:$0xff]  }
 0x5ae   : > { %v1378_v11 = vrot.slane %v1370_v7, %v6952_v61  ;;  %v1385_v13 = vrot.slane %v1371_v8, %v6952_v61  ;;  %v1394_v33 = vrot.slane %v1386_v9, %v6952_v61  ;;  %v1401_v14 = vrot.slane %v1387_v10, %v6952_v61  ;;  %v6564_v38 = vpop.eup %6563 }
 0x5af   : > { %v1822_v44 = vmul.f32 %v6564_v38, %v7029_v51 }
 0x5b0   : > { %v1406_v15 = vcombine.low %v1378_v11, %v1385_v13  ;;  %v5919_v16 = vcombine.high %v1378_v11, %v1385_v13  ;;  %v1422_v17 = vcombine.low %v1394_v33, %v1401_v14  ;;  %v5920_v18 = vcombine.high %v1394_v33, %v1401_v14  ;;  %v6514_v33 = vld [vmem:[%s7749_s3 + $0x8] sm:$0xff]   ;;  %s7759_s3 = smov 8  }
 0x5b2   : > { %v1413_v19 = vrot.slane %v1406_v15, %v6950_v58  ;;  %v1421_v20 = vrot.slane %v5919_v16, %v6950_v58  ;;  %v1429_v21 = vrot.slane %v1422_v17, %v6950_v58  ;;  %v1437_v22 = vrot.slane %v5920_v18, %v6950_v58 }
 0x5b4   : > { %v1438_v24 = vcombine.low %v1413_v19, %v1421_v20  ;;  %v1454_v25 = vcombine.low %v1429_v21, %v1437_v22  ;;  %v1439_v26 = vcombine.high %v1413_v19, %v1421_v20  ;;  %v1455_v28 = vcombine.high %v1429_v21, %v1437_v22 }
 0x5b6   : > { %v1446_v30 = vrot.slane %v1438_v24, %v6952_v61  ;;  %v1462_v31 = vrot.slane %v1454_v25, %v6952_v61  ;;  %v1453_v34 = vrot.slane %v1439_v26, %v6952_v61  ;;  %v1469_v35 = vrot.slane %v1455_v28, %v6952_v61 }
 0x5b8   : > { %v1470_v36 = vcombine.low %v1446_v30, %v1462_v31  ;;  %v1471_v37 = vcombine.high %v1446_v30, %v1462_v31  ;;  %v1472_v41 = vcombine.low %v1453_v34, %v1469_v35  ;;  %v1473_v42 = vcombine.high %v1453_v34, %v1469_v35 }
 0x5ba   : > { %6224 = vmatpush3.msra.mxu0 %v1470_v36  ;;  %6229 = vmatpush3.msra.mxu1 %v1471_v37 }
 0x5bb   : > { %6226 = vmatmul.mubr.msk.f32.vlgmr.msra.gmra.mrb[12].mxu0 %vm1474_vm4, %v1819_v39  ;;  %6231 = vmatmul.mubr.msk.f32.vlgmr.msra.gmra.mrb[12].mxu1 %vm1474_vm4, %v1820_v40 }
 0x5bc   : > { %6233 = vmatprep.subr.mxu0 %v6679_v2  ;;  %6238 = vmatprep.subr.mxu1 %v6679_v2 }
 0x5bd   : > { %6234 = vmatpush3.msra.mxu0 %v1472_v41  ;;  %6239 = vmatpush3.msra.mxu1 %v1473_v42 }
 0x5be   : > { %6235 = vmatprep.mubr.msk.f32.mxu0 %vm6680_vm0, %v6679_v2  ;;  %6240 = vmatprep.mubr.msk.f32.mxu1 %vm6680_vm0, %v6679_v2 }
 0x5bf   : > { %6236 = vmatmul.mubr.msk.f32.vlgmr.msra.gmra.mrb[14].mxu0 %vm1474_vm4, %v1821_v43  ;;  %6241 = vmatmul.mubr.msk.f32.vlgmr.msra.gmra.mrb[14].mxu1 %vm1474_vm4, %v1822_v44 }
 0x5c0   : > { %6243 = vmatprep.subr.bf16.mxu0 %v6679_v2  ;;  %6247 = vmatprep.mubr.msk.bf16.mxu0 %vm6680_vm0, %v6679_v2 }
 0x5c1   : > { %6251 = vmatprep.subr.bf16.mxu1 %v6679_v2  ;;  %6255 = vmatprep.mubr.msk.bf16.mxu1 %vm6680_vm0, %v6679_v2 }
 0x5c2   : > { %6244 = vmatpush3.bf16.msra.mxu0 %v6513_v4  ;;  %v6524_v4 = vld [vmem:[%s7752_s10 + $0x8] sm:$0xff]  }
 0x5c3   : > { %6245 = vmatprep.subr.bf16.mxu0 %v6679_v2 }
 0x5c6   : > { %6246 = vmatpush3.bf16.msra.mxu0 %v6514_v33 }
 0x5c7   : > { %6259 = vmatprep.subr.bf16.mxu0 %v6679_v2 }
 0x68e   : > { %v1892_v45 = vpop.f32.mrb[12].mxu0  ;;  %v1965_v46 = vpop.f32.mrb[12].mxu1 }
 0x68f   : > { %v6227_v47 = vpop.f32.mrb[13].mxu0  ;;  %v6232_v48 = vpop.f32.mrb[13].mxu1 }
 0x690   : > { %v6516_v47 = vld [vmem:[%s7750_s9 + $0x10] sm:$0xff]   ;;  %v6517_v48 = vld [vmem:[%s7750_s9 + $0x8] sm:$0xff]  }
 0x692   : > { %v2038_v49 = vpop.f32.mrb[14].mxu0  ;;  %v2111_v50 = vpop.f32.mrb[14].mxu1 }
 0x693   : > { %v2115_v51 = vcombine.low %v1892_v45, %v2038_v49  ;;  %v2116_v52 = vcombine.high %v1892_v45, %v2038_v49  ;;  %v2131_v53 = vcombine.low %v1965_v46, %v2111_v50  ;;  %v2132_v54 = vcombine.high %v1965_v46, %v2111_v50  ;;  %v6237_v55 = vpop.f32.mrb[15].mxu0  ;;  %v6242_v56 = vpop.f32.mrb[15].mxu1  ;;  %v6515_v46 = vld [vmem:[%s7750_s9] sm:$0xff]   ;;  %v6518_v49 = vld [vmem:[%s7750_s9 + $0x18] sm:$0xff]  }
 0x694   : > { %6252 = vmatpush3.bf16.msra.mxu1 %v6515_v46 }
 0x695   : > { %v2123_v57 = vrot.slane %v2115_v51, %v6950_v58  ;;  %v2130_v59 = vrot.slane %v2116_v52, %v6950_v58  ;;  %v2139_v60 = vrot.slane %v2131_v53, %v6950_v58  ;;  %v2146_v62 = vrot.slane %v2132_v54, %v6950_v58  ;;  %6253 = vmatprep.subr.bf16.mxu1 %v6679_v2  ;;  %v5938_v54 = vld [vmem:[%s7751_s8] ss:$0 sm:$0xff] }
 0x697   : > { %v2147_v63 = vcombine.low %v2123_v57, %v2139_v60  ;;  %v2148_v0 = vcombine.high %v2123_v57, %v2139_v60  ;;  %v2163_v1 = vcombine.low %v2130_v59, %v2146_v62  ;;  %v2164_v3 = vcombine.high %v2130_v59, %v2146_v62  ;;  %v6519_v57 = vld [vmem:[%s7689_s13] sm:$0xff]   ;;  %v6520_v62 = vld [vmem:[%s7689_s13 + $0x8] sm:$0xff]  }
 0x698   : > { %6254 = vmatpush3.bf16.msra.mxu1 %v6517_v48  ;;  %v5955_v60 = vld [vmem:[%s7688_s12] ss:$0 sm:$0xff] }
 0x699   : > { %v2155_v5 = vrot.slane %v2147_v63, %v6952_v61  ;;  %v2162_v6 = vrot.slane %v2148_v0, %v6952_v61  ;;  %v2171_v7 = vrot.slane %v2163_v1, %v6952_v61  ;;  %v2178_v8 = vrot.slane %v2164_v3, %v6952_v61  ;;  %6267 = vmatprep.subr.bf16.mxu1 %v6679_v2  ;;  %v6521_v0 = vld [vmem:[%s7689_s13 + $0x10] sm:$0xff]   ;;  %v6523_v3 = vld [vmem:[%s7752_s10] sm:$0xff]  }
 0x69a   : > { %v2573_v63 = vmul.f32 %v5955_v60, %v6921_v27  ;;  %v6522_v27 = vld [vmem:[%s7689_s13 + $0x18] sm:$0xff]  }
 0x69b   : > { %v2183_v9 = vcombine.low %v2155_v5, %v2162_v6  ;;  %v5933_v10 = vcombine.high %v2155_v5, %v2162_v6  ;;  %v2199_v11 = vcombine.low %v2171_v7, %v2178_v8  ;;  %v5934_v13 = vcombine.high %v2171_v7, %v2178_v8  ;;  %v6525_v5 = vld [vmem:[%s7752_s10 + $0x10] sm:$0xff]   ;;  %v6526_v6 = vld [vmem:[%s7752_s10 + $0x18] sm:$0xff]   ;;  %s729_s10 = sand.u32 1, %s6668_s30  }
 0x69c   : > { %v7151_v1 = vpack.c.bf16 %v2573_v63, %v2573_v63 }
 0x69d   : > { %v2190_v14 = vrot.slane %v2183_v9, %v6950_v58  ;;  %v2198_v15 = vrot.slane %v5933_v10, %v6950_v58  ;;  %v2206_v16 = vrot.slane %v2199_v11, %v6950_v58  ;;  %v2214_v17 = vrot.slane %v5934_v13, %v6950_v58 }
 0x69f   : > { %v2216_v18 = vcombine.high %v2190_v14, %v2198_v15  ;;  %v2232_v19 = vcombine.high %v2206_v16, %v2214_v17  ;;  %v2215_v20 = vcombine.low %v2190_v14, %v2198_v15  ;;  %v2231_v21 = vcombine.low %v2206_v16, %v2214_v17 }
 0x6a1   : > { %v2230_v22 = vrot.slane %v2216_v18, %v6952_v61  ;;  %v2246_v23 = vrot.slane %v2232_v19, %v6952_v61  ;;  %v2223_v24 = vrot.slane %v2215_v20, %v6952_v61  ;;  %v2239_v25 = vrot.slane %v2231_v21, %v6952_v61 }
 0x6a3   : > { %v2249_v26 = vcombine.low %v2230_v22, %v2246_v23  ;;  %v2248_v28 = vcombine.high %v2223_v24, %v2239_v25  ;;  %v2250_v29 = vcombine.high %v2230_v22, %v2246_v23  ;;  %v2247_v30 = vcombine.low %v2223_v24, %v2239_v25 }
 0x6a5   : > { %2256 = vrot.lane.b32.xlu0 %v2249_v26, %s7715_s28  ;;  %2252 = vrot.lane.b32.xlu1 %v2248_v28, %s7713_s0  ;;  %s7753_s28 = smov 120   ;;  %s7754_s0 = smov 112  }
 0x6a9   : > { %2260 = vrot.lane.b32.xlu1 %v2250_v29, %s7711_s29  ;;  %s7755_s29 = smov 104  }
 0x717   : > { %v2253_v31 = vpop.permute.xlu1 %2252  ;;  %v2257_v32 = vpop.permute.xlu0 %2256 }
 0x718   : > { %v2263_v34 = vsel %vm1474_vm4, %v2247_v30, %v2253_v31 }
 0x719   : > { %v2265_v36 = vsel %vm2264_vm5, %v2263_v34, %v2257_v32 }
 0x71b   : > { %v2261_v35 = vpop.permute.xlu1 %2260 }
 0x71c   : > { %v2267_v37 = vsel %vm2266_vm6, %v2265_v36, %v2261_v35  ;;  %v6527_v35 = vld [vmem:[%s7689_s13 + $0x20] sm:$0xff]  }
 0x71d   : > { %v2272_v38 = vpack.c.bf16 %v2267_v37, %v2267_v37  ;;  %v6528_v37 = vld [vmem:[%s7689_s13 + $0x28] sm:$0xff]  }
 0x71f   : > { %6248 = vmatmul.mubr.msk.bf16.vlgmr.msra.gmra.mrb[16].mxu0 %vm846_vm3, %v2272_v38 }
 0x720   : > { %6263 = vmatprep.mubr.msk.bf16.mxu0 %vm6680_vm0, %v6679_v2  ;;  %6260 = vmatpush3.bf16.msra.mxu0 %v6516_v47 }
 0x721   : > { %6261 = vmatprep.subr.bf16.mxu0 %v6679_v2 }
 0x724   : > { %6262 = vmatpush3.bf16.msra.mxu0 %v6518_v49 }
 0x725   : > { %6279 = vmatprep.subr.bf16.mxu0 %v6679_v2 }
 0x7f2   : > { %v2322_v39 = vpop.f32.mrb[16].mxu0 }
 0x7f3   : > { %v7106_v40 = vadd.f32 %v2322_v39, %v6896_v12  ;;  %v6249_v41 = vpop.f32.mrb[17].mxu0 }
 0x7f4   : > { %v2325_v42 = vpop.f32.mrb[18].mxu0 }
 0x7f5   : > { %v6250_v43 = vpop.f32.mrb[19].mxu0  ;;  %v2330_v44 = vmul.f32 %v7106_v40, %v7106_v40 }
 0x7f7   : > { %v2331_v45 = vsel %vm846_vm3, %v2330_v44, 0.0 }
 0x7f8   : > { %2332 = vadd.xlane.f32.xlu0 %v2331_v45 }
 0x885   : > { %v2333_v50 = vpop.xlane.xlu0 %2332 }
 0x886   : > { %v2334_v51 = vmul.f32 0.03125, %v2333_v50 }
 0x888   : > { %v2335_v52 = vadd.f32 1e-06, %v2334_v51 }
 0x88a   : > { %6565 = vrsqrt.f32 %v2335_v52 }
 0x894   : > { %v6566_v53 = vpop.eup %6565 }
 0x895   : > { %v2337_v55 = vmul.f32 %v6566_v53, %v7106_v40 }
 0x897   : > { %v2344_v56 = vmul.f32 %v5938_v54, %v2337_v55 }
 0x899   : > { %v2345_v59 = vpack.c.bf16 %v2344_v56, %v2344_v56 }
 0x89b   : > { %6256 = vmatmul.mubr.msk.bf16.vlgmr.msra.gmra.mrb[16].mxu1 %vm846_vm3, %v2345_v59  ;;  %6264 = vmatmul.mubr.msk.bf16.vlgmr.msra.gmra.mrb[20].mxu0 %vm846_vm3, %v2345_v59 }
 0x89c   : > { %6280 = vmatpush3.bf16.msra.mxu0 %v6519_v57  ;;  %6283 = vmatprep.mubr.msk.bf16.mxu0 %vm6680_vm0, %v6679_v2 }
 0x89d   : > { %6281 = vmatprep.subr.bf16.mxu0 %v6679_v2  ;;  %6275 = vmatprep.mubr.msk.bf16.mxu1 %vm6680_vm0, %v6679_v2 }
 0x89e   : > { %6268 = vmatpush3.bf16.msra.mxu1 %v6523_v3 }
 0x89f   : > { %6269 = vmatprep.subr.bf16.mxu1 %v6679_v2 }
 0x8a0   : > { %6282 = vmatpush3.bf16.msra.mxu0 %v6520_v62 }
 0x8a1   : > { %6287 = vmatprep.subr.bf16.mxu0 %v6679_v2 }
 0x8a2   : > { %6270 = vmatpush3.bf16.msra.mxu1 %v6524_v4 }
 0x8a3   : > { %6284 = vmatmul.mubr.msk.bf16.vlgmr.msra.gmra.mrb[24].mxu0 %vm846_vm3, %v7151_v1  ;;  %6271 = vmatprep.subr.bf16.mxu1 %v6679_v2 }
 0x8a4   : > { %6288 = vmatpush3.bf16.msra.mxu0 %v6521_v0  ;;  %6291 = vmatprep.mubr.msk.bf16.mxu0 %vm6680_vm0, %v6679_v2 }
 0x8a5   : > { %6289 = vmatprep.subr.bf16.mxu0 %v6679_v2 }
 0x8a6   : > { %6272 = vmatpush3.bf16.msra.mxu1 %v6525_v5 }
 0x8a7   : > { %6273 = vmatprep.subr.bf16.mxu1 %v6679_v2 }
 0x8a8   : > { %6290 = vmatpush3.bf16.msra.mxu0 %v6522_v27 }
 0x8a9   : > { %6303 = vmatprep.subr.mxu0 %v6679_v2 }
 0x8aa   : > { %6274 = vmatpush3.bf16.msra.mxu1 %v6526_v6 }
 0x8ab   : > { %6292 = vmatmul.mubr.msk.bf16.vlgmr.msra.gmra.mrb[28].mxu0 %vm846_vm3, %v7151_v1  ;;  %6295 = vmatprep.subr.bf16.mxu1 %v6679_v2 }
 0x8ac   : > { %6305 = vmatprep.mubr.msk.f32.mxu0 %vm6680_vm0, %v6679_v2 }
 0x96e   : > { %v2399_v7 = vpop.f32.mrb[16].mxu1  ;;  %v2465_v8 = vpop.f32.mrb[20].mxu0 }
 0x96f   : > { %v2406_v9 = vmul.f32 0.044715, %v2399_v7  ;;  %v6257_v10 = vpop.f32.mrb[17].mxu1  ;;  %v6265_v11 = vpop.f32.mrb[21].mxu0  ;;  %v2405_v30 = vmul.f32 0.5, %v2399_v7 }
 0x970   : > { %v2402_v13 = vpop.f32.mrb[18].mxu1  ;;  %v2468_v33 = vpop.f32.mrb[22].mxu0 }
 0x971   : > { %v2407_v14 = vmul.f32 %v2406_v9, %v2399_v7  ;;  %v6258_v15 = vpop.f32.mrb[19].mxu1  ;;  %v6266_v16 = vpop.f32.mrb[23].mxu0 }
 0x973   : > { %v2408_v17 = vmul.f32 %v2407_v14, %v2399_v7 }
 0x975   : > { %v2409_v18 = vadd.f32 %v2408_v17, %v2399_v7 }
 0x976   : > { %v2628_v19 = vpop.f32.mrb[24].mxu0 }
 0x977   : > { %v2410_v20 = vmul.f32 0.7978846, %v2409_v18  ;;  %2749 = vrot.lane.b32.xlu1 %v2628_v19, %s7753_s28  ;;  %v6285_v21 = vpop.f32.mrb[25].mxu0 }
 0x978   : > { %v2631_v22 = vpop.f32.mrb[26].mxu0 }
 0x979   : > { %6567 = vtanh.f32 %v2410_v20  ;;  %v6286_v23 = vpop.f32.mrb[27].mxu0 }
 0x97b   : > { %2752 = vrot.lane.b32.xlu1 %v2628_v19, %s7754_s0 }
 0x97e   : > { %v2685_v24 = vpop.f32.mrb[28].mxu0 }
 0x97f   : > { %2895 = vrot.lane.b32.xlu1 %v2685_v24, %s7753_s28  ;;  %v6293_v25 = vpop.f32.mrb[29].mxu0 }
 0x980   : > { %v2688_v26 = vpop.f32.mrb[30].mxu0 }
 0x981   : > { %v6294_v28 = vpop.f32.mrb[31].mxu0 }
 0x983   : > { %v6568_v29 = vpop.eup %6567  ;;  %2898 = vrot.lane.b32.xlu1 %v2685_v24, %s7754_s0 }
 0x984   : > { %v2412_v31 = vadd.f32 1.0, %v6568_v29 }
 0x986   : > { %v2413_v32 = vmul.f32 %v2412_v31, %v2405_v30 }
 0x987   : > { %2901 = vrot.lane.b32.xlu1 %v2685_v24, %s7755_s29 }
 0x988   : > { %v2471_v34 = vmul.f32 %v2465_v8, %v2413_v32 }
 0x98a   : > { %v2480_v36 = vpack.c.bf16 %v2471_v34, %v2471_v34 }
 0x98b   : > { %2755 = vrot.lane.b32.xlu1 %v2628_v19, %s7755_s29 }
 0x98c   : > { %6276 = vmatmul.mubr.msk.bf16.vlgmr.msra.gmra.mrb[20].mxu1 %vm788_vm2, %v2480_v36 }
 0x98d   : > { %6296 = vmatpush3.bf16.msra.mxu1 %v6527_v35  ;;  %6299 = vmatprep.mubr.msk.bf16.mxu1 %vm6680_vm0, %v6679_v2 }
 0x98e   : > { %6297 = vmatprep.subr.bf16.mxu1 %v6679_v2 }
 0x991   : > { %6298 = vmatpush3.bf16.msra.mxu1 %v6528_v37 }
 0x992   : > { %6308 = vmatprep.subr.mxu1 %v6679_v2 }
 0x994   : > { %6300 = vmatmul.mubr.msk.bf16.vlgmr.msra.gmra.mrb[24].mxu1 %vm846_vm3, %v7151_v1 }
 0x995   : > { %6310 = vmatprep.mubr.msk.f32.mxu1 %vm6680_vm0, %v6679_v2 }
 0x9e9   : > { %v2750_v38 = vpop.permute.xlu1 %2749 }
 0x9ed   : > { %v2753_v39 = vpop.permute.xlu1 %2752 }
 0x9ee   : > { %v2758_v52 = vcombine.low %v2628_v19, %v2753_v39  ;;  %v2759_v53 = vcombine.high %v2628_v19, %v2753_v39 }
 0x9f0   : > { %v2766_v3 = vrot.slane %v2758_v52, %v6950_v58  ;;  %v2773_v4 = vrot.slane %v2759_v53, %v6950_v58 }
 0x9f1   : > { %v2896_v41 = vpop.permute.xlu1 %2895 }
 0x9f5   : > { %v2899_v42 = vpop.permute.xlu1 %2898 }
 0x9f6   : > { %v2904_v43 = vcombine.low %v2685_v24, %v2899_v42  ;;  %v2905_v44 = vcombine.high %v2685_v24, %v2899_v42 }
 0x9f8   : > { %v2912_v48 = vrot.slane %v2904_v43, %v6950_v58  ;;  %v2919_v49 = vrot.slane %v2905_v44, %v6950_v58 }
 0x9f9   : > { %v2902_v45 = vpop.permute.xlu1 %2901 }
 0x9fa   : > { %v2920_v46 = vcombine.low %v2896_v41, %v2902_v45  ;;  %v2921_v47 = vcombine.high %v2896_v41, %v2902_v45 }
 0x9fc   : > { %v2928_v50 = vrot.slane %v2920_v46, %v6950_v58  ;;  %v2935_v51 = vrot.slane %v2921_v47, %v6950_v58 }
 0x9fd   : > { %v2756_v54 = vpop.permute.xlu1 %2755 }
 0x9fe   : > { %v2936_v55 = vcombine.low %v2912_v48, %v2928_v50  ;;  %v2937_v56 = vcombine.high %v2912_v48, %v2928_v50  ;;  %v2952_v57 = vcombine.low %v2919_v49, %v2935_v51  ;;  %v2953_v59 = vcombine.high %v2919_v49, %v2935_v51 }
 0x9ff   : > { %v2774_v60 = vcombine.low %v2750_v38, %v2756_v54  ;;  %v2775_v62 = vcombine.high %v2750_v38, %v2756_v54 }
 0xa00   : > { %v2944_v63 = vrot.slane %v2936_v55, %v6952_v61  ;;  %v2951_v0 = vrot.slane %v2937_v56, %v6952_v61  ;;  %v2960_v1 = vrot.slane %v2952_v57, %v6952_v61  ;;  %v2967_v27 = vrot.slane %v2953_v59, %v6952_v61 }
 0xa01   : > { %v2782_v5 = vrot.slane %v2774_v60, %v6950_v58  ;;  %v2789_v6 = vrot.slane %v2775_v62, %v6950_v58 }
 0xa02   : > { %v2972_v7 = vcombine.low %v2944_v63, %v2951_v0  ;;  %v5975_v8 = vcombine.high %v2944_v63, %v2951_v0  ;;  %v2988_v9 = vcombine.low %v2960_v1, %v2967_v27  ;;  %v5976_v10 = vcombine.high %v2960_v1, %v2967_v27 }
 0xa03   : > { %v2790_v11 = vcombine.low %v2766_v3, %v2782_v5  ;;  %v2791_v13 = vcombine.high %v2766_v3, %v2782_v5  ;;  %v2806_v33 = vcombine.low %v2773_v4, %v2789_v6  ;;  %v2807_v14 = vcombine.high %v2773_v4, %v2789_v6  ;;  %v836_v4 = vld [vmem:[%s7756_s4] sm:$0xff]  ;;  %v837_v5 = vld [vmem:[%s7757_s6 + $0x8] sm:$0xff]  ;;  %s7763_s4 = sld [smem:[#allocation14_spill]] }
 0xa04   : > { %v2979_v15 = vrot.slane %v2972_v7, %v6950_v58  ;;  %v2987_v16 = vrot.slane %v5975_v8, %v6950_v58  ;;  %v2995_v17 = vrot.slane %v2988_v9, %v6950_v58  ;;  %v3003_v18 = vrot.slane %v5976_v10, %v6950_v58 }
 0xa05   : > { %v2798_v19 = vrot.slane %v2790_v11, %v6952_v61  ;;  %v2805_v20 = vrot.slane %v2791_v13, %v6952_v61  ;;  %v2814_v21 = vrot.slane %v2806_v33, %v6952_v61  ;;  %v2821_v22 = vrot.slane %v2807_v14, %v6952_v61  ;;  %v838_v13 = vld [vmem:[%s7757_s6 + $0x10] sm:$0xff] }
 0xa06   : > { %v3004_v23 = vcombine.low %v2979_v15, %v2987_v16  ;;  %v3020_v24 = vcombine.low %v2995_v17, %v3003_v18  ;;  %v3005_v30 = vcombine.high %v2979_v15, %v2987_v16  ;;  %v3021_v31 = vcombine.high %v2995_v17, %v3003_v18  ;;  %v839_v15 = vld [vmem:[%s7757_s6 + $0x18] sm:$0xff] }
 0xa07   : > { %v2826_v25 = vcombine.low %v2798_v19, %v2805_v20  ;;  %v5973_v26 = vcombine.high %v2798_v19, %v2805_v20  ;;  %v2842_v28 = vcombine.low %v2814_v21, %v2821_v22  ;;  %v5974_v29 = vcombine.high %v2814_v21, %v2821_v22 }
 0xa08   : > { %v3012_v32 = vrot.slane %v3004_v23, %v6952_v61  ;;  %v3028_v34 = vrot.slane %v3020_v24, %v6952_v61  ;;  %v3019_v46 = vrot.slane %v3005_v30, %v6952_v61  ;;  %v3035_v47 = vrot.slane %v3021_v31, %v6952_v61 }
 0xa09   : > { %v2833_v35 = vrot.slane %v2826_v25, %v6950_v58  ;;  %v2841_v36 = vrot.slane %v5973_v26, %v6950_v58  ;;  %v2849_v37 = vrot.slane %v2842_v28, %v6950_v58  ;;  %v2857_v38 = vrot.slane %v5974_v29, %v6950_v58 }
 0xa0a   : > { %v3036_v39 = vcombine.low %v3012_v32, %v3028_v34  ;;  %v3037_v41 = vcombine.high %v3012_v32, %v3028_v34  ;;  %v3038_v54 = vcombine.low %v3019_v46, %v3035_v47  ;;  %v3039_v55 = vcombine.high %v3019_v46, %v3035_v47 }
 0xa0b   : > { %v2858_v42 = vcombine.low %v2833_v35, %v2841_v36  ;;  %v2859_v43 = vcombine.high %v2833_v35, %v2841_v36  ;;  %v2874_v44 = vcombine.low %v2849_v37, %v2857_v38  ;;  %v2875_v45 = vcombine.high %v2849_v37, %v2857_v38 }
 0xa0c   : > { %6304 = vmatpush3.xpose.msk.msra.mxu0 %vm1474_vm4, %v3036_v39  ;;  %6309 = vmatpush3.xpose.msk.msra.mxu1 %vm1474_vm4, %v3037_v41 }
 0xa0d   : > { %6313 = vmatprep.subr.mxu0 %v6679_v2  ;;  %6318 = vmatprep.subr.mxu1 %v6679_v2  ;;  %v2866_v48 = vrot.slane %v2858_v42, %v6952_v61  ;;  %v2882_v49 = vrot.slane %v2874_v44, %v6952_v61  ;;  %v2873_v52 = vrot.slane %v2859_v43, %v6952_v61 }
 0xa0e   : > { %v2889_v53 = vrot.slane %v2875_v45, %v6952_v61 }
 0xa0f   : > { %v2890_v50 = vcombine.low %v2866_v48, %v2882_v49  ;;  %v2891_v51 = vcombine.high %v2866_v48, %v2882_v49 }
 0xa10   : > { %v2892_v56 = vcombine.low %v2873_v52, %v2889_v53  ;;  %v2893_v57 = vcombine.high %v2873_v52, %v2889_v53 }
 0xa11   : > { %6306 = vmatmul.mubr.msk.f32.vlgmr.msra.gmra.mrb[32].mxu0 %vm1474_vm4, %v2890_v50  ;;  %6311 = vmatmul.mubr.msk.f32.vlgmr.msra.gmra.mrb[28].mxu1 %vm1474_vm4, %v2891_v51 }
 0xa12   : > { %6314 = vmatpush3.xpose.msk.msra.mxu0 %vm1474_vm4, %v3038_v54  ;;  %6319 = vmatpush3.xpose.msk.msra.mxu1 %vm1474_vm4, %v3039_v55 }
 0xa13   : > { %6315 = vmatprep.mubr.msk.f32.mxu0 %vm6680_vm0, %v6679_v2  ;;  %6320 = vmatprep.mubr.msk.f32.mxu1 %vm6680_vm0, %v6679_v2 }
 0xa14   : > { %6323 = vmatprep.subr.mxu0 %v6679_v2  ;;  %6328 = vmatprep.subr.mxu1 %v6679_v2 }
 0xa15   : > { %6316 = vmatmul.mubr.msk.f32.vlgmr.msra.gmra.mrb[34].mxu0 %vm1474_vm4, %v2892_v56  ;;  %6321 = vmatmul.mubr.msk.f32.vlgmr.msra.gmra.mrb[30].mxu1 %vm1474_vm4, %v2893_v57 }
 0xa16   : > { %6325 = vmatprep.mubr.msk.f32.mxu0 %vm6680_vm0, %v6679_v2  ;;  %6330 = vmatprep.mubr.msk.f32.mxu1 %vm6680_vm0, %v6679_v2 }
 0xa5f   : > { %v7256_v59 = vpop.f32.mrb[20].mxu1 }
 0xa60   : > { %v6277_v60 = vpop.f32.mrb[21].mxu1 }
 0xa61   : > { %v2545_v62 = vpop.f32.mrb[22].mxu1 }
 0xa62   : > { %v6278_v63 = vpop.f32.mrb[23].mxu1 }
 0xa67   : > { %v7258_v0 = vpop.f32.mrb[24].mxu1 }
 0xa68   : > { %v6301_v1 = vpop.f32.mrb[25].mxu1 }
 0xa69   : > { %v2745_v27 = vpop.f32.mrb[26].mxu1 }
 0xa6a   : > { %v6302_v3 = vpop.f32.mrb[27].mxu1 }
 0xae4   : > { %v3258_v6 = vpop.f32.mrb[32].mxu0  ;;  %v3334_v7 = vpop.f32.mrb[28].mxu1 }
 0xae5   : > { %v3259_v8 = vadd.f32 %v3258_v6, %v836_v4  ;;  %v3335_v9 = vadd.f32 %v3334_v7, %v837_v5  ;;  %v6307_v10 = vpop.f32.mrb[33].mxu0  ;;  %v6312_v11 = vpop.f32.mrb[29].mxu1 }
 0xae7   : > { %v3493_v33 = vsel %vm1474_vm4, %v3335_v9, -inf  ;;  %v3490_v14 = vsel %vm1474_vm4, %v3259_v8, -inf }
 0xae8   : > { %3494 = vmax.xlane.f32.xlu0 %v3493_v33  ;;  %v3486_v16 = vpop.f32.mrb[30].mxu1  ;;  %3491 = vmax.xlane.f32.xlu1 %v3490_v14  ;;  %v3410_v17 = vpop.f32.mrb[34].mxu0 }
 0xae9   : > { %v3411_v18 = vadd.f32 %v3410_v17, %v838_v13  ;;  %v6317_v19 = vpop.f32.mrb[35].mxu0  ;;  %v6322_v20 = vpop.f32.mrb[31].mxu1  ;;  %v3487_v21 = vadd.f32 %v3486_v16, %v839_v15 }
 0xaeb   : > { %v3496_v22 = vsel %vm1474_vm4, %v3411_v18, -inf  ;;  %v3499_v23 = vsel %vm1474_vm4, %v3487_v21, -inf }
 0xaec   : > { %3497 = vmax.xlane.f32.xlu0 %v3496_v22 }
 0xaf0   : > { %3500 = vmax.xlane.f32.xlu0 %v3499_v23 }
 0xaf9   : > { %3044 = vrot.lane.b32.xlu1 %v7258_v0, %s7754_s0 }
 0xafd   : > { %3047 = vrot.lane.b32.xlu1 %v7258_v0, %s7755_s29 }
 0xb75   : > { %v3495_v24 = vpop.xlane.xlu0 %3494  ;;  %v3492_v25 = vpop.xlane.xlu1 %3491 }
 0xb76   : > { %v3503_v26 = vsub.f32 %v3335_v9, %v3495_v24  ;;  %v3502_v28 = vsub.f32 %v3259_v8, %v3492_v25 }
 0xb78   : > { %v3506_v29 = vmul.f32 1.442695, %v3502_v28  ;;  %v3508_v30 = vmul.f32 1.442695, %v3503_v26 }
 0xb79   : > { %v3498_v31 = vpop.xlane.xlu0 %3497  ;;  %v3045_v50 = vpop.permute.xlu1 %3044 }
 0xb7a   : > { %v3504_v32 = vsub.f32 %v3411_v18, %v3498_v31  ;;  %6569 = vpow2.f32 %v3506_v29  ;;  %v3050_v52 = vcombine.low %v7258_v0, %v3045_v50  ;;  %v3051_v53 = vcombine.high %v7258_v0, %v3045_v50 }
 0xb7b   : > { %6571 = vpow2.f32 %v3508_v30 }
 0xb7c   : > { %v3510_v34 = vmul.f32 1.442695, %v3504_v32  ;;  %v3058_v60 = vrot.slane %v3050_v52, %v6950_v58  ;;  %v3065_v62 = vrot.slane %v3051_v53, %v6950_v58 }
 0xb7d   : > { %v3501_v35 = vpop.xlane.xlu0 %3500  ;;  %v3048_v54 = vpop.permute.xlu1 %3047 }
 0xb7e   : > { %v3505_v36 = vsub.f32 %v3487_v21, %v3501_v35  ;;  %6573 = vpow2.f32 %v3510_v34 }
 0xb80   : > { %v3512_v37 = vmul.f32 1.442695, %v3505_v36 }
 0xb82   : > { %6575 = vpow2.f32 %v3512_v37 }
 0xb84   : > { %v7280_v38 = vpop.eup %6569 }
 0xb85   : > { %v3514_v39 = vsel %vm1474_vm4, %v7280_v38, 0.0  ;;  %v6572_v41 = vpop.eup %6571 }
 0xb86   : > { %3515 = vadd.xlane.f32.xlu0 %v3514_v39  ;;  %v3517_v42 = vsel %vm1474_vm4, %v6572_v41, 0.0 }
 0xb88   : > { %v7285_v43 = vpop.eup %6573 }
 0xb89   : > { %v3520_v44 = vsel %vm1474_vm4, %v7285_v43, 0.0 }
 0xb8a   : > { %3518 = vadd.xlane.f32.xlu0 %v3517_v42 }
 0xb8c   : > { %v7289_v45 = vpop.eup %6575 }
 0xb8d   : > { %v3523_v46 = vsel %vm1474_vm4, %v7289_v45, 0.0 }
 0xb8e   : > { %3521 = vadd.xlane.f32.xlu0 %v3520_v44 }
 0xb92   : > { %3524 = vadd.xlane.f32.xlu0 %v3523_v46 }
 0xba8   : > { %3041 = vrot.lane.b32.xlu0 %v7258_v0, %s7753_s28 }
 0xc13   : > { %v3516_v47 = vpop.xlane.xlu0 %3515 }
 0xc14   : > { %6577 = vrcp.f32 %v3516_v47 }
 0xc17   : > { %v3519_v48 = vpop.xlane.xlu0 %3518 }
 0xc18   : > { %6579 = vrcp.f32 %v3519_v48 }
 0xc1b   : > { %v3522_v49 = vpop.xlane.xlu0 %3521 }
 0xc1c   : > { %6581 = vrcp.f32 %v3522_v49 }
 0xc1e   : > { %v6578_v17 = vpop.eup %6577 }
 0xc1f   : > { %v3525_v51 = vpop.xlane.xlu0 %3524  ;;  %v3530_v32 = vmul.f32 %v6578_v17, %v7280_v38 }
 0xc20   : > { %6583 = vrcp.f32 %v3525_v51 }
 0xc22   : > { %v6580_v22 = vpop.eup %6579 }
 0xc23   : > { %v3042_v55 = vpop.permute.xlu0 %3041  ;;  %v3531_v34 = vmul.f32 %v6580_v22, %v6572_v41 }
 0xc24   : > { %v3066_v56 = vcombine.low %v3042_v55, %v3048_v54  ;;  %v3067_v57 = vcombine.high %v3042_v55, %v3048_v54 }
 0xc26   : > { %v3074_v63 = vrot.slane %v3066_v56, %v6950_v58  ;;  %v3081_v1 = vrot.slane %v3067_v57, %v6950_v58  ;;  %v6582_v25 = vpop.eup %6581 }
 0xc27   : > { %v3532_v37 = vmul.f32 %v6582_v25, %v7285_v43  ;;  %v2548_v25 = vadd.f32 %v7256_v59, %v7106_v40  ;;  %v6532_v40 = vld [vmem:[%s7693_s17 + $0x8] sm:$0xff]  }
 0xc28   : > { %v3082_v27 = vcombine.low %v3058_v60, %v3074_v63  ;;  %v3083_v3 = vcombine.high %v3058_v60, %v3074_v63  ;;  %v3098_v4 = vcombine.low %v3065_v62, %v3081_v1  ;;  %v3099_v5 = vcombine.high %v3065_v62, %v3081_v1  ;;  %v6529_v63 = vld [vmem:[%s7690_s14] sm:$0xff]  }
 0xc2a   : > { %v3090_v0 = vrot.slane %v3082_v27, %v6952_v61  ;;  %v3097_v6 = vrot.slane %v3083_v3, %v6952_v61  ;;  %v3106_v7 = vrot.slane %v3098_v4, %v6952_v61  ;;  %v3113_v8 = vrot.slane %v3099_v5, %v6952_v61  ;;  %v6584_v31 = vpop.eup %6583 }
 0xc2b   : > { %v3533_v39 = vmul.f32 %v6584_v31, %v7289_v45 }
 0xc2c   : > { %v3118_v9 = vcombine.low %v3090_v0, %v3097_v6  ;;  %v5977_v10 = vcombine.high %v3090_v0, %v3097_v6  ;;  %v3134_v11 = vcombine.low %v3106_v7, %v3113_v8  ;;  %v5978_v13 = vcombine.high %v3106_v7, %v3113_v8  ;;  %v6530_v8 = vld [vmem:[%s7690_s14 + $0x8] sm:$0xff]  }
 0xc2e   : > { %v3125_v33 = vrot.slane %v3118_v9, %v6950_v58  ;;  %v3133_v14 = vrot.slane %v5977_v10, %v6950_v58  ;;  %v3141_v15 = vrot.slane %v3134_v11, %v6950_v58  ;;  %v3149_v16 = vrot.slane %v5978_v13, %v6950_v58 }
 0xc30   : > { %v3150_v18 = vcombine.low %v3125_v33, %v3133_v14  ;;  %v3166_v19 = vcombine.low %v3141_v15, %v3149_v16  ;;  %v3151_v20 = vcombine.high %v3125_v33, %v3133_v14  ;;  %v3167_v21 = vcombine.high %v3141_v15, %v3149_v16 }
 0xc32   : > { %v3158_v23 = vrot.slane %v3150_v18, %v6952_v61  ;;  %v3174_v24 = vrot.slane %v3166_v19, %v6952_v61  ;;  %v3165_v26 = vrot.slane %v3151_v20, %v6952_v61  ;;  %v3181_v28 = vrot.slane %v3167_v21, %v6952_v61 }
 0xc34   : > { %v3182_v29 = vcombine.low %v3158_v23, %v3174_v24  ;;  %v3183_v30 = vcombine.high %v3158_v23, %v3174_v24  ;;  %v3184_v35 = vcombine.low %v3165_v26, %v3181_v28  ;;  %v3185_v36 = vcombine.high %v3165_v26, %v3181_v28 }
 0xc35   : > { %v2550_v26 = vmul.f32 %v2548_v25, %v2548_v25 }
 0xc36   : > { %6324 = vmatpush3.msra.mxu0 %v3182_v29  ;;  %6329 = vmatpush3.msra.mxu1 %v3183_v30 }
 0xc37   : > { %6326 = vmatmul.mubr.msk.f32.vlgmr.msra.gmra.mrb[36].mxu0 %vm1474_vm4, %v3530_v32  ;;  %6331 = vmatmul.mubr.msk.f32.vlgmr.msra.gmra.mrb[32].mxu1 %vm1474_vm4, %v3531_v34  ;;  %v2551_v28 = vsel %vm846_vm3, %v2550_v26, 0.0 }
 0xc38   : > { %6333 = vmatprep.subr.mxu0 %v6679_v2  ;;  %6338 = vmatprep.subr.mxu1 %v6679_v2 }
 0xc39   : > { %6334 = vmatpush3.msra.mxu0 %v3184_v35  ;;  %6339 = vmatpush3.msra.mxu1 %v3185_v36  ;;  %v6531_v36 = vld [vmem:[%s7693_s17] sm:$0xff]  }
 0xc3a   : > { %6335 = vmatprep.mubr.msk.f32.mxu0 %vm6680_vm0, %v6679_v2  ;;  %6340 = vmatprep.mubr.msk.f32.mxu1 %vm6680_vm0, %v6679_v2 }
 0xc3b   : > { %6336 = vmatmul.mubr.msk.f32.vlgmr.msra.gmra.mrb[38].mxu0 %vm1474_vm4, %v3532_v37  ;;  %6341 = vmatmul.mubr.msk.f32.vlgmr.msra.gmra.mrb[34].mxu1 %vm1474_vm4, %v3533_v39 }
 0xc3c   : > { %6343 = vmatprep.subr.bf16.mxu0 %v6679_v2  ;;  %6347 = vmatprep.mubr.msk.bf16.mxu0 %vm6680_vm0, %v6679_v2 }
 0xc3d   : > { %6351 = vmatprep.subr.bf16.mxu1 %v6679_v2  ;;  %6355 = vmatprep.mubr.msk.bf16.mxu1 %vm6680_vm0, %v6679_v2 }
 0xc3e   : > { %6344 = vmatpush3.bf16.msra.mxu0 %v6529_v63 }
 0xc3f   : > { %6345 = vmatprep.subr.bf16.mxu0 %v6679_v2 }
 0xc42   : > { %6346 = vmatpush3.bf16.msra.mxu0 %v6530_v8 }
 0xc43   : > { %6359 = vmatprep.subr.bf16.mxu0 %v6679_v2 }
 0xd0a   : > { %v3603_v38 = vpop.f32.mrb[36].mxu0  ;;  %v3676_v41 = vpop.f32.mrb[32].mxu1 }
 0xd0b   : > { %v6327_v42 = vpop.f32.mrb[37].mxu0  ;;  %v6332_v43 = vpop.f32.mrb[33].mxu1 }
 0xd0c   : > { %v5954_v42 = vld [vmem:[%s7761_s11] ss:$0 sm:$0xff]  ;;  %s7762_s11 = sshll.u32 %s6864_s1, 5 }
 0xd0d   : > { %s744_s8 = scalar_lea.vmem %s7763_s4, %s7762_s11  ;;  %s6051_s4 = sshll.u32 %s6831_s5, 4 }
 0xd0e   : > { %v3749_v44 = vpop.f32.mrb[38].mxu0  ;;  %v3822_v45 = vpop.f32.mrb[34].mxu1  ;;  %s6689_s5 = smov [#allocation2]  }
 0xd0f   : > { %v3826_v46 = vcombine.low %v3603_v38, %v3749_v44  ;;  %v3827_v47 = vcombine.high %v3603_v38, %v3749_v44  ;;  %v3842_v48 = vcombine.low %v3676_v41, %v3822_v45  ;;  %v3843_v49 = vcombine.high %v3676_v41, %v3822_v45  ;;  %v6337_v50 = vpop.f32.mrb[39].mxu0  ;;  %v6342_v51 = vpop.f32.mrb[35].mxu1 }
 0xd11   : > { %v3834_v52 = vrot.slane %v3826_v46, %v6950_v58  ;;  %v3841_v53 = vrot.slane %v3827_v47, %v6950_v58  ;;  %v3850_v54 = vrot.slane %v3842_v48, %v6950_v58  ;;  %v3857_v55 = vrot.slane %v3843_v49, %v6950_v58 }
 0xd13   : > { %v3858_v56 = vcombine.low %v3834_v52, %v3850_v54  ;;  %v3859_v57 = vcombine.high %v3834_v52, %v3850_v54  ;;  %v3874_v60 = vcombine.low %v3841_v53, %v3857_v55  ;;  %v3875_v62 = vcombine.high %v3841_v53, %v3857_v55  ;;  %v6533_v53 = vld [vmem:[%s7692_s16] sm:$0xff]   ;;  %v6534_v54 = vld [vmem:[%s7692_s16 + $0x8] sm:$0xff]  }
 0xd14   : > { %6352 = vmatpush3.bf16.msra.mxu1 %v6533_v53 }
 0xd15   : > { %v3866_v1 = vrot.slane %v3858_v56, %v6952_v61  ;;  %v3873_v27 = vrot.slane %v3859_v57, %v6952_v61  ;;  %v3882_v3 = vrot.slane %v3874_v60, %v6952_v61  ;;  %v3889_v4 = vrot.slane %v3875_v62, %v6952_v61  ;;  %6353 = vmatprep.subr.bf16.mxu1 %v6679_v2 }
 0xd17   : > { %v3894_v5 = vcombine.low %v3866_v1, %v3873_v27  ;;  %v5991_v0 = vcombine.high %v3866_v1, %v3873_v27  ;;  %v3910_v6 = vcombine.low %v3882_v3, %v3889_v4  ;;  %v5992_v7 = vcombine.high %v3882_v3, %v3889_v4  ;;  %v5996_v27 = vld [vmem:[%s7691_s15] ss:$0 sm:$0xff] }
 0xd18   : > { %6354 = vmatpush3.bf16.msra.mxu1 %v6534_v54 }
 0xd19   : > { %v3901_v9 = vrot.slane %v3894_v5, %v6950_v58  ;;  %v3909_v10 = vrot.slane %v5991_v0, %v6950_v58  ;;  %v3917_v11 = vrot.slane %v3910_v6, %v6950_v58  ;;  %v3925_v13 = vrot.slane %v5992_v7, %v6950_v58  ;;  %6367 = vmatprep.subr.bf16.mxu1 %v6679_v2  ;;  %v6535_v5 = vld [vmem:[%s7693_s17 + $0x10] sm:$0xff]   ;;  %v6536_v6 = vld [vmem:[%s7693_s17 + $0x18] sm:$0xff]  }
 0xd1b   : > { %v3927_v33 = vcombine.high %v3901_v9, %v3909_v10  ;;  %v3943_v14 = vcombine.high %v3917_v11, %v3925_v13  ;;  %v3926_v15 = vcombine.low %v3901_v9, %v3909_v10  ;;  %v3942_v16 = vcombine.low %v3917_v11, %v3925_v13 }
 0xd1d   : > { %v3941_v17 = vrot.slane %v3927_v33, %v6952_v61  ;;  %v3957_v18 = vrot.slane %v3943_v14, %v6952_v61  ;;  %v3934_v19 = vrot.slane %v3926_v15, %v6952_v61  ;;  %v3950_v20 = vrot.slane %v3942_v16, %v6952_v61 }
 0xd1f   : > { %v3960_v21 = vcombine.low %v3941_v17, %v3957_v18  ;;  %v3959_v22 = vcombine.high %v3934_v19, %v3950_v20  ;;  %v3961_v23 = vcombine.high %v3941_v17, %v3957_v18  ;;  %v3958_v24 = vcombine.low %v3934_v19, %v3950_v20 }
 0xd21   : > { %3967 = vrot.lane.b32.xlu1 %v3960_v21, %s7758_s24  ;;  %3963 = vrot.lane.b32.xlu0 %v3959_v22, %s7759_s3 }
 0xd25   : > { %3971 = vrot.lane.b32.xlu0 %v3961_v23, %s7760_s2 }
 0xd45   : > { %2552 = vadd.xlane.f32.xlu1 %v2551_v28 }
 0xd93   : > { %v3964_v29 = vpop.permute.xlu0 %3963  ;;  %v3968_v30 = vpop.permute.xlu1 %3967 }
 0xd94   : > { %v3974_v31 = vsel %vm1474_vm4, %v3958_v24, %v3964_v29 }
 0xd95   : > { %v3975_v34 = vsel %vm2264_vm5, %v3974_v31, %v3968_v30 }
 0xd97   : > { %v3972_v32 = vpop.permute.xlu0 %3971 }
 0xd98   : > { %v3976_v35 = vsel %vm2266_vm6, %v3975_v34, %v3972_v32 }
 0xd99   : > { %v3981_v37 = vpack.c.bf16 %v3976_v35, %v3976_v35 }
 0xd9b   : > { %6348 = vmatmul.mubr.msk.bf16.vlgmr.msra.gmra.mrb[40].mxu0 %vm846_vm3, %v3981_v37 }
 0xd9c   : > { %6360 = vmatpush3.bf16.msra.mxu0 %v6531_v36  ;;  %6363 = vmatprep.mubr.msk.bf16.mxu0 %vm6680_vm0, %v6679_v2 }
 0xd9d   : > { %6361 = vmatprep.subr.bf16.mxu0 %v6679_v2 }
 0xda0   : > { %6362 = vmatpush3.bf16.msra.mxu0 %v6532_v40 }
 0xda1   : > { %6375 = vmatprep.subr.mxu0 %v6679_v2 }
 0xdd2   : > { %v2553_v59 = vpop.xlane.xlu1 %2552 }
 0xdd3   : > { %v2554_v39 = vmul.f32 0.03125, %v2553_v59 }
 0xdd5   : > { %v2555_v38 = vadd.f32 1e-06, %v2554_v39 }
 0xdd7   : > { %6585 = vrsqrt.f32 %v2555_v38 }
 0xde1   : > { %v6586_v41 = vpop.eup %6585 }
 0xde2   : > { %v2557_v43 = vmul.f32 %v6586_v41, %v2548_v25 }
 0xde4   : > { %v2564_v44 = vmul.f32 %v5954_v42, %v2557_v43 }
 0xde6   : > { %v2565_v45 = vpack.c.bf16 %v2564_v44, %v2564_v44 }
 0xde8   : > { %6364 = vmatmul.mubr.msk.bf16.vlgmr.msra.gmra.mrb[44].mxu0 %vm846_vm3, %v2565_v45 }
 0xde9   : > { %6377 = vmatprep.mubr.msk.f32.mxu0 %vm6680_vm0, %v6679_v2 }
 0xe6e   : > { %v4031_v46 = vpop.f32.mrb[40].mxu0 }
 0xe6f   : > { %v7383_v47 = vadd.f32 %v4031_v46, %v6896_v12  ;;  %v6349_v48 = vpop.f32.mrb[41].mxu0 }
 0xe70   : > { %v4034_v49 = vpop.f32.mrb[42].mxu0 }
 0xe71   : > { %v6350_v50 = vpop.f32.mrb[43].mxu0  ;;  %v4039_v51 = vmul.f32 %v7383_v47, %v7383_v47 }
 0xe73   : > { %v4040_v52 = vsel %vm846_vm3, %v4039_v51, 0.0 }
 0xe74   : > { %4041 = vadd.xlane.f32.xlu0 %v4040_v52 }
 0xebb   : > { %v4167_v12 = vpop.f32.mrb[44].mxu0 }
 0xebc   : > { %4380 = vrot.lane.b32.xlu1 %v4167_v12, %s7754_s0  ;;  %4377 = vrot.lane.b32.xlu0 %v4167_v12, %s7753_s28  ;;  %v6365_v55 = vpop.f32.mrb[45].mxu0 }
 0xebd   : > { %v4170_v56 = vpop.f32.mrb[46].mxu0 }
 0xebe   : > { %v6366_v57 = vpop.f32.mrb[47].mxu0 }
 0xec0   : > { %4383 = vrot.lane.b32.xlu1 %v4167_v12, %s7755_s29 }
 0xf01   : > { %v4042_v60 = vpop.xlane.xlu0 %4041 }
 0xf02   : > { %v4043_v62 = vmul.f32 0.03125, %v4042_v60 }
 0xf04   : > { %v4044_v63 = vadd.f32 1e-06, %v4043_v62 }
 0xf06   : > { %6587 = vrsqrt.f32 %v4044_v63 }
 0xf10   : > { %v6588_v1 = vpop.eup %6587 }
 0xf11   : > { %v4046_v3 = vmul.f32 %v6588_v1, %v7383_v47 }
 0xf13   : > { %v4053_v4 = vmul.f32 %v5996_v27, %v4046_v3 }
 0xf15   : > { %v4054_v0 = vpack.c.bf16 %v4053_v4, %v4053_v4 }
 0xf17   : > { %6356 = vmatmul.mubr.msk.bf16.vlgmr.msra.gmra.mrb[36].mxu1 %vm846_vm3, %v4054_v0 }
 0xf18   : > { %6368 = vmatpush3.bf16.msra.mxu1 %v6535_v5  ;;  %6371 = vmatprep.mubr.msk.bf16.mxu1 %vm6680_vm0, %v6679_v2 }
 0xf19   : > { %6369 = vmatprep.subr.bf16.mxu1 %v6679_v2 }
 0xf1c   : > { %6370 = vmatpush3.bf16.msra.mxu1 %v6536_v6 }
 0xf1d   : > { %6380 = vmatprep.subr.mxu1 %v6679_v2 }
 0xf1f   : > { %6372 = vmatmul.mubr.msk.bf16.vlgmr.msra.gmra.mrb[40].mxu1 %vm846_vm3, %v2565_v45 }
 0xf20   : > { %6382 = vmatprep.mubr.msk.f32.mxu1 %vm6680_vm0, %v6679_v2 }
 0xf2e   : > { %v4381_v7 = vpop.permute.xlu1 %4380  ;;  %v4378_v10 = vpop.permute.xlu0 %4377 }
 0xf2f   : > { %v4386_v8 = vcombine.low %v4167_v12, %v4381_v7  ;;  %v4387_v9 = vcombine.high %v4167_v12, %v4381_v7 }
 0xf31   : > { %v4394_v14 = vrot.slane %v4386_v8, %v6950_v58  ;;  %v4401_v15 = vrot.slane %v4387_v9, %v6950_v58 }
 0xf32   : > { %v4384_v11 = vpop.permute.xlu1 %4383 }
 0xf33   : > { %v4402_v13 = vcombine.low %v4378_v10, %v4384_v11  ;;  %v4403_v33 = vcombine.high %v4378_v10, %v4384_v11 }
 0xf35   : > { %v4410_v16 = vrot.slane %v4402_v13, %v6950_v58  ;;  %v4417_v17 = vrot.slane %v4403_v33, %v6950_v58 }
 0xf37   : > { %v4418_v18 = vcombine.low %v4394_v14, %v4410_v16  ;;  %v4419_v19 = vcombine.high %v4394_v14, %v4410_v16  ;;  %v4434_v20 = vcombine.low %v4401_v15, %v4417_v17  ;;  %v4435_v21 = vcombine.high %v4401_v15, %v4417_v17 }
 0xf39   : > { %v4426_v22 = vrot.slane %v4418_v18, %v6952_v61  ;;  %v4433_v23 = vrot.slane %v4419_v19, %v6952_v61  ;;  %v4442_v24 = vrot.slane %v4434_v20, %v6952_v61  ;;  %v4449_v25 = vrot.slane %v4435_v21, %v6952_v61 }
 0xf3b   : > { %v4454_v26 = vcombine.low %v4426_v22, %v4433_v23  ;;  %v6012_v28 = vcombine.high %v4426_v22, %v4433_v23  ;;  %v4470_v29 = vcombine.low %v4442_v24, %v4449_v25  ;;  %v6013_v30 = vcombine.high %v4442_v24, %v4449_v25 }
 0xf3d   : > { %v4461_v31 = vrot.slane %v4454_v26, %v6950_v58  ;;  %v4469_v32 = vrot.slane %v6012_v28, %v6950_v58  ;;  %v4477_v34 = vrot.slane %v4470_v29, %v6950_v58  ;;  %v4485_v35 = vrot.slane %v6013_v30, %v6950_v58 }
 0xf3f   : > { %v4486_v36 = vcombine.low %v4461_v31, %v4469_v32  ;;  %v4487_v37 = vcombine.high %v4461_v31, %v4469_v32  ;;  %v4502_v40 = vcombine.low %v4477_v34, %v4485_v35  ;;  %v4503_v59 = vcombine.high %v4477_v34, %v4485_v35  ;;  %v840_v35 = vld [vmem:[%s744_s8] sm:$0xff] }
 0xf41   : > { %v4494_v39 = vrot.slane %v4486_v36, %v6952_v61  ;;  %v4510_v38 = vrot.slane %v4502_v40, %v6952_v61  ;;  %v4501_v41 = vrot.slane %v4487_v37, %v6952_v61  ;;  %v4517_v42 = vrot.slane %v4503_v59, %v6952_v61  ;;  %v841_v36 = vld [vmem:[%s744_s8 + $0x8] sm:$0xff] }
 0xf43   : > { %v4518_v43 = vcombine.low %v4494_v39, %v4510_v38  ;;  %v4519_v44 = vcombine.high %v4494_v39, %v4510_v38  ;;  %v4520_v45 = vcombine.low %v4501_v41, %v4517_v42  ;;  %v4521_v46 = vcombine.high %v4501_v41, %v4517_v42  ;;  %v843_v42 = vld [vmem:[%s744_s8 + $0x18] sm:$0xff] }
 0xf45   : > { %6376 = vmatpush3.xpose.msk.msra.mxu0 %vm1474_vm4, %v4518_v43  ;;  %6381 = vmatpush3.xpose.msk.msra.mxu1 %vm1474_vm4, %v4519_v44  ;;  %v842_v43 = vld [vmem:[%s744_s8 + $0x10] sm:$0xff]  ;;  %s730_s8 = scalar_lea.vmem [#allocation2], %s729_s10 }
 0xf46   : > { %6385 = vmatprep.subr.mxu0 %v6679_v2  ;;  %6390 = vmatprep.subr.mxu1 %v6679_v2  ;;  %s5803_s1 = sshll.u32 %s730_s8, 4  ;;  %s7636_s1 = int_to_ptr.vmem [resolvable:$true] %s5803_s1 }
 0xfea   : > { %v4108_v48 = vpop.f32.mrb[36].mxu1 }
 0xfeb   : > { %v6357_v49 = vpop.f32.mrb[37].mxu1  ;;  %4234 = vrot.lane.b32.xlu1 %v4108_v48, %s7754_s0  ;;  %4231 = vrot.lane.b32.xlu0 %v4108_v48, %s7753_s28 }
 0xfec   : > { %v4111_v50 = vpop.f32.mrb[38].mxu1 }
 0xfed   : > { %v6358_v51 = vpop.f32.mrb[39].mxu1 }
 0xfef   : > { %4237 = vrot.lane.b32.xlu0 %v4108_v48, %s7755_s29 }
 0xff2   : > { %v7440_v52 = vpop.f32.mrb[40].mxu1 }
 0xff3   : > { %v6373_v53 = vpop.f32.mrb[41].mxu1 }
 0xff4   : > { %v4227_v54 = vpop.f32.mrb[42].mxu1 }
 0xff5   : > { %v6374_v12 = vpop.f32.mrb[43].mxu1 }
0x105d   : > { %v4235_v55 = vpop.permute.xlu1 %4234  ;;  %v4232_v56 = vpop.permute.xlu0 %4231 }
0x105e   : > { %v4240_v57 = vcombine.low %v4108_v48, %v4235_v55  ;;  %v4241_v60 = vcombine.high %v4108_v48, %v4235_v55 }
0x1060   : > { %v4248_v27 = vrot.slane %v4240_v57, %v6950_v58  ;;  %v4255_v3 = vrot.slane %v4241_v60, %v6950_v58 }
0x1061   : > { %v4238_v62 = vpop.permute.xlu0 %4237 }
0x1062   : > { %v4256_v63 = vcombine.low %v4232_v56, %v4238_v62  ;;  %v4257_v1 = vcombine.high %v4232_v56, %v4238_v62 }
0x1064   : > { %v4264_v4 = vrot.slane %v4256_v63, %v6950_v58  ;;  %v4271_v5 = vrot.slane %v4257_v1, %v6950_v58 }
0x1066   : > { %v4272_v0 = vcombine.low %v4248_v27, %v4264_v4  ;;  %v4273_v6 = vcombine.high %v4248_v27, %v4264_v4  ;;  %v4288_v7 = vcombine.low %v4255_v3, %v4271_v5  ;;  %v4289_v8 = vcombine.high %v4255_v3, %v4271_v5 }
0x1068   : > { %v4280_v9 = vrot.slane %v4272_v0, %v6952_v61  ;;  %v4287_v10 = vrot.slane %v4273_v6, %v6952_v61  ;;  %v4296_v11 = vrot.slane %v4288_v7, %v6952_v61  ;;  %v4303_v13 = vrot.slane %v4289_v8, %v6952_v61 }
0x106a   : > { %v4308_v33 = vcombine.low %v4280_v9, %v4287_v10  ;;  %v6010_v14 = vcombine.high %v4280_v9, %v4287_v10  ;;  %v4324_v15 = vcombine.low %v4296_v11, %v4303_v13  ;;  %v6011_v16 = vcombine.high %v4296_v11, %v4303_v13 }
0x106c   : > { %v4315_v17 = vrot.slane %v4308_v33, %v6950_v58  ;;  %v4323_v18 = vrot.slane %v6010_v14, %v6950_v58  ;;  %v4331_v19 = vrot.slane %v4324_v15, %v6950_v58  ;;  %v4339_v20 = vrot.slane %v6011_v16, %v6950_v58 }
0x106e   : > { %v4340_v21 = vcombine.low %v4315_v17, %v4323_v18  ;;  %v4341_v22 = vcombine.high %v4315_v17, %v4323_v18  ;;  %v4356_v23 = vcombine.low %v4331_v19, %v4339_v20  ;;  %v4357_v24 = vcombine.high %v4331_v19, %v4339_v20 }
0x1070   : > { %v4348_v25 = vrot.slane %v4340_v21, %v6952_v61  ;;  %v4364_v26 = vrot.slane %v4356_v23, %v6952_v61  ;;  %v4355_v30 = vrot.slane %v4341_v22, %v6952_v61  ;;  %v4371_v31 = vrot.slane %v4357_v24, %v6952_v61 }
0x1072   : > { %v4372_v28 = vcombine.low %v4348_v25, %v4364_v26  ;;  %v4373_v29 = vcombine.high %v4348_v25, %v4364_v26  ;;  %v4374_v32 = vcombine.low %v4355_v30, %v4371_v31  ;;  %v4375_v34 = vcombine.high %v4355_v30, %v4371_v31 }
0x1074   : > { %6378 = vmatmul.mubr.msk.f32.vlgmr.msra.gmra.mrb[48].mxu0 %vm1474_vm4, %v4372_v28  ;;  %6383 = vmatmul.mubr.msk.f32.vlgmr.msra.gmra.mrb[44].mxu1 %vm1474_vm4, %v4373_v29 }
0x1075   : > { %6386 = vmatpush3.xpose.msk.msra.mxu0 %vm1474_vm4, %v4520_v45  ;;  %6391 = vmatpush3.xpose.msk.msra.mxu1 %vm1474_vm4, %v4521_v46 }
0x1076   : > { %6387 = vmatprep.mubr.msk.f32.mxu0 %vm6680_vm0, %v6679_v2  ;;  %6392 = vmatprep.mubr.msk.f32.mxu1 %vm6680_vm0, %v6679_v2 }
0x1077   : > { %6395 = vmatprep.subr.mxu0 %v6679_v2  ;;  %6400 = vmatprep.subr.mxu1 %v6679_v2 }
0x1078   : > { %6388 = vmatmul.mubr.msk.f32.vlgmr.msra.gmra.mrb[50].mxu0 %vm1474_vm4, %v4374_v32  ;;  %6393 = vmatmul.mubr.msk.f32.vlgmr.msra.gmra.mrb[46].mxu1 %vm1474_vm4, %v4375_v34 }
0x1079   : > { %6397 = vmatprep.mubr.msk.f32.mxu0 %vm6680_vm0, %v6679_v2  ;;  %6402 = vmatprep.mubr.msk.f32.mxu1 %vm6680_vm0, %v6679_v2 }
0x1147   : > { %v4740_v37 = vpop.f32.mrb[48].mxu0  ;;  %v4816_v40 = vpop.f32.mrb[44].mxu1 }
0x1148   : > { %v4741_v59 = vadd.f32 %v4740_v37, %v840_v35  ;;  %v4817_v39 = vadd.f32 %v4816_v40, %v841_v36  ;;  %v6379_v38 = vpop.f32.mrb[49].mxu0  ;;  %v6384_v41 = vpop.f32.mrb[45].mxu1 }
0x114a   : > { %v4975_v44 = vsel %vm1474_vm4, %v4817_v39, -inf  ;;  %v4972_v45 = vsel %vm1474_vm4, %v4741_v59, -inf }
0x114b   : > { %4976 = vmax.xlane.f32.xlu0 %v4975_v44  ;;  %v4968_v46 = vpop.f32.mrb[46].mxu1  ;;  %4973 = vmax.xlane.f32.xlu1 %v4972_v45  ;;  %v4892_v48 = vpop.f32.mrb[50].mxu0 }
0x114c   : > { %v4969_v49 = vadd.f32 %v4968_v46, %v843_v42  ;;  %v4893_v50 = vadd.f32 %v4892_v48, %v842_v43  ;;  %v6389_v51 = vpop.f32.mrb[51].mxu0  ;;  %v6394_v53 = vpop.f32.mrb[47].mxu1 }
0x114e   : > { %v4981_v54 = vsel %vm1474_vm4, %v4969_v49, -inf  ;;  %v4978_v12 = vsel %vm1474_vm4, %v4893_v50, -inf }
0x114f   : > { %4982 = vmax.xlane.f32.xlu1 %v4981_v54  ;;  %4979 = vmax.xlane.f32.xlu0 %v4978_v12 }
0x11d8   : > { %v4977_v55 = vpop.xlane.xlu0 %4976  ;;  %v4974_v56 = vpop.xlane.xlu1 %4973 }
0x11d9   : > { %v4985_v57 = vsub.f32 %v4817_v39, %v4977_v55  ;;  %v4984_v60 = vsub.f32 %v4741_v59, %v4974_v56 }
0x11db   : > { %v4990_v62 = vmul.f32 1.442695, %v4985_v57  ;;  %v4988_v63 = vmul.f32 1.442695, %v4984_v60 }
0x11dc   : > { %v4980_v1 = vpop.xlane.xlu0 %4979  ;;  %v4983_v9 = vpop.xlane.xlu1 %4982 }
0x11dd   : > { %6589 = vpow2.f32 %v4990_v62  ;;  %v4986_v27 = vsub.f32 %v4893_v50, %v4980_v1  ;;  %v4987_v10 = vsub.f32 %v4969_v49, %v4983_v9 }
0x11de   : > { %6591 = vpow2.f32 %v4988_v63 }
0x11df   : > { %v4992_v3 = vmul.f32 1.442695, %v4986_v27  ;;  %v4994_v11 = vmul.f32 1.442695, %v4987_v10 }
0x11e1   : > { %6593 = vpow2.f32 %v4992_v3 }
0x11e2   : > { %6595 = vpow2.f32 %v4994_v11 }
0x11e7   : > { %v7483_v4 = vpop.eup %6589 }
0x11e8   : > { %v7485_v5 = vpop.eup %6591  ;;  %v4999_v0 = vsel %vm1474_vm4, %v7483_v4, 0.0 }
0x11e9   : > { %5000 = vadd.xlane.f32.xlu1 %v4999_v0  ;;  %v4996_v6 = vsel %vm1474_vm4, %v7485_v5, 0.0 }
0x11ea   : > { %4997 = vadd.xlane.f32.xlu0 %v4996_v6 }
0x11eb   : > { %v7491_v7 = vpop.eup %6593 }
0x11ec   : > { %v5002_v8 = vsel %vm1474_vm4, %v7491_v7, 0.0  ;;  %v7499_v13 = vpop.eup %6595 }
0x11ed   : > { %v5005_v33 = vsel %vm1474_vm4, %v7499_v13, 0.0 }
0x11ee   : > { %5003 = vadd.xlane.f32.xlu0 %v5002_v8 }
0x11fa   : > { %4526 = vrot.lane.b32.xlu1 %v7440_v52, %s7754_s0 }
0x1204   : > { %4523 = vrot.lane.b32.xlu0 %v7440_v52, %s7753_s28 }
0x121e   : > { %5006 = vadd.xlane.f32.xlu1 %v5005_v33 }
0x122f   : > { %4529 = vrot.lane.b32.xlu1 %v7440_v52, %s7755_s29  ;;  %s7634_s29 = scalar_lea.hbm %s7699_s23, %s6051_s4 }
0x1276   : > { %v5001_v14 = vpop.xlane.xlu1 %5000 }
0x1277   : > { %v4998_v15 = vpop.xlane.xlu0 %4997  ;;  %6597 = vrcp.f32 %v5001_v14 }
0x1278   : > { %6599 = vrcp.f32 %v4998_v15 }
0x127a   : > { %v4527_v16 = vpop.permute.xlu1 %4526 }
0x127b   : > { %v5004_v17 = vpop.xlane.xlu0 %5003  ;;  %v4532_v19 = vcombine.low %v7440_v52, %v4527_v16  ;;  %v4533_v20 = vcombine.high %v7440_v52, %v4527_v16 }
0x127c   : > { %6601 = vrcp.f32 %v5004_v17 }
0x127d   : > { %v4540_v25 = vrot.slane %v4532_v19, %v6950_v58  ;;  %v4547_v26 = vrot.slane %v4533_v20, %v6950_v58 }
0x127f   : > { %v4524_v21 = vpop.permute.xlu0 %4523 }
0x1281   : > { %v6598_v45 = vpop.eup %6597 }
0x1282   : > { %v6600_v51 = vpop.eup %6599  ;;  %v5013_v63 = vmul.f32 %v6598_v45, %v7483_v4 }
0x1283   : > { %v5012_v1 = vmul.f32 %v6600_v51, %v7485_v5 }
0x1286   : > { %v6602_v12 = vpop.eup %6601 }
0x1287   : > { %v5014_v0 = vmul.f32 %v6602_v12, %v7491_v7 }
0x12ab   : > { %v5007_v18 = vpop.xlane.xlu1 %5006 }
0x12ac   : > { %6603 = vrcp.f32 %v5007_v18 }
0x12af   : > { %v4530_v22 = vpop.permute.xlu1 %4529 }
0x12b0   : > { %v4548_v23 = vcombine.low %v4524_v21, %v4530_v22  ;;  %v4549_v24 = vcombine.high %v4524_v21, %v4530_v22 }
0x12b2   : > { %v4556_v28 = vrot.slane %v4548_v23, %v6950_v58  ;;  %v4563_v29 = vrot.slane %v4549_v24, %v6950_v58 }
0x12b4   : > { %v4564_v30 = vcombine.low %v4540_v25, %v4556_v28  ;;  %v4565_v31 = vcombine.high %v4540_v25, %v4556_v28  ;;  %v4580_v32 = vcombine.low %v4547_v26, %v4563_v29  ;;  %v4581_v34 = vcombine.high %v4547_v26, %v4563_v29  ;;  %v6537_v25 = vld [vmem:[%s7694_s18] sm:$0xff]  }
0x12b6   : > { %v4572_v52 = vrot.slane %v4564_v30, %v6952_v61  ;;  %v4579_v35 = vrot.slane %v4565_v31, %v6952_v61  ;;  %v4588_v36 = vrot.slane %v4580_v32, %v6952_v61  ;;  %v4595_v37 = vrot.slane %v4581_v34, %v6952_v61  ;;  %v6604_v62 = vpop.eup %6603 }
0x12b7   : > { %v5015_v6 = vmul.f32 %v6604_v62, %v7499_v13 }
0x12b8   : > { %v4600_v40 = vcombine.low %v4572_v52, %v4579_v35  ;;  %v6014_v59 = vcombine.high %v4572_v52, %v4579_v35  ;;  %v4616_v39 = vcombine.low %v4588_v36, %v4595_v37  ;;  %v6015_v38 = vcombine.high %v4588_v36, %v4595_v37  ;;  %v6538_v35 = vld [vmem:[%s7694_s18 + $0x8] sm:$0xff]  }
0x12ba   : > { %v4607_v41 = vrot.slane %v4600_v40, %v6950_v58  ;;  %v4615_v42 = vrot.slane %v6014_v59, %v6950_v58  ;;  %v4623_v43 = vrot.slane %v4616_v39, %v6950_v58  ;;  %v4631_v44 = vrot.slane %v6015_v38, %v6950_v58 }
0x12bc   : > { %v4632_v46 = vcombine.low %v4607_v41, %v4615_v42  ;;  %v4648_v48 = vcombine.low %v4623_v43, %v4631_v44  ;;  %v4633_v49 = vcombine.high %v4607_v41, %v4615_v42  ;;  %v4649_v50 = vcombine.high %v4623_v43, %v4631_v44 }
0x12be   : > { %v4640_v53 = vrot.slane %v4632_v46, %v6952_v61  ;;  %v4656_v54 = vrot.slane %v4648_v48, %v6952_v61  ;;  %v4647_v55 = vrot.slane %v4633_v49, %v6952_v61  ;;  %v4663_v56 = vrot.slane %v4649_v50, %v6952_v61 }
0x12c0   : > { %v4664_v57 = vcombine.low %v4640_v53, %v4656_v54  ;;  %v4665_v60 = vcombine.high %v4640_v53, %v4656_v54  ;;  %v4666_v27 = vcombine.low %v4647_v55, %v4663_v56  ;;  %v4667_v3 = vcombine.high %v4647_v55, %v4663_v56 }
0x12c2   : > { %6396 = vmatpush3.msra.mxu0 %v4664_v57  ;;  %6401 = vmatpush3.msra.mxu1 %v4665_v60 }
0x12c3   : > { %6398 = vmatmul.mubr.msk.f32.vlgmr.msra.gmra.mrb[52].mxu0 %vm1474_vm4, %v5012_v1  ;;  %6403 = vmatmul.mubr.msk.f32.vlgmr.msra.gmra.mrb[48].mxu1 %vm1474_vm4, %v5013_v63 }
0x12c4   : > { %6405 = vmatprep.subr.mxu0 %v6679_v2  ;;  %6410 = vmatprep.subr.mxu1 %v6679_v2 }
0x12c5   : > { %6406 = vmatpush3.msra.mxu0 %v4666_v27  ;;  %6411 = vmatpush3.msra.mxu1 %v4667_v3 }
0x12c6   : > { %6407 = vmatprep.mubr.msk.f32.mxu0 %vm6680_vm0, %v6679_v2  ;;  %6412 = vmatprep.mubr.msk.f32.mxu1 %vm6680_vm0, %v6679_v2 }
0x12c7   : > { %6408 = vmatmul.mubr.msk.f32.vlgmr.msra.gmra.mrb[54].mxu0 %vm1474_vm4, %v5014_v0  ;;  %6413 = vmatmul.mubr.msk.f32.vlgmr.msra.gmra.mrb[50].mxu1 %vm1474_vm4, %v5015_v6  ;;  %v6539_v0 = vld [vmem:[%s7696_s20] sm:$0xff]   ;;  %v6540_v6 = vld [vmem:[%s7696_s20 + $0x10] sm:$0xff]  }
0x12c8   : > { %6415 = vmatprep.subr.bf16.mxu0 %v6679_v2  ;;  %6419 = vmatprep.mubr.msk.bf16.mxu0 %vm6680_vm0, %v6679_v2 }
0x12c9   : > { %6423 = vmatprep.subr.bf16.mxu1 %v6679_v2  ;;  %6427 = vmatprep.mubr.msk.bf16.mxu1 %vm6680_vm0, %v6679_v2 }
0x12ca   : > { %6416 = vmatpush3.bf16.msra.mxu0 %v6537_v25  ;;  %6424 = vmatpush3.bf16.msra.mxu1 %v6539_v0 }
0x12cb   : > { %6417 = vmatprep.subr.bf16.mxu0 %v6679_v2  ;;  %6425 = vmatprep.subr.bf16.mxu1 %v6679_v2 }
0x12ce   : > { %6418 = vmatpush3.bf16.msra.mxu0 %v6538_v35 }
0x12cf   : > { %6431 = vmatprep.subr.bf16.mxu0 %v6679_v2 }
0x1396   : > { %v5085_v4 = vpop.f32.mrb[52].mxu0  ;;  %v5158_v5 = vpop.f32.mrb[48].mxu1 }
0x1397   : > { %v6399_v7 = vpop.f32.mrb[53].mxu0  ;;  %v6404_v8 = vpop.f32.mrb[49].mxu1 }
0x139a   : > { %v5231_v9 = vpop.f32.mrb[54].mxu0  ;;  %v5304_v10 = vpop.f32.mrb[50].mxu1 }
0x139b   : > { %v5308_v11 = vcombine.low %v5085_v4, %v5231_v9  ;;  %v5309_v13 = vcombine.high %v5085_v4, %v5231_v9  ;;  %v5324_v33 = vcombine.low %v5158_v5, %v5304_v10  ;;  %v5325_v14 = vcombine.high %v5158_v5, %v5304_v10  ;;  %v6409_v15 = vpop.f32.mrb[55].mxu0  ;;  %v6414_v16 = vpop.f32.mrb[51].mxu1  ;;  %v6542_v4 = vld [vmem:[%s7696_s20 + $0x18] sm:$0xff]   ;;  %v6033_v10 = vld [vmem:[%s7695_s19] ss:$0 sm:$0xff] }
0x139c   : > { %v6544_v15 = vld [vmem:[%s7697_s21 + $0x8] sm:$0xff]   ;;  %v6545_v16 = vld [vmem:[%s7697_s21 + $0x10] sm:$0xff]  }
0x139d   : > { %v5316_v17 = vrot.slane %v5308_v11, %v6950_v58  ;;  %v5323_v18 = vrot.slane %v5309_v13, %v6950_v58  ;;  %v5332_v19 = vrot.slane %v5324_v33, %v6950_v58  ;;  %v5339_v20 = vrot.slane %v5325_v14, %v6950_v58  ;;  %v6543_v14 = vld [vmem:[%s7697_s21] sm:$0xff]  }
0x139f   : > { %v5340_v21 = vcombine.low %v5316_v17, %v5332_v19  ;;  %v5341_v22 = vcombine.high %v5316_v17, %v5332_v19  ;;  %v5356_v23 = vcombine.low %v5323_v18, %v5339_v20  ;;  %v5357_v24 = vcombine.high %v5323_v18, %v5339_v20  ;;  %v6546_v17 = vld [vmem:[%s7697_s21 + $0x18] sm:$0xff]  }
0x13a1   : > { %v5348_v26 = vrot.slane %v5340_v21, %v6952_v61  ;;  %v5355_v28 = vrot.slane %v5341_v22, %v6952_v61  ;;  %v5364_v29 = vrot.slane %v5356_v23, %v6952_v61  ;;  %v5371_v30 = vrot.slane %v5357_v24, %v6952_v61 }
0x13a3   : > { %v5376_v31 = vcombine.low %v5348_v26, %v5355_v28  ;;  %v6028_v32 = vcombine.high %v5348_v26, %v5355_v28  ;;  %v5392_v34 = vcombine.low %v5364_v29, %v5371_v30  ;;  %v6029_v52 = vcombine.high %v5364_v29, %v5371_v30 }
0x13a5   : > { %v5383_v36 = vrot.slane %v5376_v31, %v6950_v58  ;;  %v5391_v37 = vrot.slane %v6028_v32, %v6950_v58  ;;  %v5399_v40 = vrot.slane %v5392_v34, %v6950_v58  ;;  %v5407_v59 = vrot.slane %v6029_v52, %v6950_v58 }
0x13a7   : > { %v5409_v39 = vcombine.high %v5383_v36, %v5391_v37  ;;  %v5425_v38 = vcombine.high %v5399_v40, %v5407_v59  ;;  %v5408_v41 = vcombine.low %v5383_v36, %v5391_v37  ;;  %v5424_v42 = vcombine.low %v5399_v40, %v5407_v59  ;;  %v6613_v40 = vld [vmem:[%s6875_s26] sm:$0xff] }
0x13a8   : > { %vm5756_vm7 = vcmp.ne.s32.totalorder %v6613_v40, 1 }
0x13a9   : > { %v5423_v43 = vrot.slane %v5409_v39, %v6952_v61  ;;  %v5439_v44 = vrot.slane %v5425_v38, %v6952_v61  ;;  %v5416_v45 = vrot.slane %v5408_v41, %v6952_v61  ;;  %v5432_v46 = vrot.slane %v5424_v42, %v6952_v61 }
0x13aa   : > { %v6050_v59 = vsel %vm5756_vm7, 1.0, %v6679_v2 }
0x13ab   : > { %v5442_v48 = vcombine.low %v5423_v43, %v5439_v44  ;;  %v5441_v49 = vcombine.high %v5416_v45, %v5432_v46  ;;  %v5443_v50 = vcombine.high %v5423_v43, %v5439_v44  ;;  %v5440_v51 = vcombine.low %v5416_v45, %v5432_v46 }
0x13ac   : > { %v5773_v39 = vsel %vm5772_vm8, %v6050_v59, 0.0 }
0x13ad   : > { %5449 = vrot.lane.b32.xlu1 %v5442_v48, %s7758_s24  ;;  %5445 = vrot.lane.b32.xlu0 %v5441_v49, %s7759_s3  ;;  %v5774_v38 = vrot.slane %v5773_v39, 4  ;;  %s5791_s24 = scalar_lea.sflag [#allocation3], %s729_s10  ;;  %s6614_s3 = scalar_lea.vmem %s7636_s1, 16 }
0x13ae   : > { %p6615_p11 = scmp.ne.s32.totalorder %s7636_s1, %s6614_s3 }
0x13af   : > { %v5775_v41 = vadd.f32 %v5774_v38, %v5773_v39 }
0x13b0   : > { %p6616_p12 = pnand %p6615_p11, %p6848_p5 }
0x13b1   : > { %5453 = vrot.lane.b32.xlu0 %v5443_v50, %s7760_s2  ;;  %v5776_v42 = vrot.slane %v5775_v41, 2  ;;  %s6618_s2 = sshll.u32 %s6689_s5, 4  ;;  %s6619_s2 = int_to_ptr.vmem [resolvable:$false] %s6618_s2 }
0x13b2   : > { %p6617_p13 = pneg %p6616_p12  ;;  %s6620_s9 = scalar_lea.vmem %s6619_s2, 32 }
0x13b3   : > { %v5777_v43 = vadd.f32 %v5776_v42, %v5775_v41  ;;  %p6621_p0 = scmp.lt.s32.totalorder %s7636_s1, %s6619_s2  ;;  %p6622_p1 = scmp.lt.s32.totalorder %s6620_s9, %s6614_s3 }
0x13b5   : > { %v5778_v44 = vrot.slane %v5777_v43, 1  ;;  %p6623_p2 = por %p6622_p1, %p6621_p0 }
0x13b7   : > { %v5779_v45 = vadd.f32 %v5778_v44, %v5777_v43  ;;  %p6624_p3 = pnand %p6623_p2, %p6617_p13 }
0x13b9   : > { %v5780_v46 = vmax.f32 %v5779_v45, 1.0 }
0x141f   : > { %v5446_v58 = vpop.permute.xlu0 %5445  ;;  %v5450_v53 = vpop.permute.xlu1 %5449 }
0x1420   : > { %v5456_v54 = vsel %vm1474_vm4, %v5440_v51, %v5446_v58 }
0x1421   : > { %v5457_v55 = vsel %vm2264_vm5, %v5456_v54, %v5450_v53 }
0x1423   : > { %v5454_v12 = vpop.permute.xlu0 %5453 }
0x1424   : > { %v5458_v56 = vsel %vm2266_vm6, %v5457_v55, %v5454_v12 }
0x1425   : > { %v5463_v61 = vpack.c.bf16 %v5458_v56, %v5458_v56 }
0x1427   : > { %6420 = vmatmul.mubr.msk.bf16.vlgmr.msra.gmra.mrb[56].mxu0 %vm846_vm3, %v5463_v61  ;;  %v6049_v61 = vld [vmem:[%s7698_s22] ss:$0 sm:$0xff] }
0x1428   : > { %6435 = vmatprep.mubr.msk.bf16.mxu0 %vm6680_vm0, %v6679_v2  ;;  %6432 = vmatpush3.bf16.msra.mxu0 %v6540_v6 }
0x1429   : > { %6433 = vmatprep.subr.bf16.mxu0 %v6679_v2 }
0x142c   : > { %6434 = vmatpush3.bf16.msra.mxu0 %v6542_v4 }
0x14fa   : > { %v5513_v57 = vpop.f32.mrb[56].mxu0 }
0x14fb   : > { %v7577_v60 = vadd.f32 %v5513_v57, %v7383_v47  ;;  %v6421_v62 = vpop.f32.mrb[57].mxu0  ;;  %v6541_v47 = vld [vmem:[%s7696_s20 + $0x8] sm:$0xff]  }
0x14fc   : > { %v5516_v63 = vpop.f32.mrb[58].mxu0  ;;  %6426 = vmatpush3.bf16.msra.mxu1 %v6541_v47 }
0x14fd   : > { %v6422_v1 = vpop.f32.mrb[59].mxu0  ;;  %v5521_v27 = vmul.f32 %v7577_v60, %v7577_v60  ;;  %6439 = vmatprep.subr.bf16.mxu1 %v6679_v2 }
0x14ff   : > { %v5522_v3 = vsel %vm846_vm3, %v5521_v27, 0.0 }
0x1500   : > { %5523 = vadd.xlane.f32.xlu1 %v5522_v3 }
0x1511   : > { %5783 = vperm.xlu1 %6502, %v5780_v46  }
0x158d   : > { %v5524_v5 = vpop.xlane.xlu1 %5523 }
0x158e   : > { %v5525_v7 = vmul.f32 0.03125, %v5524_v5 }
0x1590   : > { %v5526_v8 = vadd.f32 1e-06, %v5525_v7 }
0x1591   : > { %v5784_v63 = vpop.permute.xlu1 %5783 }
0x1592   : > { %6605 = vrsqrt.f32 %v5526_v8 }
0x159c   : > { %v6606_v9 = vpop.eup %6605 }
0x159d   : > { %v5528_v11 = vmul.f32 %v6606_v9, %v7577_v60 }
0x159f   : > { %v5535_v13 = vmul.f32 %v6033_v10, %v5528_v11 }
0x15a1   : > { %v5536_v33 = vpack.c.bf16 %v5535_v13, %v5535_v13 }
0x15a3   : > { %6428 = vmatmul.mubr.msk.bf16.vlgmr.msra.gmra.mrb[52].mxu1 %vm846_vm3, %v5536_v33  ;;  %6436 = vmatmul.mubr.msk.bf16.vlgmr.msra.gmra.mrb[60].mxu0 %vm846_vm3, %v5536_v33 }
0x15a4   : > { %6447 = vmatprep.mubr.msk.bf16.mxu1 %vm6680_vm0, %v6679_v2  ;;  %6440 = vmatpush3.bf16.msra.mxu1 %v6543_v14 }
0x15a5   : > { %6441 = vmatprep.subr.bf16.mxu1 %v6679_v2 }
0x15a8   : > { %6442 = vmatpush3.bf16.msra.mxu1 %v6544_v15 }
0x15a9   : > { %6443 = vmatprep.subr.bf16.mxu1 %v6679_v2 }
0x15ac   : > { %6444 = vmatpush3.bf16.msra.mxu1 %v6545_v16 }
0x15ad   : > { %6445 = vmatprep.subr.bf16.mxu1 %v6679_v2 }
0x15b0   : > { %6446 = vmatpush3.bf16.msra.mxu1 %v6546_v17 }
0x1676   : > { %v5590_v18 = vpop.f32.mrb[52].mxu1  ;;  %v5656_v19 = vpop.f32.mrb[60].mxu0 }
0x1677   : > { %v5597_v20 = vmul.f32 0.044715, %v5590_v18  ;;  %v6429_v21 = vpop.f32.mrb[53].mxu1  ;;  %v6437_v22 = vpop.f32.mrb[61].mxu0  ;;  %v5596_v34 = vmul.f32 0.5, %v5590_v18 }
0x1678   : > { %v5593_v23 = vpop.f32.mrb[54].mxu1  ;;  %v5659_v24 = vpop.f32.mrb[62].mxu0 }
0x1679   : > { %v5598_v25 = vmul.f32 %v5597_v20, %v5590_v18  ;;  %v6430_v26 = vpop.f32.mrb[55].mxu1  ;;  %v6438_v28 = vpop.f32.mrb[63].mxu0 }
0x167b   : > { %v5599_v29 = vmul.f32 %v5598_v25, %v5590_v18 }
0x167d   : > { %v5600_v30 = vadd.f32 %v5599_v29, %v5590_v18 }
0x167f   : > { %v5601_v31 = vmul.f32 0.7978846, %v5600_v30 }
0x1681   : > { %6607 = vtanh.f32 %v5601_v31 }
0x168b   : > { %v6608_v32 = vpop.eup %6607 }
0x168c   : > { %v5603_v52 = vadd.f32 1.0, %v6608_v32 }
0x168e   : > { %v5604_v35 = vmul.f32 %v5603_v52, %v5596_v34 }
0x1690   : > { %v5662_v36 = vmul.f32 %v5656_v19, %v5604_v35 }
0x1692   : > { %v5671_v37 = vpack.c.bf16 %v5662_v36, %v5662_v36 }
0x1694   : > { %6448 = vmatmul.mubr.msk.bf16.vlgmr.msra.gmra.mrb[56].mxu1 %vm788_vm2, %v5671_v37 }
0x1767   : > { %v5733_v48 = vpop.f32.mrb[56].mxu1 }
0x1768   : > { %v5739_v49 = vadd.f32 %v5733_v48, %v7577_v60  ;;  %v6449_v50 = vpop.f32.mrb[57].mxu1 }
0x1769   : > { %v5736_v51 = vpop.f32.mrb[58].mxu1 }
0x176a   : > { %v6450_v58 = vpop.f32.mrb[59].mxu1  ;;  %v5741_v53 = vmul.f32 %v5739_v49, %v5739_v49 }
0x176c   : > { %v5742_v54 = vsel %vm846_vm3, %v5741_v53, 0.0 }
0x176d   : > { %5743 = vadd.xlane.f32.xlu0 %v5742_v54 }
0x1783   : > { %5761 = vperm.xlu0 %6501, %v6050_v59  }
0x17fa   : > { %v5744_v2 = vpop.xlane.xlu0 %5743 }
0x17fb   : > { %v5745_v12 = vmul.f32 0.03125, %v5744_v2 }
0x17fd   : > { %v5746_v55 = vadd.f32 1e-06, %v5745_v12 }
0x17ff   : > { %6609 = vrsqrt.f32 %v5746_v55 }
0x1800   : > { %6611 = vrcp.f32 %v5784_v63 }
0x1802   : > { %v5762_v62 = vpop.permute.xlu0 %5761 }
0x1809   : > { %v6610_v56 = vpop.eup %6609 }
0x180a   : > { %v5748_v57 = vmul.f32 %v6610_v56, %v5739_v49  ;;  %v6612_v5 = vpop.eup %6611 }
0x180c   : > { %v5755_v60 = vmul.f32 %v6049_v61, %v5748_v57 }
0x180e   : > { %v5764_v1 = vmul.f32 %v5762_v62, %v5755_v60 }
0x1810   : > { %v5765_v27 = vsel %vm846_vm3, %v5764_v1, 0.0 }
0x1811   : > { %v5766_v3 = vrot.slane %v5765_v27, 4 }
0x1813   : > { %v5767_v0 = vadd.f32 %v5766_v3, %v5765_v27 }
0x1815   : > { %v5768_v6 = vrot.slane %v5767_v0, 2 }
0x1817   : > { %v5769_v47 = vadd.f32 %v5768_v6, %v5767_v0 }
0x1819   : > { %v5770_v4 = vrot.slane %v5769_v47, 1 }
0x181b   : > { %v5771_v7 = vadd.f32 %v5770_v4, %v5769_v47 }
0x181d   : > { %v5787_v8 = vmul.f32 %v6612_v5, %v5771_v7 }
0x181f   : > { %5789 = vst.msk [vmem:[%s730_s8] sm:$0x1] %vm5788_vm9, %v5787_v8 }
0x1820   : > { %6627 = shalt.err (!%p6624_p3)
}
0x1821   : > { %s6628_s11 = scalar_lea.hbm %s7634_s29, 16  ;;  %s6632_s10 = scalar_lea.hbm %s7699_s23, 32 }
0x1822   : > { %p6629_p4 = scmp.ne.s32.totalorder %s7634_s29, %s6628_s11  ;;  %p6633_p9 = scmp.lt.u32.totalorder %s7634_s29, %s7699_s23 }
0x1823   : > { %p6634_p10 = scmp.lt.u32.totalorder %s6632_s10, %s6628_s11  ;;  %p6636_p12 = scmp.lt.u32.totalorder %s6628_s11, %s7634_s29 }
0x1824   : > { %p6630_p7 = pnand %p6629_p4, %p6848_p5 }
0x1825   : > { %p6635_p11 = por %p6634_p10, %p6633_p9 }
0x1826   : > { %p6631_p8 = pneg %p6630_p7 }
0x1827   : > { %p6637_p13 = por %p6636_p12, %p6635_p11 }
0x1829   : > { %p6638_p0 = pnand %p6637_p13, %p6631_p8 }
0x182b   : > { %6641 = shalt.err (!%p6638_p0)
}
0x182c   : > { %6451 = dma.vmem_to_hbm [thread:$0]  (%p6848_p5), %s7636_s1, 16, %s7634_s29, %s5791_s24  }
0x182d PF: > { %s7764_s28 = sld [smem:[#allocation5_spill]]  ;;  %p6457_p1 = scmp.ge.s32.totalorder %s6676_s25, 2 }
0x182f   : > { %p6454_p2 = pnand %p6457_p1, %p6852_p6 }
0x1833   : > { %s5815_s3 = sand.u32 1, %s7764_s28  }
0x1834   : > { %s5816_s5 = scalar_lea.sflag [#allocation3], %s5815_s3 }
0x1835   : > { %6659 = dma.done.wait (!%p6454_p2), %s5816_s5, 16  }
0x1836   : > { %6661 = vsyncadd (!%p6454_p2), %s5816_s5, 4294967280  ;;  %s7766_s25 = sld [smem:[#allocation7_spill]]  ;;  %s7767_s2 = sld [smem:[#allocation6_spill]] }
0x1837   : > { %s7768_s24 = sld [smem:[#allocation8_spill]]  ;;  %s7769_s4 = smov %s6668_s30 }
0x183c   : > { %p33_p3 = scmp.ge.s32.totalorder %s7766_s25, 4   ;;  %s7770_s30 = smov %s7767_s2 }
0x183e   :  { %35 = sbr.rel (!%p33_p3) target bundleno = 16 (0x10), region = 160 }
0x1845   :  { %5820 = vsyncpa [#allocation3], 1 }
0x1846   :  { %5822 = vsyncpa [#allocation3 + $0x1], 1 }

</bundles_post_ra>
